<compile_context>
chip_gen: v5e
topology: v5e:2x2
jax: 0.10.0
libtpu: 0.0.40
codegen_flags: <defaults>
</compile_context>

<pallas_src>
import jax
import jax.numpy as jnp
from jax.experimental import pallas as pl
from jax.experimental.pallas import tpu as pltpu


def _round_up(x, m):
    return ((x + m - 1) // m) * m


# ----------------------------------------------------------------------------
# Fused kernel factory
# ----------------------------------------------------------------------------
def _make_fused_kernel(c, gc, h, w, l, alpha=0.2):
    """Kernel argument order:
         x_ref   : (1, c, l)        f32   flat, zero-padded (H+2,W+2) spatial + guard
         mask_ref: (1, mp)          f32   1.0 at valid output columns, 0.0 at the 2
                                          wrap-around columns per row
         w_i     : (9, cout_i, cin_i) f32 per-tap weight slabs (tap = ky*3 + kx)
         b_i     : (cout_i, 1)      f32
         out_ref : (1, c, mp)       f32   flat output (rows of length W+2; cols >= W garbage)
         state   : (c + 4*gc, l)    f32   VMEM scratch: [x, out1..out4] in padded flat layout
    """
    wp = w + 2                 # padded row stride
    mp = h * wp                # GEMM M (flat spatial incl. 2 garbage cols per row)
    interior = wp + 1          # flat offset of image pixel (0, 0) inside the padded layout
    c_tot = c + 4 * gc
    cins = [c + i * gc for i in range(5)]
    couts = [gc] * 4 + [c]

    def kernel(x_ref, mask_ref, w1, b1, w2, b2, w3, b3, w4, b4, w5, b5,
               out_ref, state_ref):
        w_refs = (w1, w2, w3, w4, w5)
        b_refs = (b1, b2, b3, b4, b5)

        # Zero the intermediate rows (establishes the conv zero-padding + guards for
        # out1..out4), then drop the already-padded x into rows [0:c].
        state_ref[c:c_tot, :] = jnp.zeros((c_tot - c, l), jnp.float32)
        state_ref[0:c, :] = x_ref[0]

        mask = mask_ref[...]                                   # (1, mp), hoisted once

        def conv(idx, activate):
            cin, cout = cins[idx], couts[idx]
            wr, br = w_refs[idx], b_refs[idx]
            acc = None
            # 9 taps, each a single GEMM over the FULL concatenated Cin (spatial on lanes).
            for t in range(9):
                ky, kx = divmod(t, 3)
                s = ky * wp + kx                               # contiguous static slice
                contrib = jnp.dot(wr[t], state_ref[0:cin, s:s + mp],
                                  preferred_element_type=jnp.float32)
                acc = contrib if acc is None else acc + contrib
            acc = acc + br[...]                                # (cout, 1) broadcast
            if activate:
                # ELU(alpha): x if x > 0 else alpha*(exp(x)-1); exp goes to the EUP slot.
                neg = alpha * (jnp.exp(jnp.minimum(acc, 0.0)) - 1.0)
                acc = jnp.where(acc > 0.0, acc, neg)
            return acc                                         # (cout, mp)

        # conv1..conv4 (+ELU): write each result back into the dense state (masked so the
        # two wrap-around columns per row land as zeros = the conv padding of later convs).
        for i in range(4):
            y = conv(i, True)
            c0 = c + i * gc
            state_ref[c0:c0 + gc, interior:interior + mp] = y * mask

        # conv5 (no activation) fused with the residual epilogue: out5*0.2 + identity.
        out5 = conv(4, False)
        identity = state_ref[0:c, interior:interior + mp]      # x, same flat layout
        out_ref[0] = out5 * 0.2 + identity

    return kernel


# ----------------------------------------------------------------------------
# Parameters (PyTorch nn.Conv2d layout: OIHW weights, per-channel bias)
# ----------------------------------------------------------------------------
def init_params(key, channels, growth_channels, dtype=jnp.float32):
    in_chs = [channels + i * growth_channels for i in range(5)]
    out_chs = [growth_channels] * 4 + [channels]
    params = []
    for cin, cout in zip(in_chs, out_chs):
        key, kw, kb = jax.random.split(key, 3)
        bound = 1.0 / float((cin * 9) ** 0.5)
        wgt = jax.random.uniform(kw, (cout, cin, 3, 3), dtype, -bound, bound)
        b = jax.random.uniform(kb, (cout,), dtype, -bound, bound)
        params.append((wgt, b))
    return params


# ----------------------------------------------------------------------------
# Wrapper
# ----------------------------------------------------------------------------
def residual_dense_block(x_nchw, params):
    """x_nchw: (N, C, H, W) float32 -> (N, C, H, W) float32."""
    n, c, h, w = x_nchw.shape
    gc = params[0][0].shape[0]
    c_tot = c + 4 * gc
    hp, wp = h + 2, w + 2
    mp = h * wp
    l = _round_up(hp * wp + 2, 128)        # flat length incl. guard, lane-aligned

    # Pad once (height+width by 1, conv zero-padding), flatten spatial, pad to l.
    xp = jnp.pad(x_nchw.astype(jnp.float32), ((0, 0), (0, 0), (1, 1), (1, 1)))
    x_flat = jnp.pad(xp.reshape(n, c, hp * wp), ((0, 0), (0, 0), (0, l - hp * wp)))

    # Valid-column mask for the flat (row stride W+2) output layout.
    mask = ((jnp.arange(mp) % wp) < w).astype(jnp.float32).reshape(1, mp)

    # Weights -> per-tap slabs (9, Cout, Cin); biases -> (Cout, 1).
    w_slabs, biases = [], []
    for wt, b in params:
        co, ci = int(wt.shape[0]), int(wt.shape[1])
        w_slabs.append(jnp.transpose(wt, (2, 3, 0, 1)).reshape(9, co, ci)
                       .astype(jnp.float32))
        biases.append(b.astype(jnp.float32).reshape(co, 1))

    kernel = _make_fused_kernel(c, gc, h, w, l)

    in_specs = [pl.BlockSpec((1, c, l), lambda i: (i, 0, 0)),
                pl.BlockSpec((1, mp), lambda i: (0, 0))]
    args = [x_flat, mask]
    for ws, bs in zip(w_slabs, biases):
        in_specs.append(pl.BlockSpec(ws.shape, lambda i: (0, 0, 0)))
        in_specs.append(pl.BlockSpec(bs.shape, lambda i: (0, 0)))
        args.extend([ws, bs])

    flops = 2 * n * mp * 9 * sum(int(ws.shape[1]) * int(ws.shape[2]) for ws in w_slabs)
    transcendentals = n * mp * gc * 4
    bytes_accessed = (sum(int(a.size) * a.dtype.itemsize for a in args)
                      + n * c * mp * 4)

    # VMEM: dense state + double-buffered x/out blocks + resident weights + temps.
    vmem_bytes = 4 * (c_tot * l + 2 * c * l + 2 * c * mp + 2 * mp
                      + sum(int(ws.size) for ws in w_slabs)
                      + 6 * max(c, gc) * mp)
    vmem_limit = int(min(48 * 1024 * 1024, max(8 * 1024 * 1024, 2 * vmem_bytes)))

    out_flat = pl.pallas_call(
        kernel,
        out_shape=jax.ShapeDtypeStruct((n, c, mp), jnp.float32),
        grid=(n,),
        in_specs=in_specs,
        out_specs=pl.BlockSpec((1, c, mp), lambda i: (i, 0, 0)),
        scratch_shapes=[pltpu.VMEM((c_tot, l), jnp.float32)],
        compiler_params=pltpu.CompilerParams(
            dimension_semantics=("parallel",),
            vmem_limit_bytes=vmem_limit),
        cost_estimate=pl.CostEstimate(flops=flops,
                                      transcendentals=transcendentals,
                                      bytes_accessed=bytes_accessed),
    )(*args)

    # Drop the 2 garbage columns per row, recover NCHW.
    return out_flat.reshape(n, c, h, wp)[:, :, :, :w]


# ----------------------------------------------------------------------------
# Pure-JAX reference (lax conv, HIGHEST precision) for a correctness check
# ----------------------------------------------------------------------------
def _elu(x, alpha=0.2):
    return jnp.where(x > 0.0, x, alpha * (jnp.exp(jnp.minimum(x, 0.0)) - 1.0))


def _ref_conv(x, wgt, b):
    y = jax.lax.conv_general_dilated(
        x, wgt, window_strides=(1, 1), padding=((1, 1), (1, 1)),
        dimension_numbers=("NCHW", "OIHW", "NCHW"),
        precision=jax.lax.Precision.HIGHEST)
    return y + b[None, :, None, None]


def _ref_block(x, params):
    (w1, b1), (w2, b2), (w3, b3), (w4, b4), (w5, b5) = params
    o1 = _elu(_ref_conv(x, w1, b1))
    o2 = _elu(_ref_conv(jnp.concatenate([x, o1], 1), w2, b2))
    o3 = _elu(_ref_conv(jnp.concatenate([x, o1, o2], 1), w3, b3))
    o4 = _elu(_ref_conv(jnp.concatenate([x, o1, o2, o3], 1), w4, b4))
    o5 = _ref_conv(jnp.concatenate([x, o1, o2, o3, o4], 1), w5, b5)   # no ELU
    return o5 * 0.2 + x


if __name__ == "__main__":
    batch, channels, growth_channels, spatial = 2, 16, 8, 16

    key = jax.random.PRNGKey(0)
    key, kx = jax.random.split(key)
    x_nchw = jax.random.normal(kx, (batch, channels, spatial, spatial), jnp.float32)
    params = init_params(key, channels, growth_channels)

    fwd = jax.jit(residual_dense_block)
    out = jax.block_until_ready(fwd(x_nchw, params))
    assert out.shape == (batch, channels, spatial, spatial)

    ref = jax.block_until_ready(_ref_block(x_nchw, params))
    # MXU matmul rounding (default f32 matmul passes) vs HIGHEST lax conv, compounded
    # over 5 cascaded convs -> keep a conservative tolerance.
    assert jnp.allclose(out, ref, rtol=2e-2, atol=2e-2), "mismatch vs reference"
    assert bool(jnp.all(jnp.isfinite(out)))

    print("KERNEL_OK")
</pallas_src>

<mosaic_0001>
module attributes {stable_mosaic.version = 11 : i64} {
  func.func @kernel(%arg0: i32, %arg1: memref<1x16x384xf32, #tpu.memory_space<vmem>>, %arg2: memref<1x288xf32, #tpu.memory_space<vmem>>, %arg3: memref<9x8x16xf32, #tpu.memory_space<vmem>>, %arg4: memref<8x1xf32, #tpu.memory_space<vmem>>, %arg5: memref<9x8x24xf32, #tpu.memory_space<vmem>>, %arg6: memref<8x1xf32, #tpu.memory_space<vmem>>, %arg7: memref<9x8x32xf32, #tpu.memory_space<vmem>>, %arg8: memref<8x1xf32, #tpu.memory_space<vmem>>, %arg9: memref<9x8x40xf32, #tpu.memory_space<vmem>>, %arg10: memref<8x1xf32, #tpu.memory_space<vmem>>, %arg11: memref<9x16x48xf32, #tpu.memory_space<vmem>>, %arg12: memref<16x1xf32, #tpu.memory_space<vmem>>, %arg13: memref<1x16x288xf32, #tpu.memory_space<vmem>>, %arg14: memref<48x384xf32, #tpu.memory_space<vmem>>) attributes {dimension_semantics = [#tpu.dimension_semantics<parallel>], iteration_bounds = array<i64: 2>, scalar_prefetch = 0 : i64, scratch_operands = 1 : i64, tpu.core_type = #tpu.core_type<tc>, window_params = [{transform_indices = @transform_0, window_bounds = array<i64: 1, 16, 384>}, {pipeline_mode = #tpu.pipeline_mode<synchronous>, transform_indices = @transform_1, window_bounds = array<i64: 1, 288>}, {pipeline_mode = #tpu.pipeline_mode<synchronous>, transform_indices = @transform_2, window_bounds = array<i64: 9, 8, 16>}, {pipeline_mode = #tpu.pipeline_mode<synchronous>, transform_indices = @transform_3, window_bounds = array<i64: 8, 1>}, {pipeline_mode = #tpu.pipeline_mode<synchronous>, transform_indices = @transform_4, window_bounds = array<i64: 9, 8, 24>}, {pipeline_mode = #tpu.pipeline_mode<synchronous>, transform_indices = @transform_5, window_bounds = array<i64: 8, 1>}, {pipeline_mode = #tpu.pipeline_mode<synchronous>, transform_indices = @transform_6, window_bounds = array<i64: 9, 8, 32>}, {pipeline_mode = #tpu.pipeline_mode<synchronous>, transform_indices = @transform_7, window_bounds = array<i64: 8, 1>}, {pipeline_mode = #tpu.pipeline_mode<synchronous>, transform_indices = @transform_8, window_bounds = array<i64: 9, 8, 40>}, {pipeline_mode = #tpu.pipeline_mode<synchronous>, transform_indices = @transform_9, window_bounds = array<i64: 8, 1>}, {pipeline_mode = #tpu.pipeline_mode<synchronous>, transform_indices = @transform_10, window_bounds = array<i64: 9, 16, 48>}, {pipeline_mode = #tpu.pipeline_mode<synchronous>, transform_indices = @transform_11, window_bounds = array<i64: 16, 1>}, {transform_indices = @transform_12, window_bounds = array<i64: 1, 16, 288>}]} {
    %cst = arith.constant 0.000000e+00 : f32
    %0 = vector.broadcast %cst : f32 to vector<32x384xf32>
    %c16 = arith.constant 16 : index
    %c0 = arith.constant 0 : index
    %1 = vector.load %arg14[%c16, %c0] : memref<48x384xf32, #tpu.memory_space<vmem>>, vector<32x384xf32>
    tpu.vector_store %arg14[%c16, %c0], %0 {strides = array<i32>} : memref<48x384xf32, #tpu.memory_space<vmem>>, vector<32x384xf32>,
    %c0_0 = arith.constant 0 : index
    %c0_1 = arith.constant 0 : index
    %c0_2 = arith.constant 0 : index
    %2 = vector.load %arg1[%c0_0, %c0_1, %c0_2] : memref<1x16x384xf32, #tpu.memory_space<vmem>>, vector<1x16x384xf32>
    %3 = vector.shape_cast %2 : vector<1x16x384xf32> to vector<16x384xf32>
    %c0_3 = arith.constant 0 : index
    %c0_4 = arith.constant 0 : index
    %4 = vector.load %arg14[%c0_3, %c0_4] : memref<48x384xf32, #tpu.memory_space<vmem>>, vector<16x384xf32>
    tpu.vector_store %arg14[%c0_3, %c0_4], %3 {strides = array<i32>} : memref<48x384xf32, #tpu.memory_space<vmem>>, vector<16x384xf32>,
    %c0_5 = arith.constant 0 : index
    %c0_6 = arith.constant 0 : index
    %5 = vector.load %arg2[%c0_5, %c0_6] : memref<1x288xf32, #tpu.memory_space<vmem>>, vector<1x288xf32>
    %c0_7 = arith.constant 0 : index
    %c0_8 = arith.constant 0 : index
    %c0_9 = arith.constant 0 : index
    %6 = vector.load %arg3[%c0_7, %c0_8, %c0_9] : memref<9x8x16xf32, #tpu.memory_space<vmem>>, vector<1x8x16xf32>
    %7 = vector.shape_cast %6 : vector<1x8x16xf32> to vector<8x16xf32>
    %c0_10 = arith.constant 0 : index
    %c0_11 = arith.constant 0 : index
    %8 = vector.load %arg14[%c0_10, %c0_11] : memref<48x384xf32, #tpu.memory_space<vmem>>, vector<16x288xf32>
    %cst_12 = arith.constant dense<0.000000e+00> : vector<8x288xf32>
    %9 = tpu.matmul %7, %8, %cst_12 {dimension_numbers = #tpu.dot_dimension_numbers<[1], [0], [0], [1], [0, 0, 1, 1], [], []>} : vector<8x16xf32>, vector<16x288xf32>, vector<8x288xf32> -> vector<8x288xf32>
    %c1 = arith.constant 1 : index
    %c0_13 = arith.constant 0 : index
    %c0_14 = arith.constant 0 : index
    %10 = vector.load %arg3[%c1, %c0_13, %c0_14] : memref<9x8x16xf32, #tpu.memory_space<vmem>>, vector<1x8x16xf32>
    %11 = vector.shape_cast %10 : vector<1x8x16xf32> to vector<8x16xf32>
    %c0_15 = arith.constant 0 : index
    %c1_16 = arith.constant 1 : index
    %12 = vector.load %arg14[%c0_15, %c1_16] : memref<48x384xf32, #tpu.memory_space<vmem>>, vector<16x288xf32>
    %cst_17 = arith.constant dense<0.000000e+00> : vector<8x288xf32>
    %13 = tpu.matmul %11, %12, %cst_17 {dimension_numbers = #tpu.dot_dimension_numbers<[1], [0], [0], [1], [0, 0, 1, 1], [], []>} : vector<8x16xf32>, vector<16x288xf32>, vector<8x288xf32> -> vector<8x288xf32>
    %14 = arith.addf %9, %13 : vector<8x288xf32>
    %c2 = arith.constant 2 : index
    %c0_18 = arith.constant 0 : index
    %c0_19 = arith.constant 0 : index
    %15 = vector.load %arg3[%c2, %c0_18, %c0_19] : memref<9x8x16xf32, #tpu.memory_space<vmem>>, vector<1x8x16xf32>
    %16 = vector.shape_cast %15 : vector<1x8x16xf32> to vector<8x16xf32>
    %c0_20 = arith.constant 0 : index
    %c2_21 = arith.constant 2 : index
    %17 = vector.load %arg14[%c0_20, %c2_21] : memref<48x384xf32, #tpu.memory_space<vmem>>, vector<16x288xf32>
    %cst_22 = arith.constant dense<0.000000e+00> : vector<8x288xf32>
    %18 = tpu.matmul %16, %17, %cst_22 {dimension_numbers = #tpu.dot_dimension_numbers<[1], [0], [0], [1], [0, 0, 1, 1], [], []>} : vector<8x16xf32>, vector<16x288xf32>, vector<8x288xf32> -> vector<8x288xf32>
    %19 = arith.addf %14, %18 : vector<8x288xf32>
    %c3 = arith.constant 3 : index
    %c0_23 = arith.constant 0 : index
    %c0_24 = arith.constant 0 : index
    %20 = vector.load %arg3[%c3, %c0_23, %c0_24] : memref<9x8x16xf32, #tpu.memory_space<vmem>>, vector<1x8x16xf32>
    %21 = vector.shape_cast %20 : vector<1x8x16xf32> to vector<8x16xf32>
    %c0_25 = arith.constant 0 : index
    %c18 = arith.constant 18 : index
    %22 = vector.load %arg14[%c0_25, %c18] : memref<48x384xf32, #tpu.memory_space<vmem>>, vector<16x288xf32>
    %cst_26 = arith.constant dense<0.000000e+00> : vector<8x288xf32>
    %23 = tpu.matmul %21, %22, %cst_26 {dimension_numbers = #tpu.dot_dimension_numbers<[1], [0], [0], [1], [0, 0, 1, 1], [], []>} : vector<8x16xf32>, vector<16x288xf32>, vector<8x288xf32> -> vector<8x288xf32>
    %24 = arith.addf %19, %23 : vector<8x288xf32>
    %c4 = arith.constant 4 : index
    %c0_27 = arith.constant 0 : index
    %c0_28 = arith.constant 0 : index
    %25 = vector.load %arg3[%c4, %c0_27, %c0_28] : memref<9x8x16xf32, #tpu.memory_space<vmem>>, vector<1x8x16xf32>
    %26 = vector.shape_cast %25 : vector<1x8x16xf32> to vector<8x16xf32>
    %c0_29 = arith.constant 0 : index
    %c19 = arith.constant 19 : index
    %27 = vector.load %arg14[%c0_29, %c19] : memref<48x384xf32, #tpu.memory_space<vmem>>, vector<16x288xf32>
    %cst_30 = arith.constant dense<0.000000e+00> : vector<8x288xf32>
    %28 = tpu.matmul %26, %27, %cst_30 {dimension_numbers = #tpu.dot_dimension_numbers<[1], [0], [0], [1], [0, 0, 1, 1], [], []>} : vector<8x16xf32>, vector<16x288xf32>, vector<8x288xf32> -> vector<8x288xf32>
    %29 = arith.addf %24, %28 : vector<8x288xf32>
    %c5 = arith.constant 5 : index
    %c0_31 = arith.constant 0 : index
    %c0_32 = arith.constant 0 : index
    %30 = vector.load %arg3[%c5, %c0_31, %c0_32] : memref<9x8x16xf32, #tpu.memory_space<vmem>>, vector<1x8x16xf32>
    %31 = vector.shape_cast %30 : vector<1x8x16xf32> to vector<8x16xf32>
    %c0_33 = arith.constant 0 : index
    %c20 = arith.constant 20 : index
    %32 = vector.load %arg14[%c0_33, %c20] : memref<48x384xf32, #tpu.memory_space<vmem>>, vector<16x288xf32>
    %cst_34 = arith.constant dense<0.000000e+00> : vector<8x288xf32>
    %33 = tpu.matmul %31, %32, %cst_34 {dimension_numbers = #tpu.dot_dimension_numbers<[1], [0], [0], [1], [0, 0, 1, 1], [], []>} : vector<8x16xf32>, vector<16x288xf32>, vector<8x288xf32> -> vector<8x288xf32>
    %34 = arith.addf %29, %33 : vector<8x288xf32>
    %c6 = arith.constant 6 : index
    %c0_35 = arith.constant 0 : index
    %c0_36 = arith.constant 0 : index
    %35 = vector.load %arg3[%c6, %c0_35, %c0_36] : memref<9x8x16xf32, #tpu.memory_space<vmem>>, vector<1x8x16xf32>
    %36 = vector.shape_cast %35 : vector<1x8x16xf32> to vector<8x16xf32>
    %c0_37 = arith.constant 0 : index
    %c36 = arith.constant 36 : index
    %37 = vector.load %arg14[%c0_37, %c36] : memref<48x384xf32, #tpu.memory_space<vmem>>, vector<16x288xf32>
    %cst_38 = arith.constant dense<0.000000e+00> : vector<8x288xf32>
    %38 = tpu.matmul %36, %37, %cst_38 {dimension_numbers = #tpu.dot_dimension_numbers<[1], [0], [0], [1], [0, 0, 1, 1], [], []>} : vector<8x16xf32>, vector<16x288xf32>, vector<8x288xf32> -> vector<8x288xf32>
    %39 = arith.addf %34, %38 : vector<8x288xf32>
    %c7 = arith.constant 7 : index
    %c0_39 = arith.constant 0 : index
    %c0_40 = arith.constant 0 : index
    %40 = vector.load %arg3[%c7, %c0_39, %c0_40] : memref<9x8x16xf32, #tpu.memory_space<vmem>>, vector<1x8x16xf32>
    %41 = vector.shape_cast %40 : vector<1x8x16xf32> to vector<8x16xf32>
    %c0_41 = arith.constant 0 : index
    %c37 = arith.constant 37 : index
    %42 = vector.load %arg14[%c0_41, %c37] : memref<48x384xf32, #tpu.memory_space<vmem>>, vector<16x288xf32>
    %cst_42 = arith.constant dense<0.000000e+00> : vector<8x288xf32>
    %43 = tpu.matmul %41, %42, %cst_42 {dimension_numbers = #tpu.dot_dimension_numbers<[1], [0], [0], [1], [0, 0, 1, 1], [], []>} : vector<8x16xf32>, vector<16x288xf32>, vector<8x288xf32> -> vector<8x288xf32>
    %44 = arith.addf %39, %43 : vector<8x288xf32>
    %c8 = arith.constant 8 : index
    %c0_43 = arith.constant 0 : index
    %c0_44 = arith.constant 0 : index
    %45 = vector.load %arg3[%c8, %c0_43, %c0_44] : memref<9x8x16xf32, #tpu.memory_space<vmem>>, vector<1x8x16xf32>
    %46 = vector.shape_cast %45 : vector<1x8x16xf32> to vector<8x16xf32>
    %c0_45 = arith.constant 0 : index
    %c38 = arith.constant 38 : index
    %47 = vector.load %arg14[%c0_45, %c38] : memref<48x384xf32, #tpu.memory_space<vmem>>, vector<16x288xf32>
    %cst_46 = arith.constant dense<0.000000e+00> : vector<8x288xf32>
    %48 = tpu.matmul %46, %47, %cst_46 {dimension_numbers = #tpu.dot_dimension_numbers<[1], [0], [0], [1], [0, 0, 1, 1], [], []>} : vector<8x16xf32>, vector<16x288xf32>, vector<8x288xf32> -> vector<8x288xf32>
    %49 = arith.addf %44, %48 : vector<8x288xf32>
    %c0_47 = arith.constant 0 : index
    %c0_48 = arith.constant 0 : index
    %50 = vector.load %arg4[%c0_47, %c0_48] : memref<8x1xf32, #tpu.memory_space<vmem>>, vector<8x1xf32>
    %51 = vector.broadcast %50 : vector<8x1xf32> to vector<8x288xf32>
    %52 = arith.addf %49, %51 : vector<8x288xf32>
    %cst_49 = arith.constant 0.000000e+00 : f32
    %53 = vector.broadcast %cst_49 : f32 to vector<8x288xf32>
    %54 = arith.minimumf %52, %53 : vector<8x288xf32>
    %55 = math.exp %54 : vector<8x288xf32>
    %cst_50 = arith.constant 1.000000e+00 : f32
    %56 = vector.broadcast %cst_50 : f32 to vector<8x288xf32>
    %57 = arith.subf %55, %56 : vector<8x288xf32>
    %cst_51 = arith.constant 2.000000e-01 : f32
    %58 = vector.broadcast %cst_51 : f32 to vector<8x288xf32>
    %59 = arith.mulf %58, %57 : vector<8x288xf32>
    %cst_52 = arith.constant 0.000000e+00 : f32
    %60 = vector.broadcast %cst_52 : f32 to vector<8x288xf32>
    %61 = arith.cmpf ogt, %52, %60 : vector<8x288xf32>
    %62 = arith.select %61, %52, %59 : vector<8x288xi1>, vector<8x288xf32>
    %63 = vector.broadcast %5 : vector<1x288xf32> to vector<8x288xf32>
    %64 = arith.mulf %62, %63 : vector<8x288xf32>
    %c16_53 = arith.constant 16 : index
    %c19_54 = arith.constant 19 : index
    %65 = vector.load %arg14[%c16_53, %c19_54] : memref<48x384xf32, #tpu.memory_space<vmem>>, vector<8x288xf32>
    tpu.vector_store %arg14[%c16_53, %c19_54], %64 {strides = array<i32>} : memref<48x384xf32, #tpu.memory_space<vmem>>, vector<8x288xf32>,
    %c0_55 = arith.constant 0 : index
    %c0_56 = arith.constant 0 : index
    %c0_57 = arith.constant 0 : index
    %66 = vector.load %arg5[%c0_55, %c0_56, %c0_57] : memref<9x8x24xf32, #tpu.memory_space<vmem>>, vector<1x8x24xf32>
    %67 = vector.shape_cast %66 : vector<1x8x24xf32> to vector<8x24xf32>
    %c0_58 = arith.constant 0 : index
    %c0_59 = arith.constant 0 : index
    %68 = vector.load %arg14[%c0_58, %c0_59] : memref<48x384xf32, #tpu.memory_space<vmem>>, vector<24x288xf32>
    %cst_60 = arith.constant dense<0.000000e+00> : vector<8x288xf32>
    %69 = tpu.matmul %67, %68, %cst_60 {dimension_numbers = #tpu.dot_dimension_numbers<[1], [0], [0], [1], [0, 0, 1, 1], [], []>} : vector<8x24xf32>, vector<24x288xf32>, vector<8x288xf32> -> vector<8x288xf32>
    %c1_61 = arith.constant 1 : index
    %c0_62 = arith.constant 0 : index
    %c0_63 = arith.constant 0 : index
    %70 = vector.load %arg5[%c1_61, %c0_62, %c0_63] : memref<9x8x24xf32, #tpu.memory_space<vmem>>, vector<1x8x24xf32>
    %71 = vector.shape_cast %70 : vector<1x8x24xf32> to vector<8x24xf32>
    %c0_64 = arith.constant 0 : index
    %c1_65 = arith.constant 1 : index
    %72 = vector.load %arg14[%c0_64, %c1_65] : memref<48x384xf32, #tpu.memory_space<vmem>>, vector<24x288xf32>
    %cst_66 = arith.constant dense<0.000000e+00> : vector<8x288xf32>
    %73 = tpu.matmul %71, %72, %cst_66 {dimension_numbers = #tpu.dot_dimension_numbers<[1], [0], [0], [1], [0, 0, 1, 1], [], []>} : vector<8x24xf32>, vector<24x288xf32>, vector<8x288xf32> -> vector<8x288xf32>
    %74 = arith.addf %69, %73 : vector<8x288xf32>
    %c2_67 = arith.constant 2 : index
    %c0_68 = arith.constant 0 : index
    %c0_69 = arith.constant 0 : index
    %75 = vector.load %arg5[%c2_67, %c0_68, %c0_69] : memref<9x8x24xf32, #tpu.memory_space<vmem>>, vector<1x8x24xf32>
    %76 = vector.shape_cast %75 : vector<1x8x24xf32> to vector<8x24xf32>
    %c0_70 = arith.constant 0 : index
    %c2_71 = arith.constant 2 : index
    %77 = vector.load %arg14[%c0_70, %c2_71] : memref<48x384xf32, #tpu.memory_space<vmem>>, vector<24x288xf32>
    %cst_72 = arith.constant dense<0.000000e+00> : vector<8x288xf32>
    %78 = tpu.matmul %76, %77, %cst_72 {dimension_numbers = #tpu.dot_dimension_numbers<[1], [0], [0], [1], [0, 0, 1, 1], [], []>} : vector<8x24xf32>, vector<24x288xf32>, vector<8x288xf32> -> vector<8x288xf32>
    %79 = arith.addf %74, %78 : vector<8x288xf32>
    %c3_73 = arith.constant 3 : index
    %c0_74 = arith.constant 0 : index
    %c0_75 = arith.constant 0 : index
    %80 = vector.load %arg5[%c3_73, %c0_74, %c0_75] : memref<9x8x24xf32, #tpu.memory_space<vmem>>, vector<1x8x24xf32>
    %81 = vector.shape_cast %80 : vector<1x8x24xf32> to vector<8x24xf32>
    %c0_76 = arith.constant 0 : index
    %c18_77 = arith.constant 18 : index
    %82 = vector.load %arg14[%c0_76, %c18_77] : memref<48x384xf32, #tpu.memory_space<vmem>>, vector<24x288xf32>
    %cst_78 = arith.constant dense<0.000000e+00> : vector<8x288xf32>
    %83 = tpu.matmul %81, %82, %cst_78 {dimension_numbers = #tpu.dot_dimension_numbers<[1], [0], [0], [1], [0, 0, 1, 1], [], []>} : vector<8x24xf32>, vector<24x288xf32>, vector<8x288xf32> -> vector<8x288xf32>
    %84 = arith.addf %79, %83 : vector<8x288xf32>
    %c4_79 = arith.constant 4 : index
    %c0_80 = arith.constant 0 : index
    %c0_81 = arith.constant 0 : index
    %85 = vector.load %arg5[%c4_79, %c0_80, %c0_81] : memref<9x8x24xf32, #tpu.memory_space<vmem>>, vector<1x8x24xf32>
    %86 = vector.shape_cast %85 : vector<1x8x24xf32> to vector<8x24xf32>
    %c0_82 = arith.constant 0 : index
    %c19_83 = arith.constant 19 : index
    %87 = vector.load %arg14[%c0_82, %c19_83] : memref<48x384xf32, #tpu.memory_space<vmem>>, vector<24x288xf32>
    %cst_84 = arith.constant dense<0.000000e+00> : vector<8x288xf32>
    %88 = tpu.matmul %86, %87, %cst_84 {dimension_numbers = #tpu.dot_dimension_numbers<[1], [0], [0], [1], [0, 0, 1, 1], [], []>} : vector<8x24xf32>, vector<24x288xf32>, vector<8x288xf32> -> vector<8x288xf32>
    %89 = arith.addf %84, %88 : vector<8x288xf32>
    %c5_85 = arith.constant 5 : index
    %c0_86 = arith.constant 0 : index
    %c0_87 = arith.constant 0 : index
    %90 = vector.load %arg5[%c5_85, %c0_86, %c0_87] : memref<9x8x24xf32, #tpu.memory_space<vmem>>, vector<1x8x24xf32>
    %91 = vector.shape_cast %90 : vector<1x8x24xf32> to vector<8x24xf32>
    %c0_88 = arith.constant 0 : index
    %c20_89 = arith.constant 20 : index
    %92 = vector.load %arg14[%c0_88, %c20_89] : memref<48x384xf32, #tpu.memory_space<vmem>>, vector<24x288xf32>
    %cst_90 = arith.constant dense<0.000000e+00> : vector<8x288xf32>
    %93 = tpu.matmul %91, %92, %cst_90 {dimension_numbers = #tpu.dot_dimension_numbers<[1], [0], [0], [1], [0, 0, 1, 1], [], []>} : vector<8x24xf32>, vector<24x288xf32>, vector<8x288xf32> -> vector<8x288xf32>
    %94 = arith.addf %89, %93 : vector<8x288xf32>
    %c6_91 = arith.constant 6 : index
    %c0_92 = arith.constant 0 : index
    %c0_93 = arith.constant 0 : index
    %95 = vector.load %arg5[%c6_91, %c0_92, %c0_93] : memref<9x8x24xf32, #tpu.memory_space<vmem>>, vector<1x8x24xf32>
    %96 = vector.shape_cast %95 : vector<1x8x24xf32> to vector<8x24xf32>
    %c0_94 = arith.constant 0 : index
    %c36_95 = arith.constant 36 : index
    %97 = vector.load %arg14[%c0_94, %c36_95] : memref<48x384xf32, #tpu.memory_space<vmem>>, vector<24x288xf32>
    %cst_96 = arith.constant dense<0.000000e+00> : vector<8x288xf32>
    %98 = tpu.matmul %96, %97, %cst_96 {dimension_numbers = #tpu.dot_dimension_numbers<[1], [0], [0], [1], [0, 0, 1, 1], [], []>} : vector<8x24xf32>, vector<24x288xf32>, vector<8x288xf32> -> vector<8x288xf32>
    %99 = arith.addf %94, %98 : vector<8x288xf32>
    %c7_97 = arith.constant 7 : index
    %c0_98 = arith.constant 0 : index
    %c0_99 = arith.constant 0 : index
    %100 = vector.load %arg5[%c7_97, %c0_98, %c0_99] : memref<9x8x24xf32, #tpu.memory_space<vmem>>, vector<1x8x24xf32>
    %101 = vector.shape_cast %100 : vector<1x8x24xf32> to vector<8x24xf32>
    %c0_100 = arith.constant 0 : index
    %c37_101 = arith.constant 37 : index
    %102 = vector.load %arg14[%c0_100, %c37_101] : memref<48x384xf32, #tpu.memory_space<vmem>>, vector<24x288xf32>
    %cst_102 = arith.constant dense<0.000000e+00> : vector<8x288xf32>
    %103 = tpu.matmul %101, %102, %cst_102 {dimension_numbers = #tpu.dot_dimension_numbers<[1], [0], [0], [1], [0, 0, 1, 1], [], []>} : vector<8x24xf32>, vector<24x288xf32>, vector<8x288xf32> -> vector<8x288xf32>
    %104 = arith.addf %99, %103 : vector<8x288xf32>
    %c8_103 = arith.constant 8 : index
    %c0_104 = arith.constant 0 : index
    %c0_105 = arith.constant 0 : index
    %105 = vector.load %arg5[%c8_103, %c0_104, %c0_105] : memref<9x8x24xf32, #tpu.memory_space<vmem>>, vector<1x8x24xf32>
    %106 = vector.shape_cast %105 : vector<1x8x24xf32> to vector<8x24xf32>
    %c0_106 = arith.constant 0 : index
    %c38_107 = arith.constant 38 : index
    %107 = vector.load %arg14[%c0_106, %c38_107] : memref<48x384xf32, #tpu.memory_space<vmem>>, vector<24x288xf32>
    %cst_108 = arith.constant dense<0.000000e+00> : vector<8x288xf32>
    %108 = tpu.matmul %106, %107, %cst_108 {dimension_numbers = #tpu.dot_dimension_numbers<[1], [0], [0], [1], [0, 0, 1, 1], [], []>} : vector<8x24xf32>, vector<24x288xf32>, vector<8x288xf32> -> vector<8x288xf32>
    %109 = arith.addf %104, %108 : vector<8x288xf32>
    %c0_109 = arith.constant 0 : index
    %c0_110 = arith.constant 0 : index
    %110 = vector.load %arg6[%c0_109, %c0_110] : memref<8x1xf32, #tpu.memory_space<vmem>>, vector<8x1xf32>
    %111 = vector.broadcast %110 : vector<8x1xf32> to vector<8x288xf32>
    %112 = arith.addf %109, %111 : vector<8x288xf32>
    %cst_111 = arith.constant 0.000000e+00 : f32
    %113 = vector.broadcast %cst_111 : f32 to vector<8x288xf32>
    %114 = arith.minimumf %112, %113 : vector<8x288xf32>
    %115 = math.exp %114 : vector<8x288xf32>
    %cst_112 = arith.constant 1.000000e+00 : f32
    %116 = vector.broadcast %cst_112 : f32 to vector<8x288xf32>
    %117 = arith.subf %115, %116 : vector<8x288xf32>
    %cst_113 = arith.constant 2.000000e-01 : f32
    %118 = vector.broadcast %cst_113 : f32 to vector<8x288xf32>
    %119 = arith.mulf %118, %117 : vector<8x288xf32>
    %cst_114 = arith.constant 0.000000e+00 : f32
    %120 = vector.broadcast %cst_114 : f32 to vector<8x288xf32>
    %121 = arith.cmpf ogt, %112, %120 : vector<8x288xf32>
    %122 = arith.select %121, %112, %119 : vector<8x288xi1>, vector<8x288xf32>
    %123 = vector.broadcast %5 : vector<1x288xf32> to vector<8x288xf32>
    %124 = arith.mulf %122, %123 : vector<8x288xf32>
    %c24 = arith.constant 24 : index
    %c19_115 = arith.constant 19 : index
    %125 = vector.load %arg14[%c24, %c19_115] : memref<48x384xf32, #tpu.memory_space<vmem>>, vector<8x288xf32>
    tpu.vector_store %arg14[%c24, %c19_115], %124 {strides = array<i32>} : memref<48x384xf32, #tpu.memory_space<vmem>>, vector<8x288xf32>,
    %c0_116 = arith.constant 0 : index
    %c0_117 = arith.constant 0 : index
    %c0_118 = arith.constant 0 : index
    %126 = vector.load %arg7[%c0_116, %c0_117, %c0_118] : memref<9x8x32xf32, #tpu.memory_space<vmem>>, vector<1x8x32xf32>
    %127 = vector.shape_cast %126 : vector<1x8x32xf32> to vector<8x32xf32>
    %c0_119 = arith.constant 0 : index
    %c0_120 = arith.constant 0 : index
    %128 = vector.load %arg14[%c0_119, %c0_120] : memref<48x384xf32, #tpu.memory_space<vmem>>, vector<32x288xf32>
    %cst_121 = arith.constant dense<0.000000e+00> : vector<8x288xf32>
    %129 = tpu.matmul %127, %128, %cst_121 {dimension_numbers = #tpu.dot_dimension_numbers<[1], [0], [0], [1], [0, 0, 1, 1], [], []>} : vector<8x32xf32>, vector<32x288xf32>, vector<8x288xf32> -> vector<8x288xf32>
    %c1_122 = arith.constant 1 : index
    %c0_123 = arith.constant 0 : index
    %c0_124 = arith.constant 0 : index
    %130 = vector.load %arg7[%c1_122, %c0_123, %c0_124] : memref<9x8x32xf32, #tpu.memory_space<vmem>>, vector<1x8x32xf32>
    %131 = vector.shape_cast %130 : vector<1x8x32xf32> to vector<8x32xf32>
    %c0_125 = arith.constant 0 : index
    %c1_126 = arith.constant 1 : index
    %132 = vector.load %arg14[%c0_125, %c1_126] : memref<48x384xf32, #tpu.memory_space<vmem>>, vector<32x288xf32>
    %cst_127 = arith.constant dense<0.000000e+00> : vector<8x288xf32>
    %133 = tpu.matmul %131, %132, %cst_127 {dimension_numbers = #tpu.dot_dimension_numbers<[1], [0], [0], [1], [0, 0, 1, 1], [], []>} : vector<8x32xf32>, vector<32x288xf32>, vector<8x288xf32> -> vector<8x288xf32>
    %134 = arith.addf %129, %133 : vector<8x288xf32>
    %c2_128 = arith.constant 2 : index
    %c0_129 = arith.constant 0 : index
    %c0_130 = arith.constant 0 : index
    %135 = vector.load %arg7[%c2_128, %c0_129, %c0_130] : memref<9x8x32xf32, #tpu.memory_space<vmem>>, vector<1x8x32xf32>
    %136 = vector.shape_cast %135 : vector<1x8x32xf32> to vector<8x32xf32>
    %c0_131 = arith.constant 0 : index
    %c2_132 = arith.constant 2 : index
    %137 = vector.load %arg14[%c0_131, %c2_132] : memref<48x384xf32, #tpu.memory_space<vmem>>, vector<32x288xf32>
    %cst_133 = arith.constant dense<0.000000e+00> : vector<8x288xf32>
    %138 = tpu.matmul %136, %137, %cst_133 {dimension_numbers = #tpu.dot_dimension_numbers<[1], [0], [0], [1], [0, 0, 1, 1], [], []>} : vector<8x32xf32>, vector<32x288xf32>, vector<8x288xf32> -> vector<8x288xf32>
    %139 = arith.addf %134, %138 : vector<8x288xf32>
    %c3_134 = arith.constant 3 : index
    %c0_135 = arith.constant 0 : index
    %c0_136 = arith.constant 0 : index
    %140 = vector.load %arg7[%c3_134, %c0_135, %c0_136] : memref<9x8x32xf32, #tpu.memory_space<vmem>>, vector<1x8x32xf32>
    %141 = vector.shape_cast %140 : vector<1x8x32xf32> to vector<8x32xf32>
    %c0_137 = arith.constant 0 : index
    %c18_138 = arith.constant 18 : index
    %142 = vector.load %arg14[%c0_137, %c18_138] : memref<48x384xf32, #tpu.memory_space<vmem>>, vector<32x288xf32>
    %cst_139 = arith.constant dense<0.000000e+00> : vector<8x288xf32>
    %143 = tpu.matmul %141, %142, %cst_139 {dimension_numbers = #tpu.dot_dimension_numbers<[1], [0], [0], [1], [0, 0, 1, 1], [], []>} : vector<8x32xf32>, vector<32x288xf32>, vector<8x288xf32> -> vector<8x288xf32>
    %144 = arith.addf %139, %143 : vector<8x288xf32>
    %c4_140 = arith.constant 4 : index
    %c0_141 = arith.constant 0 : index
    %c0_142 = arith.constant 0 : index
    %145 = vector.load %arg7[%c4_140, %c0_141, %c0_142] : memref<9x8x32xf32, #tpu.memory_space<vmem>>, vector<1x8x32xf32>
    %146 = vector.shape_cast %145 : vector<1x8x32xf32> to vector<8x32xf32>
    %c0_143 = arith.constant 0 : index
    %c19_144 = arith.constant 19 : index
    %147 = vector.load %arg14[%c0_143, %c19_144] : memref<48x384xf32, #tpu.memory_space<vmem>>, vector<32x288xf32>
    %cst_145 = arith.constant dense<0.000000e+00> : vector<8x288xf32>
    %148 = tpu.matmul %146, %147, %cst_145 {dimension_numbers = #tpu.dot_dimension_numbers<[1], [0], [0], [1], [0, 0, 1, 1], [], []>} : vector<8x32xf32>, vector<32x288xf32>, vector<8x288xf32> -> vector<8x288xf32>
    %149 = arith.addf %144, %148 : vector<8x288xf32>
    %c5_146 = arith.constant 5 : index
    %c0_147 = arith.constant 0 : index
    %c0_148 = arith.constant 0 : index
    %150 = vector.load %arg7[%c5_146, %c0_147, %c0_148] : memref<9x8x32xf32, #tpu.memory_space<vmem>>, vector<1x8x32xf32>
    %151 = vector.shape_cast %150 : vector<1x8x32xf32> to vector<8x32xf32>
    %c0_149 = arith.constant 0 : index
    %c20_150 = arith.constant 20 : index
    %152 = vector.load %arg14[%c0_149, %c20_150] : memref<48x384xf32, #tpu.memory_space<vmem>>, vector<32x288xf32>
    %cst_151 = arith.constant dense<0.000000e+00> : vector<8x288xf32>
    %153 = tpu.matmul %151, %152, %cst_151 {dimension_numbers = #tpu.dot_dimension_numbers<[1], [0], [0], [1], [0, 0, 1, 1], [], []>} : vector<8x32xf32>, vector<32x288xf32>, vector<8x288xf32> -> vector<8x288xf32>
    %154 = arith.addf %149, %153 : vector<8x288xf32>
    %c6_152 = arith.constant 6 : index
    %c0_153 = arith.constant 0 : index
    %c0_154 = arith.constant 0 : index
    %155 = vector.load %arg7[%c6_152, %c0_153, %c0_154] : memref<9x8x32xf32, #tpu.memory_space<vmem>>, vector<1x8x32xf32>
    %156 = vector.shape_cast %155 : vector<1x8x32xf32> to vector<8x32xf32>
    %c0_155 = arith.constant 0 : index
    %c36_156 = arith.constant 36 : index
    %157 = vector.load %arg14[%c0_155, %c36_156] : memref<48x384xf32, #tpu.memory_space<vmem>>, vector<32x288xf32>
    %cst_157 = arith.constant dense<0.000000e+00> : vector<8x288xf32>
    %158 = tpu.matmul %156, %157, %cst_157 {dimension_numbers = #tpu.dot_dimension_numbers<[1], [0], [0], [1], [0, 0, 1, 1], [], []>} : vector<8x32xf32>, vector<32x288xf32>, vector<8x288xf32> -> vector<8x288xf32>
    %159 = arith.addf %154, %158 : vector<8x288xf32>
    %c7_158 = arith.constant 7 : index
    %c0_159 = arith.constant 0 : index
    %c0_160 = arith.constant 0 : index
    %160 = vector.load %arg7[%c7_158, %c0_159, %c0_160] : memref<9x8x32xf32, #tpu.memory_space<vmem>>, vector<1x8x32xf32>
    %161 = vector.shape_cast %160 : vector<1x8x32xf32> to vector<8x32xf32>
    %c0_161 = arith.constant 0 : index
    %c37_162 = arith.constant 37 : index
    %162 = vector.load %arg14[%c0_161, %c37_162] : memref<48x384xf32, #tpu.memory_space<vmem>>, vector<32x288xf32>
    %cst_163 = arith.constant dense<0.000000e+00> : vector<8x288xf32>
    %163 = tpu.matmul %161, %162, %cst_163 {dimension_numbers = #tpu.dot_dimension_numbers<[1], [0], [0], [1], [0, 0, 1, 1], [], []>} : vector<8x32xf32>, vector<32x288xf32>, vector<8x288xf32> -> vector<8x288xf32>
    %164 = arith.addf %159, %163 : vector<8x288xf32>
    %c8_164 = arith.constant 8 : index
    %c0_165 = arith.constant 0 : index
    %c0_166 = arith.constant 0 : index
    %165 = vector.load %arg7[%c8_164, %c0_165, %c0_166] : memref<9x8x32xf32, #tpu.memory_space<vmem>>, vector<1x8x32xf32>
    %166 = vector.shape_cast %165 : vector<1x8x32xf32> to vector<8x32xf32>
    %c0_167 = arith.constant 0 : index
    %c38_168 = arith.constant 38 : index
    %167 = vector.load %arg14[%c0_167, %c38_168] : memref<48x384xf32, #tpu.memory_space<vmem>>, vector<32x288xf32>
    %cst_169 = arith.constant dense<0.000000e+00> : vector<8x288xf32>
    %168 = tpu.matmul %166, %167, %cst_169 {dimension_numbers = #tpu.dot_dimension_numbers<[1], [0], [0], [1], [0, 0, 1, 1], [], []>} : vector<8x32xf32>, vector<32x288xf32>, vector<8x288xf32> -> vector<8x288xf32>
    %169 = arith.addf %164, %168 : vector<8x288xf32>
    %c0_170 = arith.constant 0 : index
    %c0_171 = arith.constant 0 : index
    %170 = vector.load %arg8[%c0_170, %c0_171] : memref<8x1xf32, #tpu.memory_space<vmem>>, vector<8x1xf32>
    %171 = vector.broadcast %170 : vector<8x1xf32> to vector<8x288xf32>
    %172 = arith.addf %169, %171 : vector<8x288xf32>
    %cst_172 = arith.constant 0.000000e+00 : f32
    %173 = vector.broadcast %cst_172 : f32 to vector<8x288xf32>
    %174 = arith.minimumf %172, %173 : vector<8x288xf32>
    %175 = math.exp %174 : vector<8x288xf32>
    %cst_173 = arith.constant 1.000000e+00 : f32
    %176 = vector.broadcast %cst_173 : f32 to vector<8x288xf32>
    %177 = arith.subf %175, %176 : vector<8x288xf32>
    %cst_174 = arith.constant 2.000000e-01 : f32
    %178 = vector.broadcast %cst_174 : f32 to vector<8x288xf32>
    %179 = arith.mulf %178, %177 : vector<8x288xf32>
    %cst_175 = arith.constant 0.000000e+00 : f32
    %180 = vector.broadcast %cst_175 : f32 to vector<8x288xf32>
    %181 = arith.cmpf ogt, %172, %180 : vector<8x288xf32>
    %182 = arith.select %181, %172, %179 : vector<8x288xi1>, vector<8x288xf32>
    %183 = vector.broadcast %5 : vector<1x288xf32> to vector<8x288xf32>
    %184 = arith.mulf %182, %183 : vector<8x288xf32>
    %c32 = arith.constant 32 : index
    %c19_176 = arith.constant 19 : index
    %185 = vector.load %arg14[%c32, %c19_176] : memref<48x384xf32, #tpu.memory_space<vmem>>, vector<8x288xf32>
    tpu.vector_store %arg14[%c32, %c19_176], %184 {strides = array<i32>} : memref<48x384xf32, #tpu.memory_space<vmem>>, vector<8x288xf32>,
    %c0_177 = arith.constant 0 : index
    %c0_178 = arith.constant 0 : index
    %c0_179 = arith.constant 0 : index
    %186 = vector.load %arg9[%c0_177, %c0_178, %c0_179] : memref<9x8x40xf32, #tpu.memory_space<vmem>>, vector<1x8x40xf32>
    %187 = vector.shape_cast %186 : vector<1x8x40xf32> to vector<8x40xf32>
    %c0_180 = arith.constant 0 : index
    %c0_181 = arith.constant 0 : index
    %188 = vector.load %arg14[%c0_180, %c0_181] : memref<48x384xf32, #tpu.memory_space<vmem>>, vector<40x288xf32>
    %cst_182 = arith.constant dense<0.000000e+00> : vector<8x288xf32>
    %189 = tpu.matmul %187, %188, %cst_182 {dimension_numbers = #tpu.dot_dimension_numbers<[1], [0], [0], [1], [0, 0, 1, 1], [], []>} : vector<8x40xf32>, vector<40x288xf32>, vector<8x288xf32> -> vector<8x288xf32>
    %c1_183 = arith.constant 1 : index
    %c0_184 = arith.constant 0 : index
    %c0_185 = arith.constant 0 : index
    %190 = vector.load %arg9[%c1_183, %c0_184, %c0_185] : memref<9x8x40xf32, #tpu.memory_space<vmem>>, vector<1x8x40xf32>
    %191 = vector.shape_cast %190 : vector<1x8x40xf32> to vector<8x40xf32>
    %c0_186 = arith.constant 0 : index
    %c1_187 = arith.constant 1 : index
    %192 = vector.load %arg14[%c0_186, %c1_187] : memref<48x384xf32, #tpu.memory_space<vmem>>, vector<40x288xf32>
    %cst_188 = arith.constant dense<0.000000e+00> : vector<8x288xf32>
    %193 = tpu.matmul %191, %192, %cst_188 {dimension_numbers = #tpu.dot_dimension_numbers<[1], [0], [0], [1], [0, 0, 1, 1], [], []>} : vector<8x40xf32>, vector<40x288xf32>, vector<8x288xf32> -> vector<8x288xf32>
    %194 = arith.addf %189, %193 : vector<8x288xf32>
    %c2_189 = arith.constant 2 : index
    %c0_190 = arith.constant 0 : index
    %c0_191 = arith.constant 0 : index
    %195 = vector.load %arg9[%c2_189, %c0_190, %c0_191] : memref<9x8x40xf32, #tpu.memory_space<vmem>>, vector<1x8x40xf32>
    %196 = vector.shape_cast %195 : vector<1x8x40xf32> to vector<8x40xf32>
    %c0_192 = arith.constant 0 : index
    %c2_193 = arith.constant 2 : index
    %197 = vector.load %arg14[%c0_192, %c2_193] : memref<48x384xf32, #tpu.memory_space<vmem>>, vector<40x288xf32>
    %cst_194 = arith.constant dense<0.000000e+00> : vector<8x288xf32>
    %198 = tpu.matmul %196, %197, %cst_194 {dimension_numbers = #tpu.dot_dimension_numbers<[1], [0], [0], [1], [0, 0, 1, 1], [], []>} : vector<8x40xf32>, vector<40x288xf32>, vector<8x288xf32> -> vector<8x288xf32>
    %199 = arith.addf %194, %198 : vector<8x288xf32>
    %c3_195 = arith.constant 3 : index
    %c0_196 = arith.constant 0 : index
    %c0_197 = arith.constant 0 : index
    %200 = vector.load %arg9[%c3_195, %c0_196, %c0_197] : memref<9x8x40xf32, #tpu.memory_space<vmem>>, vector<1x8x40xf32>
    %201 = vector.shape_cast %200 : vector<1x8x40xf32> to vector<8x40xf32>
    %c0_198 = arith.constant 0 : index
    %c18_199 = arith.constant 18 : index
    %202 = vector.load %arg14[%c0_198, %c18_199] : memref<48x384xf32, #tpu.memory_space<vmem>>, vector<40x288xf32>
    %cst_200 = arith.constant dense<0.000000e+00> : vector<8x288xf32>
    %203 = tpu.matmul %201, %202, %cst_200 {dimension_numbers = #tpu.dot_dimension_numbers<[1], [0], [0], [1], [0, 0, 1, 1], [], []>} : vector<8x40xf32>, vector<40x288xf32>, vector<8x288xf32> -> vector<8x288xf32>
    %204 = arith.addf %199, %203 : vector<8x288xf32>
    %c4_201 = arith.constant 4 : index
    %c0_202 = arith.constant 0 : index
    %c0_203 = arith.constant 0 : index
    %205 = vector.load %arg9[%c4_201, %c0_202, %c0_203] : memref<9x8x40xf32, #tpu.memory_space<vmem>>, vector<1x8x40xf32>
    %206 = vector.shape_cast %205 : vector<1x8x40xf32> to vector<8x40xf32>
    %c0_204 = arith.constant 0 : index
    %c19_205 = arith.constant 19 : index
    %207 = vector.load %arg14[%c0_204, %c19_205] : memref<48x384xf32, #tpu.memory_space<vmem>>, vector<40x288xf32>
    %cst_206 = arith.constant dense<0.000000e+00> : vector<8x288xf32>
    %208 = tpu.matmul %206, %207, %cst_206 {dimension_numbers = #tpu.dot_dimension_numbers<[1], [0], [0], [1], [0, 0, 1, 1], [], []>} : vector<8x40xf32>, vector<40x288xf32>, vector<8x288xf32> -> vector<8x288xf32>
    %209 = arith.addf %204, %208 : vector<8x288xf32>
    %c5_207 = arith.constant 5 : index
    %c0_208 = arith.constant 0 : index
    %c0_209 = arith.constant 0 : index
    %210 = vector.load %arg9[%c5_207, %c0_208, %c0_209] : memref<9x8x40xf32, #tpu.memory_space<vmem>>, vector<1x8x40xf32>
    %211 = vector.shape_cast %210 : vector<1x8x40xf32> to vector<8x40xf32>
    %c0_210 = arith.constant 0 : index
    %c20_211 = arith.constant 20 : index
    %212 = vector.load %arg14[%c0_210, %c20_211] : memref<48x384xf32, #tpu.memory_space<vmem>>, vector<40x288xf32>
    %cst_212 = arith.constant dense<0.000000e+00> : vector<8x288xf32>
    %213 = tpu.matmul %211, %212, %cst_212 {dimension_numbers = #tpu.dot_dimension_numbers<[1], [0], [0], [1], [0, 0, 1, 1], [], []>} : vector<8x40xf32>, vector<40x288xf32>, vector<8x288xf32> -> vector<8x288xf32>
    %214 = arith.addf %209, %213 : vector<8x288xf32>
    %c6_213 = arith.constant 6 : index
    %c0_214 = arith.constant 0 : index
    %c0_215 = arith.constant 0 : index
    %215 = vector.load %arg9[%c6_213, %c0_214, %c0_215] : memref<9x8x40xf32, #tpu.memory_space<vmem>>, vector<1x8x40xf32>
    %216 = vector.shape_cast %215 : vector<1x8x40xf32> to vector<8x40xf32>
    %c0_216 = arith.constant 0 : index
    %c36_217 = arith.constant 36 : index
    %217 = vector.load %arg14[%c0_216, %c36_217] : memref<48x384xf32, #tpu.memory_space<vmem>>, vector<40x288xf32>
    %cst_218 = arith.constant dense<0.000000e+00> : vector<8x288xf32>
    %218 = tpu.matmul %216, %217, %cst_218 {dimension_numbers = #tpu.dot_dimension_numbers<[1], [0], [0], [1], [0, 0, 1, 1], [], []>} : vector<8x40xf32>, vector<40x288xf32>, vector<8x288xf32> -> vector<8x288xf32>
    %219 = arith.addf %214, %218 : vector<8x288xf32>
    %c7_219 = arith.constant 7 : index
    %c0_220 = arith.constant 0 : index
    %c0_221 = arith.constant 0 : index
    %220 = vector.load %arg9[%c7_219, %c0_220, %c0_221] : memref<9x8x40xf32, #tpu.memory_space<vmem>>, vector<1x8x40xf32>
    %221 = vector.shape_cast %220 : vector<1x8x40xf32> to vector<8x40xf32>
    %c0_222 = arith.constant 0 : index
    %c37_223 = arith.constant 37 : index
    %222 = vector.load %arg14[%c0_222, %c37_223] : memref<48x384xf32, #tpu.memory_space<vmem>>, vector<40x288xf32>
    %cst_224 = arith.constant dense<0.000000e+00> : vector<8x288xf32>
    %223 = tpu.matmul %221, %222, %cst_224 {dimension_numbers = #tpu.dot_dimension_numbers<[1], [0], [0], [1], [0, 0, 1, 1], [], []>} : vector<8x40xf32>, vector<40x288xf32>, vector<8x288xf32> -> vector<8x288xf32>
    %224 = arith.addf %219, %223 : vector<8x288xf32>
    %c8_225 = arith.constant 8 : index
    %c0_226 = arith.constant 0 : index
    %c0_227 = arith.constant 0 : index
    %225 = vector.load %arg9[%c8_225, %c0_226, %c0_227] : memref<9x8x40xf32, #tpu.memory_space<vmem>>, vector<1x8x40xf32>
    %226 = vector.shape_cast %225 : vector<1x8x40xf32> to vector<8x40xf32>
    %c0_228 = arith.constant 0 : index
    %c38_229 = arith.constant 38 : index
    %227 = vector.load %arg14[%c0_228, %c38_229] : memref<48x384xf32, #tpu.memory_space<vmem>>, vector<40x288xf32>
    %cst_230 = arith.constant dense<0.000000e+00> : vector<8x288xf32>
    %228 = tpu.matmul %226, %227, %cst_230 {dimension_numbers = #tpu.dot_dimension_numbers<[1], [0], [0], [1], [0, 0, 1, 1], [], []>} : vector<8x40xf32>, vector<40x288xf32>, vector<8x288xf32> -> vector<8x288xf32>
    %229 = arith.addf %224, %228 : vector<8x288xf32>
    %c0_231 = arith.constant 0 : index
    %c0_232 = arith.constant 0 : index
    %230 = vector.load %arg10[%c0_231, %c0_232] : memref<8x1xf32, #tpu.memory_space<vmem>>, vector<8x1xf32>
    %231 = vector.broadcast %230 : vector<8x1xf32> to vector<8x288xf32>
    %232 = arith.addf %229, %231 : vector<8x288xf32>
    %cst_233 = arith.constant 0.000000e+00 : f32
    %233 = vector.broadcast %cst_233 : f32 to vector<8x288xf32>
    %234 = arith.minimumf %232, %233 : vector<8x288xf32>
    %235 = math.exp %234 : vector<8x288xf32>
    %cst_234 = arith.constant 1.000000e+00 : f32
    %236 = vector.broadcast %cst_234 : f32 to vector<8x288xf32>
    %237 = arith.subf %235, %236 : vector<8x288xf32>
    %cst_235 = arith.constant 2.000000e-01 : f32
    %238 = vector.broadcast %cst_235 : f32 to vector<8x288xf32>
    %239 = arith.mulf %238, %237 : vector<8x288xf32>
    %cst_236 = arith.constant 0.000000e+00 : f32
    %240 = vector.broadcast %cst_236 : f32 to vector<8x288xf32>
    %241 = arith.cmpf ogt, %232, %240 : vector<8x288xf32>
    %242 = arith.select %241, %232, %239 : vector<8x288xi1>, vector<8x288xf32>
    %243 = vector.broadcast %5 : vector<1x288xf32> to vector<8x288xf32>
    %244 = arith.mulf %242, %243 : vector<8x288xf32>
    %c40 = arith.constant 40 : index
    %c19_237 = arith.constant 19 : index
    %245 = vector.load %arg14[%c40, %c19_237] : memref<48x384xf32, #tpu.memory_space<vmem>>, vector<8x288xf32>
    tpu.vector_store %arg14[%c40, %c19_237], %244 {strides = array<i32>} : memref<48x384xf32, #tpu.memory_space<vmem>>, vector<8x288xf32>,
    %c0_238 = arith.constant 0 : index
    %c0_239 = arith.constant 0 : index
    %c0_240 = arith.constant 0 : index
    %246 = vector.load %arg11[%c0_238, %c0_239, %c0_240] : memref<9x16x48xf32, #tpu.memory_space<vmem>>, vector<1x16x48xf32>
    %247 = vector.shape_cast %246 : vector<1x16x48xf32> to vector<16x48xf32>
    %c0_241 = arith.constant 0 : index
    %c0_242 = arith.constant 0 : index
    %248 = vector.load %arg14[%c0_241, %c0_242] : memref<48x384xf32, #tpu.memory_space<vmem>>, vector<48x288xf32>
    %cst_243 = arith.constant dense<0.000000e+00> : vector<16x288xf32>
    %249 = tpu.matmul %247, %248, %cst_243 {dimension_numbers = #tpu.dot_dimension_numbers<[1], [0], [0], [1], [0, 0, 1, 1], [], []>} : vector<16x48xf32>, vector<48x288xf32>, vector<16x288xf32> -> vector<16x288xf32>
    %c1_244 = arith.constant 1 : index
    %c0_245 = arith.constant 0 : index
    %c0_246 = arith.constant 0 : index
    %250 = vector.load %arg11[%c1_244, %c0_245, %c0_246] : memref<9x16x48xf32, #tpu.memory_space<vmem>>, vector<1x16x48xf32>
    %251 = vector.shape_cast %250 : vector<1x16x48xf32> to vector<16x48xf32>
    %c0_247 = arith.constant 0 : index
    %c1_248 = arith.constant 1 : index
    %252 = vector.load %arg14[%c0_247, %c1_248] : memref<48x384xf32, #tpu.memory_space<vmem>>, vector<48x288xf32>
    %cst_249 = arith.constant dense<0.000000e+00> : vector<16x288xf32>
    %253 = tpu.matmul %251, %252, %cst_249 {dimension_numbers = #tpu.dot_dimension_numbers<[1], [0], [0], [1], [0, 0, 1, 1], [], []>} : vector<16x48xf32>, vector<48x288xf32>, vector<16x288xf32> -> vector<16x288xf32>
    %254 = arith.addf %249, %253 : vector<16x288xf32>
    %c2_250 = arith.constant 2 : index
    %c0_251 = arith.constant 0 : index
    %c0_252 = arith.constant 0 : index
    %255 = vector.load %arg11[%c2_250, %c0_251, %c0_252] : memref<9x16x48xf32, #tpu.memory_space<vmem>>, vector<1x16x48xf32>
    %256 = vector.shape_cast %255 : vector<1x16x48xf32> to vector<16x48xf32>
    %c0_253 = arith.constant 0 : index
    %c2_254 = arith.constant 2 : index
    %257 = vector.load %arg14[%c0_253, %c2_254] : memref<48x384xf32, #tpu.memory_space<vmem>>, vector<48x288xf32>
    %cst_255 = arith.constant dense<0.000000e+00> : vector<16x288xf32>
    %258 = tpu.matmul %256, %257, %cst_255 {dimension_numbers = #tpu.dot_dimension_numbers<[1], [0], [0], [1], [0, 0, 1, 1], [], []>} : vector<16x48xf32>, vector<48x288xf32>, vector<16x288xf32> -> vector<16x288xf32>
    %259 = arith.addf %254, %258 : vector<16x288xf32>
    %c3_256 = arith.constant 3 : index
    %c0_257 = arith.constant 0 : index
    %c0_258 = arith.constant 0 : index
    %260 = vector.load %arg11[%c3_256, %c0_257, %c0_258] : memref<9x16x48xf32, #tpu.memory_space<vmem>>, vector<1x16x48xf32>
    %261 = vector.shape_cast %260 : vector<1x16x48xf32> to vector<16x48xf32>
    %c0_259 = arith.constant 0 : index
    %c18_260 = arith.constant 18 : index
    %262 = vector.load %arg14[%c0_259, %c18_260] : memref<48x384xf32, #tpu.memory_space<vmem>>, vector<48x288xf32>
    %cst_261 = arith.constant dense<0.000000e+00> : vector<16x288xf32>
    %263 = tpu.matmul %261, %262, %cst_261 {dimension_numbers = #tpu.dot_dimension_numbers<[1], [0], [0], [1], [0, 0, 1, 1], [], []>} : vector<16x48xf32>, vector<48x288xf32>, vector<16x288xf32> -> vector<16x288xf32>
    %264 = arith.addf %259, %263 : vector<16x288xf32>
    %c4_262 = arith.constant 4 : index
    %c0_263 = arith.constant 0 : index
    %c0_264 = arith.constant 0 : index
    %265 = vector.load %arg11[%c4_262, %c0_263, %c0_264] : memref<9x16x48xf32, #tpu.memory_space<vmem>>, vector<1x16x48xf32>
    %266 = vector.shape_cast %265 : vector<1x16x48xf32> to vector<16x48xf32>
    %c0_265 = arith.constant 0 : index
    %c19_266 = arith.constant 19 : index
    %267 = vector.load %arg14[%c0_265, %c19_266] : memref<48x384xf32, #tpu.memory_space<vmem>>, vector<48x288xf32>
    %cst_267 = arith.constant dense<0.000000e+00> : vector<16x288xf32>
    %268 = tpu.matmul %266, %267, %cst_267 {dimension_numbers = #tpu.dot_dimension_numbers<[1], [0], [0], [1], [0, 0, 1, 1], [], []>} : vector<16x48xf32>, vector<48x288xf32>, vector<16x288xf32> -> vector<16x288xf32>
    %269 = arith.addf %264, %268 : vector<16x288xf32>
    %c5_268 = arith.constant 5 : index
    %c0_269 = arith.constant 0 : index
    %c0_270 = arith.constant 0 : index
    %270 = vector.load %arg11[%c5_268, %c0_269, %c0_270] : memref<9x16x48xf32, #tpu.memory_space<vmem>>, vector<1x16x48xf32>
    %271 = vector.shape_cast %270 : vector<1x16x48xf32> to vector<16x48xf32>
    %c0_271 = arith.constant 0 : index
    %c20_272 = arith.constant 20 : index
    %272 = vector.load %arg14[%c0_271, %c20_272] : memref<48x384xf32, #tpu.memory_space<vmem>>, vector<48x288xf32>
    %cst_273 = arith.constant dense<0.000000e+00> : vector<16x288xf32>
    %273 = tpu.matmul %271, %272, %cst_273 {dimension_numbers = #tpu.dot_dimension_numbers<[1], [0], [0], [1], [0, 0, 1, 1], [], []>} : vector<16x48xf32>, vector<48x288xf32>, vector<16x288xf32> -> vector<16x288xf32>
    %274 = arith.addf %269, %273 : vector<16x288xf32>
    %c6_274 = arith.constant 6 : index
    %c0_275 = arith.constant 0 : index
    %c0_276 = arith.constant 0 : index
    %275 = vector.load %arg11[%c6_274, %c0_275, %c0_276] : memref<9x16x48xf32, #tpu.memory_space<vmem>>, vector<1x16x48xf32>
    %276 = vector.shape_cast %275 : vector<1x16x48xf32> to vector<16x48xf32>
    %c0_277 = arith.constant 0 : index
    %c36_278 = arith.constant 36 : index
    %277 = vector.load %arg14[%c0_277, %c36_278] : memref<48x384xf32, #tpu.memory_space<vmem>>, vector<48x288xf32>
    %cst_279 = arith.constant dense<0.000000e+00> : vector<16x288xf32>
    %278 = tpu.matmul %276, %277, %cst_279 {dimension_numbers = #tpu.dot_dimension_numbers<[1], [0], [0], [1], [0, 0, 1, 1], [], []>} : vector<16x48xf32>, vector<48x288xf32>, vector<16x288xf32> -> vector<16x288xf32>
    %279 = arith.addf %274, %278 : vector<16x288xf32>
    %c7_280 = arith.constant 7 : index
    %c0_281 = arith.constant 0 : index
    %c0_282 = arith.constant 0 : index
    %280 = vector.load %arg11[%c7_280, %c0_281, %c0_282] : memref<9x16x48xf32, #tpu.memory_space<vmem>>, vector<1x16x48xf32>
    %281 = vector.shape_cast %280 : vector<1x16x48xf32> to vector<16x48xf32>
    %c0_283 = arith.constant 0 : index
    %c37_284 = arith.constant 37 : index
    %282 = vector.load %arg14[%c0_283, %c37_284] : memref<48x384xf32, #tpu.memory_space<vmem>>, vector<48x288xf32>
    %cst_285 = arith.constant dense<0.000000e+00> : vector<16x288xf32>
    %283 = tpu.matmul %281, %282, %cst_285 {dimension_numbers = #tpu.dot_dimension_numbers<[1], [0], [0], [1], [0, 0, 1, 1], [], []>} : vector<16x48xf32>, vector<48x288xf32>, vector<16x288xf32> -> vector<16x288xf32>
    %284 = arith.addf %279, %283 : vector<16x288xf32>
    %c8_286 = arith.constant 8 : index
    %c0_287 = arith.constant 0 : index
    %c0_288 = arith.constant 0 : index
    %285 = vector.load %arg11[%c8_286, %c0_287, %c0_288] : memref<9x16x48xf32, #tpu.memory_space<vmem>>, vector<1x16x48xf32>
    %286 = vector.shape_cast %285 : vector<1x16x48xf32> to vector<16x48xf32>
    %c0_289 = arith.constant 0 : index
    %c38_290 = arith.constant 38 : index
    %287 = vector.load %arg14[%c0_289, %c38_290] : memref<48x384xf32, #tpu.memory_space<vmem>>, vector<48x288xf32>
    %cst_291 = arith.constant dense<0.000000e+00> : vector<16x288xf32>
    %288 = tpu.matmul %286, %287, %cst_291 {dimension_numbers = #tpu.dot_dimension_numbers<[1], [0], [0], [1], [0, 0, 1, 1], [], []>} : vector<16x48xf32>, vector<48x288xf32>, vector<16x288xf32> -> vector<16x288xf32>
    %289 = arith.addf %284, %288 : vector<16x288xf32>
    %c0_292 = arith.constant 0 : index
    %c0_293 = arith.constant 0 : index
    %290 = vector.load %arg12[%c0_292, %c0_293] : memref<16x1xf32, #tpu.memory_space<vmem>>, vector<16x1xf32>
    %291 = vector.broadcast %290 : vector<16x1xf32> to vector<16x288xf32>
    %292 = arith.addf %289, %291 : vector<16x288xf32>
    %c0_294 = arith.constant 0 : index
    %c19_295 = arith.constant 19 : index
    %293 = vector.load %arg14[%c0_294, %c19_295] : memref<48x384xf32, #tpu.memory_space<vmem>>, vector<16x288xf32>
    %cst_296 = arith.constant 2.000000e-01 : f32
    %294 = vector.broadcast %cst_296 : f32 to vector<16x288xf32>
    %295 = arith.mulf %292, %294 : vector<16x288xf32>
    %296 = arith.addf %295, %293 : vector<16x288xf32>
    %c0_297 = arith.constant 0 : index
    %c0_298 = arith.constant 0 : index
    %c0_299 = arith.constant 0 : index
    %297 = vector.load %arg13[%c0_297, %c0_298, %c0_299] : memref<1x16x288xf32, #tpu.memory_space<vmem>>, vector<1x16x288xf32>
    %298 = vector.shape_cast %297 : vector<1x16x288xf32> to vector<16x288xf32>
    %299 = vector.shape_cast %296 : vector<16x288xf32> to vector<1x16x288xf32>
    tpu.vector_store %arg13[%c0_297, %c0_298, %c0_299], %299 {strides = array<i32>} : memref<1x16x288xf32, #tpu.memory_space<vmem>>, vector<1x16x288xf32>,
    return
  }
  func.func @transform_0(%arg0: i32) -> (i32, i32, i32) {
    %c0_i32 = arith.constant 0 : i32
    %c0_i32_0 = arith.constant 0 : i32
    %c0_i32_1 = arith.constant 0 : i32
    return %arg0, %c0_i32, %c0_i32_0 : i32, i32, i32
  }
  func.func @transform_1(%arg0: i32) -> (i32, i32) {
    %c0_i32 = arith.constant 0 : i32
    %c0_i32_0 = arith.constant 0 : i32
    %c0_i32_1 = arith.constant 0 : i32
    return %c0_i32, %c0_i32_0 : i32, i32
  }
  func.func @transform_2(%arg0: i32) -> (i32, i32, i32) {
    %c0_i32 = arith.constant 0 : i32
    %c0_i32_0 = arith.constant 0 : i32
    %c0_i32_1 = arith.constant 0 : i32
    %c0_i32_2 = arith.constant 0 : i32
    return %c0_i32, %c0_i32_0, %c0_i32_1 : i32, i32, i32
  }
  func.func @transform_3(%arg0: i32) -> (i32, i32) {
    %c0_i32 = arith.constant 0 : i32
    %c0_i32_0 = arith.constant 0 : i32
    %c0_i32_1 = arith.constant 0 : i32
    return %c0_i32, %c0_i32_0 : i32, i32
  }
  func.func @transform_4(%arg0: i32) -> (i32, i32, i32) {
    %c0_i32 = arith.constant 0 : i32
    %c0_i32_0 = arith.constant 0 : i32
    %c0_i32_1 = arith.constant 0 : i32
    %c0_i32_2 = arith.constant 0 : i32
    return %c0_i32, %c0_i32_0, %c0_i32_1 : i32, i32, i32
  }
  func.func @transform_5(%arg0: i32) -> (i32, i32) {
    %c0_i32 = arith.constant 0 : i32
    %c0_i32_0 = arith.constant 0 : i32
    %c0_i32_1 = arith.constant 0 : i32
    return %c0_i32, %c0_i32_0 : i32, i32
  }
  func.func @transform_6(%arg0: i32) -> (i32, i32, i32) {
    %c0_i32 = arith.constant 0 : i32
    %c0_i32_0 = arith.constant 0 : i32
    %c0_i32_1 = arith.constant 0 : i32
    %c0_i32_2 = arith.constant 0 : i32
    return %c0_i32, %c0_i32_0, %c0_i32_1 : i32, i32, i32
  }
  func.func @transform_7(%arg0: i32) -> (i32, i32) {
    %c0_i32 = arith.constant 0 : i32
    %c0_i32_0 = arith.constant 0 : i32
    %c0_i32_1 = arith.constant 0 : i32
    return %c0_i32, %c0_i32_0 : i32, i32
  }
  func.func @transform_8(%arg0: i32) -> (i32, i32, i32) {
    %c0_i32 = arith.constant 0 : i32
    %c0_i32_0 = arith.constant 0 : i32
    %c0_i32_1 = arith.constant 0 : i32
    %c0_i32_2 = arith.constant 0 : i32
    return %c0_i32, %c0_i32_0, %c0_i32_1 : i32, i32, i32
  }
  func.func @transform_9(%arg0: i32) -> (i32, i32) {
    %c0_i32 = arith.constant 0 : i32
    %c0_i32_0 = arith.constant 0 : i32
    %c0_i32_1 = arith.constant 0 : i32
    return %c0_i32, %c0_i32_0 : i32, i32
  }
  func.func @transform_10(%arg0: i32) -> (i32, i32, i32) {
    %c0_i32 = arith.constant 0 : i32
    %c0_i32_0 = arith.constant 0 : i32
    %c0_i32_1 = arith.constant 0 : i32
    %c0_i32_2 = arith.constant 0 : i32
    return %c0_i32, %c0_i32_0, %c0_i32_1 : i32, i32, i32
  }
  func.func @transform_11(%arg0: i32) -> (i32, i32) {
    %c0_i32 = arith.constant 0 : i32
    %c0_i32_0 = arith.constant 0 : i32
    %c0_i32_1 = arith.constant 0 : i32
    return %c0_i32, %c0_i32_0 : i32, i32
  }
  func.func @transform_12(%arg0: i32) -> (i32, i32, i32) {
    %c0_i32 = arith.constant 0 : i32
    %c0_i32_0 = arith.constant 0 : i32
    %c0_i32_1 = arith.constant 0 : i32
    return %arg0, %c0_i32, %c0_i32_0 : i32, i32, i32
  }
}

</mosaic_0001>

<bundles_post_ra>
// kernel: residual_dense_block.1
= control target key start
LH: loop header
LB: loop body
LE: loop exit
PB: predicated region body
PF: predicated region fallthrough
CT: control target
= control target key end

     0   :  { %s7399_s21 = smov 0   ;;  %s10163_s0 = inlined_call_operand.vmem [shape: f32[2,16,384], index: 0, kind: input, shape index: {}]   ;;  %s10164_s1 = inlined_call_operand.vmem [shape: f32[1,288], index: 1, kind: input, shape index: {}]   ;;  %s10165_s2 = inlined_call_operand.vmem [shape: f32[9,8,16], index: 2, kind: input, shape index: {}]   ;;  %s10166_s3 = inlined_call_operand.vmem [shape: f32[8,1], index: 3, kind: input, shape index: {}]   ;;  %s10167_s4 = inlined_call_operand.vmem [shape: f32[9,8,24], index: 4, kind: input, shape index: {}]   ;;  %s10168_s5 = inlined_call_operand.vmem [shape: f32[8,1], index: 5, kind: input, shape index: {}]   ;;  %s10169_s6 = inlined_call_operand.vmem [shape: f32[9,8,32], index: 6, kind: input, shape index: {}]   ;;  %s10170_s7 = inlined_call_operand.vmem [shape: f32[8,1], index: 7, kind: input, shape index: {}]   ;;  %s10171_s8 = inlined_call_operand.vmem [shape: f32[9,8,40], index: 8, kind: input, shape index: {}]   ;;  %s10172_s9 = inlined_call_operand.vmem [shape: f32[8,1], index: 9, kind: input, shape index: {}]   ;;  %s10173_s10 = inlined_call_operand.vmem [shape: f32[9,16,48], index: 10, kind: input, shape index: {}]   ;;  %s10174_s11 = inlined_call_operand.vmem [shape: f32[16,1], index: 11, kind: input, shape index: {}]   ;;  %s10175_s12 = inlined_call_operand.vmem [shape: f32[2,16,288], index: 12, kind: output, shape index: {}]  }
   0x1 LB: > { %s5830_s22 = sadd.s32 4294967295, %s7321_s21   ;;  %p5834_p0 = scmp.ge.s32.totalorder %s7321_s21, 1  ;;  %s7321_s21 = sphi %s7399_s21, %s22_s21  }
   0x2   : > { %p362_p1 = scmp.lt.s32.totalorder %s7321_s21, 3 }
   0x4   : > { %p363_p2 = pnand %p5834_p0, %p362_p1 }
   0x6   : > { %366 = sbr.rel (%p363_p2) target bundleno = 2253 (0x8cd), region = 68 }
   0xb   : > { %p404_p3 = scmp.lt.s32.totalorder %s5830_s22, 1  ;;  %s7323_s27 = smov 127   ;;  %vm477_vm0 = vcmask 130048   ;;  %v7501_v14 = vld [vmem:[%s10165_s2] sm:$0xff]  ;;  %vm466_vm1 = vcmask 1039360   ;;  %vm618_vm2 = vcmask 1031168  }
   0xc   : > { %s7324_s28 = smov 126   ;;  %s7325_s29 = smov 110   ;;  %v5837_v32 = vld [vmem:[%s10165_s2 + $0x8] sm:$0xff]  ;;  %vm709_vm3 = vcmask 900096   ;;  %vm800_vm4 = vcmask 891904   ;;  %v5844_v56 = vld [vmem:[%s10165_s2 + $0x10] sm:$0xff] }
   0xd   : > { %s10361_s22 = smov (!%p404_p3, %s5830_s22), 1  ;;  %s7326_s30 = smov 109   ;;  %v5848_v61 = vld [vmem:[%s10165_s2 + $0x18] sm:$0xff]  ;;  %vm891_vm5 = vcmask 883712   ;;  %vm982_vm6 = vcmask 752640   ;;  %vm1073_vm7 = vcmask 744448  }
   0xe   : > { %s6061_s23 = smul.u32 48, %s10361_s22  ;;  %s7327_s13 = smov 108   ;;  %vm1164_vm8 = vcmask 736256   ;;  %vm1290_vm12 = vcmask 154624   ;;  %vm1296_vm13 = vcmask 1047704   ;;  %vm1299_vm14 = vcmask 416768  }
   0xf   : > { %s7328_s14 = smov 92   ;;  %s7329_s15 = smov 91   ;;  %vm1355_vm15 = vcmask 195584  }
  0x10   : > { %s408_s26 = scalar_lea.vmem %s10163_s0, %s6061_s23  ;;  %s7330_s16 = smov 90  }
  0x11   : > { %v7415_v0 = vld [vmem:[%s408_s26 + $0x20] sm:$0xff]  ;;  %v7417_v1 = vld [vmem:[%s408_s26 + $0x28] sm:$0xff]  ;;  %v428_v5 = vld [vmem:[%s408_s26 + $0x10] sm:$0xff]  ;;  %s7332_s18 = smov 19   ;;  %s10142_s17 = scalar_lea.vmem %s10175_s12, %s6061_s23 }
  0x12   : > { %v7419_v2 = vld [vmem:[%s408_s26] sm:$0xff]  ;;  %436 = vst [vmem:[#allocation2 + $0x20] sm:$0xff] %v7415_v0  ;;  %v7424_v3 = vpack.i.bf16 %v7417_v1, %v7415_v0  ;;  %v7426_v4 = vld [vmem:[%s408_s26 + $0x8] sm:$0xff]  ;;  %v7428_v6 = vld [vmem:[%s408_s26 + $0x18] sm:$0xff]  ;;  %598 = vmatpush.msra.mxu1 %v7417_v1  ;;  %v6166_v10 = vpack.i.bf16 %v428_v5, %v7417_v1 }
  0x13   : > { %437 = vst [vmem:[#allocation2 + $0x28] sm:$0xff] %v7417_v1  ;;  %v7434_v7 = vpack.i.bf16 %v7426_v4, %v7419_v2  ;;  %v7437_v8 = vpack.i.bf16 %v7428_v6, %v428_v5  ;;  %v6156_v9 = vpack.i.bf16 %v7415_v0, %v7428_v6  ;;  %v6176_v11 = vpack.i.bf16 %v7419_v2, %v7417_v1 }
  0x14   : > { %6092 = vrot.lane.b32.xlu1 %v7424_v3, %s7323_s27  ;;  %432 = vst [vmem:[#allocation2] sm:$0xff] %v7419_v2  ;;  %599 = vmatpush.msra.mxu1 %v428_v5  ;;  %v7482_v12 = vpack.i.bf16 %v428_v5, %v7426_v4 }
  0x15   : > { %433 = vst [vmem:[#allocation2 + $0x8] sm:$0xff] %v7426_v4  ;;  %6082 = vrot.lane.b32.xlu0 %v7434_v7, %s7323_s27  ;;  %6102 = vrot.lane.b32.xlu2 %v7437_v8, %s7324_s28 }
  0x16   : > { %434 = vst [vmem:[#allocation2 + $0x10] sm:$0xff] %v428_v5  ;;  %5843 = vmatmul.msk.f32.vlgmr.msra.gmra.mxu1 %vm477_vm0, %v7501_v14 }
  0x17   : > { %435 = vst [vmem:[#allocation2 + $0x18] sm:$0xff] %v7428_v6 }
  0x1c   : > { %6097 = vrot.lane.b32.xlu1 %v7434_v7, %s7324_s28 }
  0x1d   : > { %6087 = vrot.lane.b32.xlu0 %v7437_v8, %s7323_s27  ;;  %6107 = vrot.lane.b32.xlu2 %v7424_v3, %s7324_s28 }
  0x24   : > { %6117 = vrot.lane.b32.xlu1 %v7437_v8, %s7325_s29 }
  0x25   : > { %6112 = vrot.lane.b32.xlu0 %v7434_v7, %s7325_s29  ;;  %6122 = vrot.lane.b32.xlu2 %v7424_v3, %s7325_s29 }
  0x2c   : > { %6132 = vrot.lane.b32.xlu1 %v7437_v8, %s7326_s30 }
  0x2d   : > { %6127 = vrot.lane.b32.xlu0 %v7434_v7, %s7326_s30  ;;  %6137 = vrot.lane.b32.xlu2 %v7424_v3, %s7326_s30 }
  0x34   : > { %6147 = vrot.lane.b32.xlu1 %v7437_v8, %s7327_s13 }
  0x35   : > { %6142 = vrot.lane.b32.xlu0 %v7434_v7, %s7327_s13  ;;  %6152 = vrot.lane.b32.xlu2 %v7424_v3, %s7327_s13 }
  0x3c   : > { %6162 = vrot.lane.b32.xlu1 %v7434_v7, %s7328_s14 }
  0x3d   : > { %6157 = vrot.lane.b32.xlu0 %v6156_v9, %s7328_s14  ;;  %6167 = vrot.lane.b32.xlu2 %v6166_v10, %s7328_s14 }
  0x44   : > { %6177 = vrot.lane.b32.xlu1 %v6176_v11, %s7329_s15 }
  0x45   : > { %6172 = vrot.lane.b32.xlu0 %v6156_v9, %s7329_s15  ;;  %6182 = vrot.lane.b32.xlu2 %v7482_v12, %s7329_s15 }
  0x4c   : > { %6192 = vrot.lane.b32.xlu1 %v6176_v11, %s7330_s16 }
  0x4d   : > { %6187 = vrot.lane.b32.xlu0 %v6156_v9, %s7330_s16  ;;  %6197 = vrot.lane.b32.xlu2 %v7482_v12, %s7330_s16 }
  0x54   : > { %6213 = vrot.lane.b32.xlu1 %v7424_v3, %s7323_s27 }
  0x55   : > { %6203 = vrot.lane.b32.xlu2 %v7434_v7, %s7323_s27 }
  0x6f   : > { %v7496_v13 = vpop.permute.xlu2 %6102 }
  0x70   : > { %v6105_v23 = vunpack.i.h.bf16 %v7496_v13  ;;  %v6104_v44 = vunpack.i.l.bf16 %v7496_v13 }
  0x77   : > { %v7505_v15 = vpop.permute.xlu2 %6107 }
  0x78   : > { %v6109_v24 = vunpack.i.l.bf16 %v7505_v15  ;;  %v6110_v37 = vunpack.i.h.bf16 %v7505_v15 }
  0x7a   : > { %v621_v38 = vsel %vm618_vm2, %v6105_v23, %v6109_v24  ;;  %v622_v48 = vsel %vm618_vm2, %v6109_v24, %v6110_v37  ;;  %v1241_v23 = vld [vmem:[%s10166_s3] sm:$0xff] }
  0x7f   : > { %v6123_v21 = vpop.permute.xlu2 %6122 }
  0x80   : > { %v6125_v35 = vunpack.i.h.bf16 %v6123_v21  ;;  %v6124_v36 = vunpack.i.l.bf16 %v6123_v21 }
  0x82   : > { %v713_v43 = vsel %vm709_vm3, %v6124_v36, %v6125_v35 }
  0x86   : > { %v6093_v16 = vpop.permute.xlu1 %6092 }
  0x87   : > { %v6094_v17 = vunpack.i.l.bf16 %v6093_v16  ;;  %v6083_v18 = vpop.permute.xlu0 %6082  ;;  %v6095_v19 = vunpack.i.h.bf16 %v6093_v16  ;;  %v6138_v40 = vpop.permute.xlu2 %6137 }
  0x88   : > { %v6085_v27 = vunpack.i.h.bf16 %v6083_v18  ;;  %v6084_v28 = vunpack.i.l.bf16 %v6083_v18  ;;  %v6140_v50 = vunpack.i.h.bf16 %v6138_v40  ;;  %v6139_v54 = vunpack.i.l.bf16 %v6138_v40 }
  0x89   : > { %535 = vmatpush.msra.mxu2 %v6095_v19  ;;  %v470_v20 = vsel %vm466_vm1, %v6094_v17, %v6095_v19 }
  0x8a   : > { %515 = vmatpush.msra.mxu3 %v470_v20  ;;  %v467_v41 = vsel %vm466_vm1, %v6084_v28, %v6085_v27  ;;  %v804_v58 = vsel %vm800_vm4, %v6139_v54, %v6140_v50 }
  0x8e   : > { %v6098_v22 = vpop.permute.xlu1 %6097 }
  0x8f   : > { %v6099_v25 = vunpack.i.l.bf16 %v6098_v22  ;;  %v6088_v26 = vpop.permute.xlu0 %6087  ;;  %v6100_v31 = vunpack.i.h.bf16 %v6098_v22  ;;  %v6153_v59 = vpop.permute.xlu2 %6152  ;;  %v5852_v22 = vld [vmem:[%s10165_s2 + $0x20] sm:$0xff] }
  0x90   : > { %v6090_v29 = vunpack.i.h.bf16 %v6088_v26  ;;  %v6089_v30 = vunpack.i.l.bf16 %v6088_v26  ;;  %v6155_v11 = vunpack.i.h.bf16 %v6153_v59  ;;  %v6154_v13 = vunpack.i.l.bf16 %v6153_v59  ;;  %v5864_v59 = vld [vmem:[%s10165_s2 + $0x38] sm:$0xff] }
  0x91   : > { %v619_v39 = vsel %vm618_vm2, %v6099_v25, %v6100_v31  ;;  %v620_v52 = vsel %vm618_vm2, %v6100_v31, %v6104_v44 }
  0x92   : > { %536 = vmatpush.msra.mxu2 %v6089_v30  ;;  %v469_v33 = vsel %vm466_vm1, %v6090_v29, %v6094_v17  ;;  %v468_v34 = vsel %vm466_vm1, %v6085_v27, %v6089_v30  ;;  %v895_v17 = vsel %vm891_vm5, %v6154_v13, %v6155_v11  ;;  %v7331_v27 = vmov 0  }
  0x93   : > { %495 = vmatpush.msra.mxu0 %v469_v33  ;;  %516 = vmatpush.msra.mxu3 %v468_v34 }
  0x94   : > { %646 = vmatpush.msrb.mxu2 %v621_v38  ;;  %5839 = vmatmul.msk.f32.vlgmr.msra.gmra.mxu3 %vm477_vm0, %v5837_v32 }
  0x95   : > { %558 = vmatpush.msrb.mxu3 %v7428_v6  ;;  %496 = vmatpush.msra.mxu0 %v467_v41 }
  0x96   : > { %647 = vmatpush.msrb.mxu2 %v619_v39  ;;  %5838 = vmatmul.msk.f32.vlgmr.msra.gmra.mxu0 %vm477_vm0, %v5837_v32  ;;  %v6118_v42 = vpop.permute.xlu1 %6117  ;;  %v5856_v39 = vld [vmem:[%s10165_s2 + $0x28] sm:$0xff] }
  0x97   : > { %5840 = vmatmul.msk.f32.vlgmr.msra.gmra.mxu2 %vm477_vm0, %v5837_v32  ;;  %559 = vmatpush.msrb.mxu3 %v7419_v2  ;;  %v6120_v45 = vunpack.i.h.bf16 %v6118_v42  ;;  %v6119_v46 = vunpack.i.l.bf16 %v6118_v42  ;;  %v6113_v47 = vpop.permute.xlu0 %6112  ;;  %v6168_v26 = vpop.permute.xlu2 %6167 }
  0x98   : > { %578 = vmatpush.msrb.mxu0 %v7415_v0  ;;  %v6115_v49 = vunpack.i.h.bf16 %v6113_v47  ;;  %v6114_v51 = vunpack.i.l.bf16 %v6113_v47  ;;  %757 = vmatpush.msra.mxu2 %v713_v43  ;;  %v6169_v30 = vunpack.i.l.bf16 %v6168_v26  ;;  %v6170_v32 = vunpack.i.h.bf16 %v6168_v26 }
  0x99   : > { %666 = vmatpush.msra.mxu3 %v622_v48  ;;  %v712_v53 = vsel %vm709_vm3, %v6120_v45, %v6124_v36  ;;  %6201 = vset.pattern.permute.xlu0 %v7331_v27  ;;  %v5860_v45 = vld [vmem:[%s10165_s2 + $0x30] sm:$0xff] }
  0x9a   : > { %579 = vmatpush.msrb.mxu0 %v7426_v4  ;;  %v711_v55 = vsel %vm709_vm3, %v6115_v49, %v6119_v46  ;;  %737 = vmatpush.msrb.mxu1 %v712_v53  ;;  %v710_v57 = vsel %vm709_vm3, %v6114_v51, %v6115_v49 }
  0x9b   : > { %667 = vmatpush.msra.mxu3 %v620_v52  ;;  %758 = vmatpush.msra.mxu2 %v711_v55 }
  0x9c   : > { %686 = vmatpush.msra.mxu0 %v6110_v37  ;;  %5841 = vmatmul.msk.f32.vlgmr.msrb.gmra.mxu3 %vm477_vm0, %v7501_v14 }
  0x9d   : > { %777 = vmatpush.msrb.mxu3 %v6125_v35  ;;  %738 = vmatpush.msrb.mxu1 %v710_v57 }
  0x9e   : > { %687 = vmatpush.msra.mxu0 %v6104_v44  ;;  %v6133_v60 = vpop.permute.xlu1 %6132  ;;  %5849 = vmatmul.msk.f32.vlgmr.msrb.gmra.mxu1 %vm477_vm0, %v5848_v61 }
  0x9f   : > { %5842 = vmatmul.msk.f32.vlgmr.msrb.gmra.mxu0 %vm477_vm0, %v7501_v14  ;;  %5845 = vmatmul.msk.f32.vlgmr.msrb.gmra.mxu2 %vm477_vm0, %v5844_v56  ;;  %v6135_v62 = vunpack.i.h.bf16 %v6133_v60  ;;  %v6134_v63 = vunpack.i.l.bf16 %v6133_v60  ;;  %v6128_v5 = vpop.permute.xlu0 %6127  ;;  %v6183_v40 = vpop.permute.xlu2 %6182 }
  0xa0   : > { %778 = vmatpush.msrb.mxu3 %v6119_v46  ;;  %v6130_v9 = vunpack.i.h.bf16 %v6128_v5  ;;  %v6129_v10 = vunpack.i.l.bf16 %v6128_v5  ;;  %848 = vmatpush.msra.mxu1 %v804_v58  ;;  %v6184_v47 = vunpack.i.l.bf16 %v6183_v40  ;;  %v6185_v51 = vunpack.i.h.bf16 %v6183_v40 }
  0xa1   : > { %868 = vmatpush.msrb.mxu2 %v6140_v50  ;;  %v803_v15 = vsel %vm800_vm4, %v6135_v62, %v6139_v54  ;;  %6617 = vset.pattern.permute.xlu1 %v7331_v27 }
  0xa2   : > { %828 = vmatpush.msrb.mxu0 %v803_v15  ;;  %v802_v14 = vsel %vm800_vm4, %v6130_v9, %v6134_v63  ;;  %v801_v16 = vsel %vm800_vm4, %v6129_v10, %v6130_v9  ;;  %1244 = vperm.xlu0 %6201, %v1241_v23   ;;  %v1075_v57 = vsel %vm1073_vm7, %v6184_v47, %v6185_v51 }
  0xa3   : > { %869 = vmatpush.msrb.mxu2 %v6134_v63  ;;  %849 = vmatpush.msra.mxu1 %v802_v14 }
  0xa4   : > { %5846 = vmatmul.msk.f32.vlgmr.msra.gmra.mxu3 %vm477_vm0, %v5844_v56  ;;  %829 = vmatpush.msrb.mxu0 %v801_v16 }
  0xa5   : > { %959 = vmatpush.msrb.mxu1 %v6155_v11  ;;  %7258 = vset.pattern.permute.xlu2 %v7331_v27 }
  0xa6   : > { %v6148_v18 = vpop.permute.xlu1 %6147  ;;  %5854 = vmatmul.msk.f32.vlgmr.msra.gmra.mxu1 %vm477_vm0, %v5852_v22 }
  0xa7   : > { %5847 = vmatmul.msk.f32.vlgmr.msra.gmra.mxu0 %vm477_vm0, %v5844_v56  ;;  %5850 = vmatmul.msk.f32.vlgmr.msra.gmra.mxu2 %vm477_vm0, %v5848_v61  ;;  %v6150_v19 = vunpack.i.h.bf16 %v6148_v18  ;;  %v6149_v20 = vunpack.i.l.bf16 %v6148_v18  ;;  %v6143_v21 = vpop.permute.xlu0 %6142  ;;  %v6198_v58 = vpop.permute.xlu2 %6197 }
  0xa8   : > { %939 = vmatpush.msra.mxu0 %v895_v17  ;;  %v6145_v24 = vunpack.i.h.bf16 %v6143_v21  ;;  %v6144_v25 = vunpack.i.l.bf16 %v6143_v21  ;;  %v6199_v62 = vunpack.i.l.bf16 %v6198_v58  ;;  %v5868_v17 = vld [vmem:[%s10165_s2 + $0x40] sm:$0xff] }
  0xa9   : > { %v894_v28 = vsel %vm891_vm5, %v6150_v19, %v6154_v13  ;;  %960 = vmatpush.msrb.mxu1 %v6149_v20  ;;  %v601_v19 = vpop.f32.mrf.mxu1 }
  0xaa   : > { %919 = vmatpush.msra.mxu3 %v894_v28  ;;  %v893_v29 = vsel %vm891_vm5, %v6145_v24, %v6149_v20  ;;  %v892_v31 = vsel %vm891_vm5, %v6144_v25, %v6145_v24  ;;  %6208 = vrot.lane.b32.xlu0 %v7437_v8, %s7323_s27 }
  0xab   : > { %940 = vmatpush.msra.mxu0 %v893_v29 }
  0xac   : > { %5851 = vmatmul.msk.f32.vlgmr.msrb.gmra.mxu3 %vm477_vm0, %v5848_v61  ;;  %v6200_v61 = vunpack.i.h.bf16 %v6198_v58 }
  0xad   : > { %920 = vmatpush.msra.mxu3 %v892_v31 }
  0xae   : > { %v6163_v33 = vpop.permute.xlu1 %6162  ;;  %5859 = vmatmul.msk.f32.vlgmr.msrb.gmra.mxu1 %vm477_vm0, %v5856_v39  ;;  %v1166_v16 = vsel %vm1164_vm8, %v6199_v62, %v6200_v61 }
  0xaf   : > { %5853 = vmatmul.msk.f32.vlgmr.msrb.gmra.mxu0 %vm477_vm0, %v5852_v22  ;;  %5855 = vmatmul.msk.f32.vlgmr.msrb.gmra.mxu2 %vm477_vm0, %v5852_v22  ;;  %v6165_v34 = vunpack.i.h.bf16 %v6163_v33  ;;  %v6164_v35 = vunpack.i.l.bf16 %v6163_v33  ;;  %v6158_v36 = vpop.permute.xlu0 %6157 }
  0xb0   : > { %1050 = vmatpush.msrb.mxu0 %v6169_v30  ;;  %v6160_v37 = vunpack.i.h.bf16 %v6158_v36  ;;  %v6159_v38 = vunpack.i.l.bf16 %v6158_v36 }
  0xb1   : > { %v983_v43 = vsel %vm982_vm6, %v6164_v35, %v6165_v34  ;;  %v984_v44 = vsel %vm982_vm6, %v6165_v34, %v6170_v32 }
  0xb2   : > { %1051 = vmatpush.msrb.mxu0 %v6170_v32  ;;  %v985_v41 = vsel %vm982_vm6, %v6159_v38, %v6160_v37  ;;  %v986_v42 = vsel %vm982_vm6, %v6160_v37, %v6169_v30  ;;  %6228 = vrot.lane.b32.xlu0 %v7424_v3, %s7324_s28 }
  0xb3   : > { %1010 = vmatpush.msra.mxu2 %v985_v41  ;;  %1030 = vmatpush.msrb.mxu3 %v986_v42 }
  0xb4   : > { %5857 = vmatmul.msk.f32.vlgmr.msra.gmra.mxu3 %vm477_vm0, %v5856_v39 }
  0xb5   : > { %1011 = vmatpush.msra.mxu2 %v983_v43  ;;  %1031 = vmatpush.msrb.mxu3 %v984_v44 }
  0xb6   : > { %v6178_v46 = vpop.permute.xlu1 %6177 }
  0xb7   : > { %5858 = vmatmul.msk.f32.vlgmr.msra.gmra.mxu0 %vm477_vm0, %v5856_v39  ;;  %5861 = vmatmul.msk.f32.vlgmr.msra.gmra.mxu2 %vm477_vm0, %v5860_v45  ;;  %v6180_v48 = vunpack.i.h.bf16 %v6178_v46  ;;  %v6179_v49 = vunpack.i.l.bf16 %v6178_v46  ;;  %v6173_v50 = vpop.permute.xlu0 %6172 }
  0xb8   : > { %v6175_v52 = vunpack.i.h.bf16 %v6173_v50  ;;  %v6174_v53 = vunpack.i.l.bf16 %v6173_v50 }
  0xb9   : > { %1141 = vmatpush.msra.mxu3 %v6179_v49  ;;  %v1074_v56 = vsel %vm1073_vm7, %v6180_v48, %v6184_v47 }
  0xba   : > { %v1076_v54 = vsel %vm1073_vm7, %v6174_v53, %v6175_v52  ;;  %v1077_v55 = vsel %vm1073_vm7, %v6175_v52, %v6179_v49  ;;  %6233 = vrot.lane.b32.xlu0 %v7434_v7, %s7325_s29 }
  0xbb   : > { %1101 = vmatpush.msra.mxu1 %v1076_v54  ;;  %1121 = vmatpush.msrb.mxu2 %v1077_v55 }
  0xbc   : > { %5862 = vmatmul.msk.f32.vlgmr.msrb.gmra.mxu3 %vm477_vm0, %v5860_v45 }
  0xbd   : > { %1142 = vmatpush.msra.mxu3 %v6185_v51  ;;  %1102 = vmatpush.msra.mxu1 %v1074_v56 }
  0xbe   : > { %1122 = vmatpush.msrb.mxu2 %v1075_v57  ;;  %v6193_v60 = vpop.permute.xlu1 %6192  ;;  %5865 = vmatmul.msk.f32.vlgmr.msra.gmra.mxu1 %vm477_vm0, %v5864_v59 }
  0xbf   : > { %5863 = vmatmul.msk.f32.vlgmr.msrb.gmra.mxu0 %vm477_vm0, %v5860_v45  ;;  %5866 = vmatmul.msk.f32.vlgmr.msrb.gmra.mxu2 %vm477_vm0, %v5864_v59  ;;  %v6195_v63 = vunpack.i.h.bf16 %v6193_v60  ;;  %v6194_v5 = vunpack.i.l.bf16 %v6193_v60  ;;  %v6188_v9 = vpop.permute.xlu0 %6187 }
  0xc0   : > { %v6190_v10 = vunpack.i.h.bf16 %v6188_v9  ;;  %v6189_v11 = vunpack.i.l.bf16 %v6188_v9 }
  0xc1   : > { %1232 = vmatpush.msra.mxu2 %v6194_v5  ;;  %v1165_v14 = vsel %vm1164_vm8, %v6195_v63, %v6199_v62 }
  0xc2   : > { %v1167_v13 = vsel %vm1164_vm8, %v6189_v11, %v6190_v10  ;;  %v1168_v15 = vsel %vm1164_vm8, %v6190_v10, %v6194_v5  ;;  %6253 = vrot.lane.b32.xlu0 %v7437_v8, %s7326_s30 }
  0xc3   : > { %1192 = vmatpush.msra.mxu0 %v1167_v13  ;;  %1212 = vmatpush.msrb.mxu1 %v1168_v15 }
  0xc4   : > { %5867 = vmatmul.msk.f32.vlgmr.msra.gmra.mxu3 %vm477_vm0, %v5864_v59  ;;  %1233 = vmatpush.msra.mxu2 %v6200_v61 }
  0xc5   : > { %1193 = vmatpush.msra.mxu0 %v1165_v14  ;;  %1213 = vmatpush.msrb.mxu1 %v1166_v16 }
  0xc6   : > { %5870 = vmatmul.msk.f32.vlgmr.msrb.gmra.mxu1 %vm477_vm0, %v5868_v17 }
  0xc7   : > { %5869 = vmatmul.msk.f32.vlgmr.msra.gmra.mxu0 %vm477_vm0, %v5868_v17  ;;  %5871 = vmatmul.msk.f32.vlgmr.msra.gmra.mxu2 %vm477_vm0, %v5868_v17 }
  0xca   : > { %6273 = vrot.lane.b32.xlu0 %v7424_v3, %s7327_s13 }
 0x113   : > { %v498_v18 = vpop.f32.mrf.mxu0 }
 0x114   : > { %v1245_v60 = vpop.permute.xlu0 %1244 }
 0x117   : > { %v518_v20 = vpop.f32.mrf.mxu3 }
 0x11a   : > { %v538_v21 = vpop.f32.mrf.mxu2 }
 0x11b   : > { %v740_v23 = vpop.f32.mrf.mxu1  ;;  %v602_v41 = vadd.f32 %v601_v19, %v538_v21 }
 0x11c   : > { %v581_v22 = vpop.f32.mrf.mxu0 }
 0x11d   : > { %v582_v33 = vadd.f32 %v581_v22, %v518_v20 }
 0x11f   : > { %v561_v24 = vpop.f32.mrf.mxu3 }
 0x120   : > { %v562_v31 = vadd.f32 %v561_v24, %v498_v18  ;;  %v438_v24 = vld [vmem:[%s10164_s1] sm:$0x7] }
 0x122   : > { %v649_v25 = vpop.f32.mrf.mxu2 }
 0x123   : > { %v851_v28 = vpop.f32.mrf.mxu1  ;;  %v692_v34 = vadd.f32 %v649_v25, %v562_v31 }
 0x124   : > { %v689_v26 = vpop.f32.mrf.mxu0 }
 0x125   : > { %v783_v39 = vadd.f32 %v740_v23, %v692_v34  ;;  %v694_v44 = vadd.f32 %v689_v26, %v602_v41 }
 0x127   : > { %v669_v27 = vpop.f32.mrf.mxu3 }
 0x128   : > { %v693_v38 = vadd.f32 %v669_v27, %v582_v33 }
 0x12a   : > { %v760_v29 = vpop.f32.mrf.mxu2 }
 0x12b   : > { %v962_v36 = vpop.f32.mrf.mxu1  ;;  %v784_v42 = vadd.f32 %v760_v29, %v693_v38  ;;  %v7615_v29 = vperm.slane %v438_v24, 0 }
 0x12c   : > { %v831_v30 = vpop.f32.mrf.mxu0 }
 0x12d   : > { %v874_v43 = vadd.f32 %v831_v30, %v783_v39  ;;  %v875_v48 = vadd.f32 %v851_v28, %v784_v42  ;;  %10252 = vst [vmem:[#allocation3_spill] sm:$0xff] %v7615_v29  ;;  %v7617_v30 = vperm.slane %v438_v24, 1 }
 0x12f   : > { %v780_v32 = vpop.f32.mrf.mxu3  ;;  %10253 = vst [vmem:[#allocation4_spill] sm:$0xff] %v7617_v30 }
 0x130   : > { %v785_v49 = vadd.f32 %v780_v32, %v694_v44  ;;  %v7643_v44 = vpop.permute.xlu2 %6203 }
 0x132   : > { %v871_v35 = vpop.f32.mrf.mxu2 }
 0x133   : > { %v876_v54 = vadd.f32 %v871_v35, %v785_v49 }
 0x134   : > { %v942_v37 = vpop.f32.mrf.mxu0 }
 0x135   : > { %v966_v51 = vadd.f32 %v942_v37, %v875_v48  ;;  %v967_v61 = vadd.f32 %v962_v36, %v876_v54 }
 0x137   : > { %v922_v40 = vpop.f32.mrf.mxu3 }
 0x138   : > { %v965_v45 = vadd.f32 %v922_v40, %v874_v43  ;;  %v7623_v40 = vperm.slane %v438_v24, 2  ;;  %v7333_v43 = vmov 0.0  }
 0x139   : > { %414 = vst [vmem:[#allocation2 + $0x30] sm:$0xff] %v7333_v43 }
 0x13a   : > { %v1013_v46 = vpop.f32.mrf.mxu2  ;;  %10254 = vst [vmem:[#allocation5_spill] sm:$0xff] %v7623_v40 }
 0x13b   : > { %v1104_v50 = vpop.f32.mrf.mxu1  ;;  %v1056_v52 = vadd.f32 %v1013_v46, %v965_v45  ;;  %416 = vst [vmem:[#allocation2 + $0x40] sm:$0xff] %v7333_v43  ;;  %v7645_v45 = vpop.permute.xlu1 %6213 }
 0x13c   : > { %v1053_v47 = vpop.f32.mrf.mxu0  ;;  %417 = vst [vmem:[#allocation2 + $0x48] sm:$0xff] %v7333_v43 }
 0x13d   : > { %v1147_v56 = vadd.f32 %v1104_v50, %v1056_v52  ;;  %v1058_v9 = vadd.f32 %v1053_v47, %v967_v61  ;;  %419 = vst [vmem:[#allocation2 + $0x58] sm:$0xff] %v7333_v43 }
 0x13e   : > { %420 = vst [vmem:[#allocation2 + $0x60] sm:$0xff] %v7333_v43 }
 0x13f   : > { %v1033_v53 = vpop.f32.mrf.mxu3  ;;  %422 = vst [vmem:[#allocation2 + $0x70] sm:$0xff] %v7333_v43 }
 0x140   : > { %v1057_v55 = vadd.f32 %v1033_v53, %v966_v51  ;;  %423 = vst [vmem:[#allocation2 + $0x78] sm:$0xff] %v7333_v43 }
 0x141   : > { %425 = vst [vmem:[#allocation2 + $0x88] sm:$0xff] %v7333_v43 }
 0x142   : > { %v1124_v57 = vpop.f32.mrf.mxu2 }
 0x143   : > { %v1148_v58 = vadd.f32 %v1124_v57, %v1057_v55  ;;  %v1215_v63 = vpop.f32.mrf.mxu1  ;;  %v7722_v55 = vld [vmem:[#allocation2 + $0x20] sm:$0xff] }
 0x144   : > { %v1195_v59 = vpop.f32.mrf.mxu0 }
 0x145   : > { %v1238_v62 = vadd.f32 %v1195_v59, %v1147_v56  ;;  %v1239_v5 = vadd.f32 %v1215_v63, %v1148_v58  ;;  %v7724_v56 = vpop.permute.xlu0 %6208  ;;  %v7769_v63 = vld [vmem:[%s10167_s4] sm:$0xff] }
 0x147   : > { %v1247_v10 = vadd.f32 %v1245_v60, %v1238_v62  ;;  %v1248_v11 = vadd.f32 %v1245_v60, %v1239_v5  ;;  %v1144_v13 = vpop.f32.mrf.mxu3 }
 0x148   : > { %v1149_v14 = vadd.f32 %v1144_v13, %v1058_v9  ;;  %v6215_v9 = vunpack.i.l.bf16 %v7645_v45 }
 0x149   : > { %v1250_v15 = vmin.f32 %v1247_v10, 0.0  ;;  %v1251_v16 = vmin.f32 %v1248_v11, 0.0  ;;  %vm1265_vm9 = vcmp.gt.f32.partialorder %v1247_v10, 0.0  ;;  %vm1266_vm10 = vcmp.gt.f32.partialorder %v1248_v11, 0.0 }
 0x14a   : > { %v1235_v18 = vpop.f32.mrf.mxu2 }
 0x14b   : > { %v1253_v17 = vmul.f32 1.442695, %v1250_v15  ;;  %v1255_v19 = vmul.f32 1.442695, %v1251_v16  ;;  %v1240_v20 = vadd.f32 %v1235_v18, %v1149_v14  ;;  %v6206_v15 = vunpack.i.h.bf16 %v7643_v44 }
 0x14c   : > { %v6205_v14 = vunpack.i.l.bf16 %v7643_v44  ;;  %v7882_v44 = vld [vmem:[%s10167_s4 + $0x20] sm:$0xff] }
 0x14d   : > { %7259 = vpow2.f32 %v1253_v17  ;;  %v1249_v21 = vadd.f32 %v1245_v60, %v1240_v20  ;;  %v7744_v59 = vpop.permute.xlu0 %6228 }
 0x14e   : > { %7261 = vpow2.f32 %v1255_v19  ;;  %v1340_v20 = vsel %vm466_vm1, %v6205_v14, %v6206_v15 }
 0x14f   : > { %v1252_v22 = vmin.f32 %v1249_v21, 0.0  ;;  %vm1267_vm11 = vcmp.gt.f32.partialorder %v1249_v21, 0.0 }
 0x151   : > { %v1257_v23 = vmul.f32 1.442695, %v1252_v22 }
 0x153   : > { %v7260_v25 = vpop.eup %7259  ;;  %7263 = vpow2.f32 %v1257_v23 }
 0x154   : > { %v7262_v26 = vpop.eup %7261  ;;  %v5872_v27 = vadd.f32 -1.0, %v7260_v25 }
 0x155   : > { %v5873_v28 = vadd.f32 -1.0, %v7262_v26 }
 0x156   : > { %v1262_v31 = vmul.f32 0.2, %v5872_v27 }
 0x157   : > { %v1263_v32 = vmul.f32 0.2, %v5873_v28 }
 0x158   : > { %v1268_v33 = vsel %vm1265_vm9, %v1247_v10, %v1262_v31  ;;  %v6211_v10 = vunpack.i.h.bf16 %v7724_v56 }
 0x159   : > { %v1269_v34 = vsel %vm1266_vm10, %v1248_v11, %v1263_v32  ;;  %v1278_v35 = vmul.f32 %v7615_v29, %v1268_v33  ;;  %v7264_v36 = vpop.eup %7263  ;;  %v6231_v32 = vunpack.i.h.bf16 %v7744_v59  ;;  %v6230_v33 = vunpack.i.l.bf16 %v7744_v59 }
 0x15a   : > { %v1279_v37 = vmul.f32 %v7617_v30, %v1269_v34  ;;  %v5874_v38 = vadd.f32 -1.0, %v7264_v36  ;;  %v1342_v19 = vsel %vm466_vm1, %v6211_v10, %v6215_v9  ;;  %v6210_v10 = vunpack.i.l.bf16 %v7724_v56 }
 0x15b   : > { %1284 = vrot.lane.b32.xlu1 %v1278_v35, %s7332_s18 }
 0x15c   : > { %1286 = vrot.lane.b32.xlu2 %v1279_v37, %s7332_s18  ;;  %v1264_v39 = vmul.f32 0.2, %v5874_v38 }
 0x15e   : > { %v1270_v41 = vsel %vm1267_vm11, %v1249_v21, %v1264_v39  ;;  %v7795_v21 = vld [vmem:[%s10167_s4 + $0x8] sm:$0xff]  ;;  %vm2310_vm11 = vcmask 261120  }
 0x15f   : > { %v1280_v42 = vmul.f32 %v7623_v40, %v1270_v41  ;;  %v1505_v41 = vsel %vm618_vm2, %v6230_v33, %v6231_v32 }
 0x163   : > { %1288 = vrot.lane.b32.xlu1 %v1280_v42, %s7332_s18  ;;  %v7830_v42 = vld [vmem:[%s10167_s4 + $0x10] sm:$0xff] }
 0x164   : > { %6223 = vrot.lane.b32.xlu2 %v7437_v8, %s7324_s28 }
 0x16b   : > { %6218 = vrot.lane.b32.xlu1 %v7434_v7, %s7324_s28 }
 0x16c   : > { %6243 = vrot.lane.b32.xlu2 %v7424_v3, %s7325_s29 }
 0x173   : > { %6238 = vrot.lane.b32.xlu1 %v7437_v8, %s7325_s29 }
 0x174   : > { %6248 = vrot.lane.b32.xlu2 %v7434_v7, %s7326_s30 }
 0x17b   : > { %6258 = vrot.lane.b32.xlu1 %v7424_v3, %s7326_s30 }
 0x17c   : > { %6268 = vrot.lane.b32.xlu2 %v7437_v8, %s7327_s13 }
 0x183   : > { %6263 = vrot.lane.b32.xlu1 %v7434_v7, %s7327_s13 }
 0x1b6   : > { %v1287_v46 = vpop.permute.xlu2 %1286 }
 0x1cd   : > { %v1285_v47 = vpop.permute.xlu1 %1284 }
 0x1ce   : > { %v7648_v48 = vsel %vm1290_vm12, %v1285_v47, %v1287_v46  ;;  %1297 = vst.msk [vmem:[#allocation2 + $0x30] sm:$0xff] %vm1296_vm13, %v1285_v47 }
 0x1cf   : > { %1298 = vst [vmem:[#allocation2 + $0x38] sm:$0xff] %v7648_v48 }
 0x1d5   : > { %v1289_v49 = vpop.permute.xlu1 %1288  ;;  %v7652_v50 = vld [vmem:[#allocation2 + $0x30] sm:$0xff] }
 0x1d6   : > { %v1292_v51 = vsel %vm1290_vm12, %v1287_v46, %v1289_v49  ;;  %1435 = vmatpush.msrb.mxu2 %v7652_v50  ;;  %v7658_v52 = vpack.i.bf16 %v7648_v48, %v7652_v50  ;;  %v7734_v57 = vpack.i.bf16 %v7652_v50, %v7417_v1 }
 0x1d7   : > { %1300 = vst.msk [vmem:[#allocation2 + $0x40] sm:$0xff] %vm1299_vm14, %v1292_v51 }
 0x1d8   : > { %6288 = vrot.lane.b32.xlu0 %v7658_v52, %s7325_s29  ;;  %6283 = vrot.lane.b32.xlu1 %v7658_v52, %s7324_s28 }
 0x1d9   : > { %6278 = vrot.lane.b32.xlu2 %v7658_v52, %s7323_s27  ;;  %1436 = vmatpush.msrb.mxu2 %v7428_v6 }
 0x1db   : > { %1437 = vmatpush.msrb.mxu2 %v7419_v2 }
 0x1dc   : > { %5879 = vmatmul.msk.f32.vlgmr.msrb.gmra.mxu2 %vm1355_vm15, %v7769_v63 }
 0x1dd   : > { %v7746_v60 = vpop.permute.xlu1 %6218 }
 0x1de   : > { %v7669_v53 = vld [vmem:[#allocation2 + $0x40] sm:$0xff]  ;;  %v6221_v34 = vunpack.i.h.bf16 %v7746_v60 }
 0x1df   : > { %v6302_v54 = vpack.i.bf16 %v7419_v2, %v7669_v53  ;;  %v7705_v2 = vpop.permute.xlu2 %6223  ;;  %v7750_v61 = vpack.i.bf16 %v7669_v53, %v7648_v48 }
 0x1e0   : > { %6298 = vrot.lane.b32.xlu1 %v7658_v52, %s7327_s13 }
 0x1e1   : > { %6293 = vrot.lane.b32.xlu2 %v7658_v52, %s7326_s30  ;;  %6303 = vrot.lane.b32.xlu0 %v6302_v54, %s7323_s27 }
 0x1e5   : > { %v7762_v62 = vpop.permute.xlu1 %6238 }
 0x1e7   : > { %v7713_v6 = vpop.permute.xlu2 %6243 }
 0x1e8   : > { %6313 = vrot.lane.b32.xlu1 %v7437_v8, %s7328_s14 }
 0x1e9   : > { %6318 = vrot.lane.b32.xlu2 %v7424_v3, %s7328_s14  ;;  %6308 = vrot.lane.b32.xlu0 %v7434_v7, %s7328_s14 }
 0x1ed   : > { %v7784_v18 = vpop.permute.xlu1 %6258 }
 0x1ee   : > { %v6260_v39 = vunpack.i.l.bf16 %v7784_v18 }
 0x1ef   : > { %v7736_v58 = vpop.permute.xlu2 %6248 }
 0x1f0   : > { %6338 = vrot.lane.b32.xlu1 %v6302_v54, %s7325_s29  ;;  %v6251_v43 = vunpack.i.h.bf16 %v7736_v58  ;;  %v6250_v46 = vunpack.i.l.bf16 %v7736_v58 }
 0x1f1   : > { %6328 = vrot.lane.b32.xlu2 %v6302_v54, %s7324_s28  ;;  %6323 = vrot.lane.b32.xlu0 %v7658_v52, %s7328_s14 }
 0x1f2   : > { %v1704_v14 = vsel %vm800_vm4, %v6250_v46, %v6251_v43  ;;  %v6245_v46 = vunpack.i.l.bf16 %v7713_v6 }
 0x1f5   : > { %v7806_v24 = vpop.permute.xlu1 %6263 }
 0x1f7   : > { %v7756_v1 = vpop.permute.xlu2 %6268 }
 0x1f8   : > { %6353 = vrot.lane.b32.xlu1 %v7424_v3, %s7329_s15 }
 0x1f9   : > { %6333 = vrot.lane.b32.xlu2 %v7434_v7, %s7329_s15  ;;  %6343 = vrot.lane.b32.xlu0 %v6302_v54, %s7326_s30 }
 0x200   : > { %1904 = vrot.lane.b32.xlu1 %v7669_v53, %s7328_s14 }
 0x201   : > { %1803 = vrot.lane.b32.xlu2 %v7669_v53, %s7327_s13  ;;  %6348 = vrot.lane.b32.xlu0 %v7437_v8, %s7329_s15 }
 0x208   : > { %6363 = vrot.lane.b32.xlu1 %v7434_v7, %s7330_s16  ;;  %v2189_v7 = vld [vmem:[%s10168_s5] sm:$0xff] }
 0x209   : > { %6358 = vrot.lane.b32.xlu2 %v7658_v52, %s7329_s15  ;;  %2005 = vrot.lane.b32.xlu0 %v7669_v53, %s7329_s15 }
 0x210   : > { %6378 = vrot.lane.b32.xlu1 %v7658_v52, %s7330_s16 }
 0x211   : > { %6368 = vrot.lane.b32.xlu2 %v7437_v8, %s7330_s16  ;;  %6373 = vrot.lane.b32.xlu0 %v7424_v3, %s7330_s16  ;;  %v7726_v8 = vld [vmem:[#allocation2 + $0x18] sm:$0xff] }
 0x212   : > { %v7730_v3 = vpack.i.bf16 %v7722_v55, %v7726_v8 }
 0x218   : > { %6383 = vrot.lane.b32.xlu1 %v7482_v12, %s7323_s27 }
 0x219   : > { %2106 = vrot.lane.b32.xlu2 %v7669_v53, %s7330_s16  ;;  %2192 = vperm.xlu0 %6201, %v2189_v7   ;;  %v6216_v7 = vunpack.i.h.bf16 %v7645_v45 }
 0x220   : > { %6398 = vrot.lane.b32.xlu1 %v7482_v12, %s7324_s28  ;;  %v7760_v12 = vpop.permute.xlu0 %6233 }
 0x221   : > { %6393 = vrot.lane.b32.xlu0 %v7734_v57, %s7323_s27  ;;  %6388 = vrot.lane.b32.xlu2 %v7730_v3, %s7323_s27 }
 0x228   : > { %6413 = vrot.lane.b32.xlu1 %v7750_v61, %s7323_s27  ;;  %v7782_v17 = vpop.permute.xlu0 %6253 }
 0x229   : > { %6408 = vrot.lane.b32.xlu0 %v7734_v57, %s7324_s28  ;;  %6403 = vrot.lane.b32.xlu2 %v7730_v3, %s7324_s28  ;;  %v6256_v38 = vunpack.i.h.bf16 %v7782_v17 }
 0x230   : > { %v7804_v23 = vpop.permute.xlu0 %6273 }
 0x231   : > { %6428 = vrot.lane.b32.xlu2 %v7730_v3, %s7325_s29  ;;  %v6276_v56 = vunpack.i.h.bf16 %v7804_v23 }
 0x233   : > { %v7771_v5 = vpop.permute.xlu2 %6278 }
 0x234   : > { %v6281_v11 = vunpack.i.h.bf16 %v7771_v5  ;;  %v6280_v13 = vunpack.i.l.bf16 %v7771_v5  ;;  %v1706_v5 = vsel %vm800_vm4, %v6256_v38, %v6260_v39 }
 0x236   : > { %v1344_v16 = vsel %vm466_vm1, %v6280_v13, %v6281_v11 }
 0x237   : > { %1372 = vmatpush.msrb.mxu3 %v1344_v16 }
 0x239   : > { %1373 = vmatpush.msrb.mxu3 %v1342_v19  ;;  %v1343_v19 = vsel %vm466_vm1, %v6215_v9, %v6216_v7  ;;  %v6270_v9 = vunpack.i.l.bf16 %v7756_v1 }
 0x23b   : > { %v7797_v22 = vpop.permute.xlu2 %6293  ;;  %1374 = vmatpush.msrb.mxu3 %v1340_v20  ;;  %v6226_v20 = vunpack.i.h.bf16 %v7705_v2 }
 0x23c   : > { %5876 = vmatmul.msk.f32.vlgmr.msrb.gmra.mxu3 %vm1355_vm15, %v7795_v21  ;;  %v6296_v35 = vunpack.i.h.bf16 %v7797_v22  ;;  %v6295_v36 = vunpack.i.l.bf16 %v7797_v22 }
 0x23d   : > { %1455 = vmatpush.msra.mxu3 %v7648_v48 }
 0x23e   : > { %v1708_v47 = vsel %vm800_vm4, %v6295_v36, %v6296_v35  ;;  %v6266_v36 = vunpack.i.h.bf16 %v7806_v24 }
 0x23f   : > { %1456 = vmatpush.msra.mxu3 %v7415_v0 }
 0x241   : > { %1457 = vmatpush.msra.mxu3 %v7426_v4  ;;  %v6225_v4 = vunpack.i.l.bf16 %v7705_v2 }
 0x243   : > { %v7808_v25 = vpop.permute.xlu2 %6318  ;;  %v1503_v49 = vsel %vm618_vm2, %v6221_v34, %v6225_v4 }
 0x244   : > { %5880 = vmatmul.msk.f32.vlgmr.msra.gmra.mxu3 %vm1355_vm15, %v7769_v63 }
 0x24a   : > { %v7812_v26 = vpop.permute.xlu0 %6288  ;;  %v6284_v27 = vpop.permute.xlu1 %6283 }
 0x24b   : > { %v7814_v28 = vpop.permute.xlu2 %6328  ;;  %v6286_v31 = vunpack.i.h.bf16 %v6284_v27  ;;  %v6285_v16 = vunpack.i.l.bf16 %v6284_v27  ;;  %v6290_v38 = vunpack.i.l.bf16 %v7812_v26 }
 0x24c   : > { %v6330_v0 = vunpack.i.l.bf16 %v7814_v28 }
 0x24d   : > { %v1506_v2 = vsel %vm618_vm2, %v6285_v16, %v6286_v31  ;;  %v7933_v16 = vld [vmem:[%s10167_s4 + $0x28] sm:$0xff] }
 0x24e   : > { %1573 = vmatpush.msrb.mxu3 %v6330_v0  ;;  %v1507_v37 = vsel %vm618_vm2, %v6286_v31, %v6330_v0  ;;  %v6220_v0 = vunpack.i.l.bf16 %v7746_v60 }
 0x24f   : > { %1553 = vmatpush.msra.mxu2 %v1507_v37  ;;  %v6291_v37 = vunpack.i.h.bf16 %v7812_v26  ;;  %v7906_v26 = vld [vmem:[#allocation2 + $0x28] sm:$0xff] }
 0x250   : > { %1574 = vmatpush.msrb.mxu3 %v6231_v32 }
 0x251   : > { %1554 = vmatpush.msra.mxu2 %v1505_v41  ;;  %v1504_v41 = vsel %vm618_vm2, %v6226_v20, %v6230_v33  ;;  %v1502_v33 = vsel %vm618_vm2, %v6220_v0, %v6221_v34  ;;  %v1607_v60 = vsel %vm709_vm3, %v6290_v38, %v6291_v37  ;;  %v5886_v0 = vld [vmem:[%s10167_s4 + $0x18] sm:$0xff] }
 0x252   : > { %1575 = vmatpush.msrb.mxu3 %v6225_v4  ;;  %v7837_v48 = vpop.permute.xlu1 %6298 }
 0x253   : > { %v7842_v51 = vpop.permute.xlu2 %6333  ;;  %v7844_v54 = vpop.permute.xlu0 %6303  ;;  %1555 = vmatpush.msra.mxu2 %v1503_v49  ;;  %5885 = vmatmul.msk.f32.vlgmr.msrb.gmra.mxu3 %vm1355_vm15, %v7830_v42  ;;  %v6301_v32 = vunpack.i.h.bf16 %v7837_v48  ;;  %v1806_v49 = vsel %vm891_vm5, %v6266_v36, %v6270_v9 }
 0x254   : > { %1735 = vmatpush.msra.mxu3 %v1708_v47  ;;  %v6305_v59 = vunpack.i.l.bf16 %v7844_v54  ;;  %5884 = vmatmul.msk.f32.vlgmr.msra.gmra.mxu2 %vm1355_vm15, %v7830_v42  ;;  %v6241_v47 = vunpack.i.h.bf16 %v7762_v62 }
 0x256   : > { %1736 = vmatpush.msra.mxu3 %v1706_v5  ;;  %1412 = vmatpush.msra.mxu1 %v6305_v59  ;;  %v1345_v13 = vsel %vm466_vm1, %v6281_v11, %v6305_v59  ;;  %v1341_v11 = vsel %vm466_vm1, %v6206_v15, %v6210_v10  ;;  %v6275_v15 = vunpack.i.l.bf16 %v7804_v23  ;;  %v6235_v59 = vunpack.i.l.bf16 %v7760_v12  ;;  %v7919_v5 = vld [vmem:[#allocation2 + $0x10] sm:$0xff] }
 0x257   : > { %1392 = vmatpush.msrb.mxu0 %v1345_v13 }
 0x258   : > { %1737 = vmatpush.msra.mxu3 %v1704_v14  ;;  %1413 = vmatpush.msra.mxu1 %v6216_v7  ;;  %v6236_v7 = vunpack.i.h.bf16 %v7760_v12  ;;  %v1605_v12 = vsel %vm709_vm3, %v6241_v47, %v6245_v46  ;;  %v6255_v47 = vunpack.i.l.bf16 %v7782_v17 }
 0x259   : > { %1393 = vmatpush.msrb.mxu0 %v1343_v19  ;;  %v6240_v19 = vunpack.i.l.bf16 %v7762_v62  ;;  %v6271_v62 = vunpack.i.h.bf16 %v7756_v1 }
 0x25a   : > { %1414 = vmatpush.msra.mxu1 %v6210_v10  ;;  %v7869_v27 = vpop.permute.xlu1 %6313  ;;  %v6246_v10 = vunpack.i.h.bf16 %v7713_v6  ;;  %v1603_v6 = vsel %vm709_vm3, %v6235_v59, %v6236_v7  ;;  %v6321_v59 = vunpack.i.h.bf16 %v7808_v25 }
 0x25b   : > { %v7872_v4 = vpop.permute.xlu2 %1803  ;;  %v7874_v45 = vpop.permute.xlu0 %6308  ;;  %1394 = vmatpush.msrb.mxu0 %v1341_v11  ;;  %5878 = vmatmul.msk.f32.vlgmr.msra.gmra.mxu1 %vm1355_vm15, %v7795_v21  ;;  %v6315_v58 = vunpack.i.l.bf16 %v7869_v27 }
 0x25c   : > { %1533 = vmatpush.msrb.mxu1 %v1506_v2  ;;  %5877 = vmatmul.msk.f32.vlgmr.msrb.gmra.mxu0 %vm1355_vm15, %v7795_v21  ;;  %v1810_v31 = vsel %vm891_vm5, %v6301_v32, %v7872_v4  ;;  %v1808_v21 = vsel %vm891_vm5, %v6275_v15, %v6276_v56  ;;  %v1606_v11 = vsel %vm709_vm3, %v6245_v46, %v6246_v10  ;;  %v6265_v2 = vunpack.i.l.bf16 %v7806_v24 }
 0x25d   : > { %1475 = vmatpush.msra.mxu0 %v7669_v53  ;;  %1856 = vmatpush.msrb.mxu3 %v1810_v31  ;;  %v1807_v46 = vsel %vm891_vm5, %v6271_v62, %v6275_v15  ;;  %v6316_v15 = vunpack.i.h.bf16 %v7869_v27  ;;  %v1705_v24 = vsel %vm800_vm4, %v6251_v43, %v6255_v47 }
 0x25e   : > { %1534 = vmatpush.msrb.mxu1 %v1504_v41  ;;  %5891 = vmatmul.msk.f32.vlgmr.msra.gmra.mxu3 %vm1355_vm15, %v7882_v44  ;;  %v6261_v41 = vunpack.i.h.bf16 %v7784_v18  ;;  %v6320_v18 = vunpack.i.l.bf16 %v7808_v25 }
 0x25f   : > { %1476 = vmatpush.msra.mxu0 %v7906_v26  ;;  %1857 = vmatpush.msrb.mxu3 %v1808_v21 }
 0x260   : > { %1535 = vmatpush.msrb.mxu1 %v1502_v33  ;;  %v1707_v17 = vsel %vm800_vm4, %v6260_v39, %v6261_v41  ;;  %v6311_v39 = vunpack.i.h.bf16 %v7874_v45  ;;  %v1908_v25 = vsel %vm982_vm6, %v6316_v15, %v6320_v18 }
 0x261   : > { %1477 = vmatpush.msra.mxu0 %v7919_v5  ;;  %1858 = vmatpush.msrb.mxu3 %v1806_v49 }
 0x262   : > { %v7923_v34 = vpop.permute.xlu1 %6338  ;;  %v1907_v23 = vsel %vm982_vm6, %v6311_v39, %v6315_v58 }
 0x263   : > { %1634 = vmatpush.msrb.mxu0 %v1607_v60  ;;  %v6324_v13 = vpop.permute.xlu0 %6323  ;;  %v6340_v14 = vunpack.i.l.bf16 %v7923_v34  ;;  %5883 = vmatmul.msk.f32.vlgmr.msrb.gmra.mxu1 %vm1355_vm15, %v7830_v42  ;;  %v6300_v42 = vunpack.i.l.bf16 %v7837_v48  ;;  %v7965_v33 = vpop.permute.xlu2 %6358 }
 0x264   : > { %5881 = vmatmul.msk.f32.vlgmr.msra.gmra.mxu0 %vm1355_vm15, %v7769_v63  ;;  %v1604_v63 = vsel %vm709_vm3, %v6236_v7, %v6240_v19  ;;  %v6326_v48 = vunpack.i.h.bf16 %v6324_v13  ;;  %v1805_v7 = vsel %vm891_vm5, %v6265_v2, %v6266_v36  ;;  %v6310_v36 = vunpack.i.l.bf16 %v7874_v45  ;;  %v5902_v2 = vld [vmem:[%s10167_s4 + $0x38] sm:$0xff] }
 0x265   : > { %1635 = vmatpush.msrb.mxu0 %v1605_v12  ;;  %1674 = vmatpush.msrb.mxu2 %v6340_v14  ;;  %v1608_v20 = vsel %vm709_vm3, %v6291_v37, %v6340_v14  ;;  %v1809_v37 = vsel %vm891_vm5, %v6300_v42, %v6301_v32  ;;  %v6325_v32 = vunpack.i.l.bf16 %v6324_v13  ;;  %v6361_v43 = vunpack.i.h.bf16 %v7965_v33 }
 0x266   : > { %1654 = vmatpush.msra.mxu1 %v1608_v20  ;;  %5896 = vmatmul.msk.f32.vlgmr.msrb.gmra.mxu3 %vm1355_vm15, %v7933_v16  ;;  %v6360_v45 = vunpack.i.l.bf16 %v7965_v33  ;;  %v1906_v27 = vsel %vm982_vm6, %v6310_v36, %v6311_v39  ;;  %v6336_v12 = vunpack.i.h.bf16 %v7842_v51 }
 0x267   : > { %1636 = vmatpush.msrb.mxu0 %v1603_v6  ;;  %1675 = vmatpush.msrb.mxu2 %v6246_v10 }
 0x268   : > { %1655 = vmatpush.msra.mxu1 %v1606_v11  ;;  %v2011_v20 = vsel %vm1073_vm7, %v6360_v45, %v6361_v43 }
 0x269   : > { %1676 = vmatpush.msrb.mxu2 %v6240_v19 }
 0x26a   : > { %v7950_v31 = vpop.permute.xlu1 %6353  ;;  %1656 = vmatpush.msra.mxu1 %v1604_v63  ;;  %5889 = vmatmul.msk.f32.vlgmr.msrb.gmra.mxu2 %vm1355_vm15, %v5886_v0 }
 0x26b   : > { %v7956_v38 = vpop.permute.xlu0 %6343  ;;  %1836 = vmatpush.msra.mxu2 %v1809_v37  ;;  %5888 = vmatmul.msk.f32.vlgmr.msra.gmra.mxu1 %vm1355_vm15, %v5886_v0  ;;  %v7998_v13 = vpop.permute.xlu2 %6368  ;;  %v6356_v19 = vunpack.i.h.bf16 %v7950_v31  ;;  %v6355_v6 = vunpack.i.l.bf16 %v7950_v31 }
 0x26c   : > { %v6345_v21 = vunpack.i.l.bf16 %v7956_v38  ;;  %5887 = vmatmul.msk.f32.vlgmr.msrb.gmra.mxu0 %vm1355_vm15, %v5886_v0 }
 0x26d   : > { %1837 = vmatpush.msra.mxu2 %v1807_v46  ;;  %v2010_v62 = vsel %vm1073_vm7, %v6355_v6, %v6356_v19  ;;  %v6371_v46 = vunpack.i.h.bf16 %v7998_v13 }
 0x26e   : > { %1775 = vmatpush.msrb.mxu1 %v6345_v21  ;;  %v1709_v49 = vsel %vm800_vm4, %v6296_v35, %v6345_v21  ;;  %v1910_v35 = vsel %vm982_vm6, %v6325_v32, %v6326_v48 }
 0x26f   : > { %1755 = vmatpush.msra.mxu0 %v1709_v49  ;;  %1838 = vmatpush.msra.mxu2 %v1805_v7  ;;  %v6370_v7 = vunpack.i.l.bf16 %v7998_v13 }
 0x270   : > { %1776 = vmatpush.msrb.mxu1 %v6261_v41 }
 0x271   : > { %1756 = vmatpush.msra.mxu0 %v1707_v17 }
 0x272   : > { %1777 = vmatpush.msrb.mxu1 %v6255_v47  ;;  %v1905_v22 = vpop.permute.xlu1 %1904  ;;  %5895 = vmatmul.msk.f32.vlgmr.msra.gmra.mxu2 %vm1355_vm15, %v7933_v16 }
 0x273   : > { %v6349_v60 = vpop.permute.xlu0 %6348  ;;  %1757 = vmatpush.msra.mxu0 %v1705_v24  ;;  %v1911_v10 = vsel %vm982_vm6, %v6326_v48, %v1905_v22  ;;  %5893 = vmatmul.msk.f32.vlgmr.msrb.gmra.mxu1 %vm1355_vm15, %v7882_v44  ;;  %v2107_v31 = vpop.permute.xlu2 %2106  ;;  %v5906_v24 = vld [vmem:[%s10167_s4 + $0x40] sm:$0xff] }
 0x274   : > { %1937 = vmatpush.msra.mxu1 %v1910_v35  ;;  %5892 = vmatmul.msk.f32.vlgmr.msra.gmra.mxu0 %vm1355_vm15, %v7882_v44  ;;  %v5898_v44 = vld [vmem:[%s10167_s4 + $0x30] sm:$0xff]  ;;  %v6351_v14 = vunpack.i.h.bf16 %v6349_v60  ;;  %v6350_v1 = vunpack.i.l.bf16 %v6349_v60  ;;  %v1439_v60 = vpop.f32.mrf.mxu2 }
 0x275   : > { %1876 = vmatpush.msrb.mxu0 %v7872_v4  ;;  %1977 = vmatpush.msra.mxu3 %v1905_v22  ;;  %v1909_v4 = vsel %vm982_vm6, %v6320_v18, %v6321_v59 }
 0x276   : > { %1938 = vmatpush.msra.mxu1 %v1908_v25  ;;  %1957 = vmatpush.msrb.mxu2 %v1911_v10  ;;  %v2008_v63 = vsel %vm1073_vm7, %v6336_v12, %v6350_v1 }
 0x277   : > { %1877 = vmatpush.msrb.mxu0 %v6276_v56  ;;  %1978 = vmatpush.msra.mxu3 %v6321_v59  ;;  %v6335_v56 = vunpack.i.l.bf16 %v7842_v51 }
 0x278   : > { %1939 = vmatpush.msra.mxu1 %v1906_v27  ;;  %1958 = vmatpush.msrb.mxu2 %v1909_v4 }
 0x279   : > { %1878 = vmatpush.msrb.mxu0 %v6270_v9  ;;  %1979 = vmatpush.msra.mxu3 %v6315_v58  ;;  %v2009_v9 = vsel %vm1073_vm7, %v6351_v14, %v6355_v6  ;;  %v2007_v0 = vsel %vm1073_vm7, %v6335_v56, %v6336_v12 }
 0x27a   : > { %1959 = vmatpush.msrb.mxu2 %v1907_v23  ;;  %5901 = vmatmul.msk.f32.vlgmr.msra.gmra.mxu3 %vm1355_vm15, %v5898_v44  ;;  %v6364_v42 = vpop.permute.xlu1 %6363 }
 0x27b   : > { %2038 = vmatpush.msra.mxu0 %v2011_v20  ;;  %v2006_v11 = vpop.permute.xlu0 %2005  ;;  %5900 = vmatmul.msk.f32.vlgmr.msrb.gmra.mxu2 %vm1355_vm15, %v5898_v44  ;;  %v6365_v47 = vunpack.i.l.bf16 %v6364_v42  ;;  %v6366_v17 = vunpack.i.h.bf16 %v6364_v42 }
 0x27c   : > { %5899 = vmatmul.msk.f32.vlgmr.msra.gmra.mxu1 %vm1355_vm15, %v5898_v44  ;;  %2078 = vmatpush.msra.mxu2 %v2006_v11  ;;  %v2012_v51 = vsel %vm1073_vm7, %v6361_v43, %v2006_v11 }
 0x27d   : > { %2039 = vmatpush.msra.mxu0 %v2009_v9  ;;  %2058 = vmatpush.msrb.mxu1 %v2012_v51  ;;  %v2108_v22 = vsel %vm1164_vm8, %v6365_v47, %v6366_v17  ;;  %v2109_v35 = vsel %vm1164_vm8, %v6366_v17, %v6370_v7 }
 0x27e   : > { %5897 = vmatmul.msk.f32.vlgmr.msrb.gmra.mxu0 %vm1355_vm15, %v7933_v16  ;;  %2079 = vmatpush.msra.mxu2 %v6356_v19 }
 0x27f   : > { %2040 = vmatpush.msra.mxu0 %v2007_v0  ;;  %2059 = vmatpush.msrb.mxu1 %v2010_v62 }
 0x280   : > { %2080 = vmatpush.msra.mxu2 %v6350_v1 }
 0x281   : > { %2060 = vmatpush.msrb.mxu1 %v2008_v63 }
 0x282   : > { %v6379_v37 = vpop.permute.xlu1 %6378 }
 0x283   : > { %2179 = vmatpush.msra.mxu1 %v2107_v31  ;;  %v6374_v41 = vpop.permute.xlu0 %6373  ;;  %v6381_v16 = vunpack.i.h.bf16 %v6379_v37  ;;  %v6380_v21 = vunpack.i.l.bf16 %v6379_v37  ;;  %5905 = vmatmul.msk.f32.vlgmr.msra.gmra.mxu2 %vm1355_vm15, %v5902_v2 }
 0x284   : > { %v6376_v33 = vunpack.i.h.bf16 %v6374_v41  ;;  %v6375_v48 = vunpack.i.l.bf16 %v6374_v41  ;;  %5904 = vmatmul.msk.f32.vlgmr.msrb.gmra.mxu1 %vm1355_vm15, %v5902_v2 }
 0x285   : > { %v2112_v32 = vsel %vm1164_vm8, %v6380_v21, %v6381_v16  ;;  %v2113_v49 = vsel %vm1164_vm8, %v6381_v16, %v2107_v31 }
 0x286   : > { %5903 = vmatmul.msk.f32.vlgmr.msra.gmra.mxu0 %vm1355_vm15, %v5902_v2  ;;  %2180 = vmatpush.msra.mxu1 %v6376_v33  ;;  %v2110_v15 = vsel %vm1164_vm8, %v6371_v46, %v6375_v48  ;;  %v2111_v59 = vsel %vm1164_vm8, %v6375_v48, %v6376_v33 }
 0x287   : > { %2139 = vmatpush.msrb.mxu3 %v2112_v32  ;;  %2159 = vmatpush.msrb.mxu0 %v2113_v49 }
 0x288   : > { %2181 = vmatpush.msra.mxu1 %v6370_v7 }
 0x289   : > { %2140 = vmatpush.msrb.mxu3 %v2110_v15  ;;  %2160 = vmatpush.msrb.mxu0 %v2111_v59 }
 0x28b   : > { %2141 = vmatpush.msrb.mxu3 %v2108_v22  ;;  %2161 = vmatpush.msrb.mxu0 %v2109_v35 }
 0x28c   : > { %5907 = vmatmul.msk.f32.vlgmr.msrb.gmra.mxu3 %vm1355_vm15, %v5906_v24  ;;  %5909 = vmatmul.msk.f32.vlgmr.msra.gmra.mxu1 %vm1355_vm15, %v5906_v24 }
 0x28e   : > { %5908 = vmatmul.msk.f32.vlgmr.msrb.gmra.mxu0 %vm1355_vm15, %v5906_v24  ;;  %v2193_v24 = vpop.permute.xlu0 %2192 }
 0x2bf   : > { %v1376_v18 = vpop.f32.mrf.mxu3 }
 0x2c0   : > { %v1440_v51 = vadd.f32 %v1439_v60, %v1376_v18 }
 0x2c7   : > { %v1459_v10 = vpop.f32.mrf.mxu3 }
 0x2d6   : > { %v1577_v45 = vpop.f32.mrf.mxu3 }
 0x2d7   : > { %v1557_v43 = vpop.f32.mrf.mxu2 }
 0x2d8   : > { %v1416_v39 = vpop.f32.mrf.mxu1 }
 0x2d9   : > { %v1396_v36 = vpop.f32.mrf.mxu0 }
 0x2da   : > { %v1460_v19 = vadd.f32 %v1459_v10, %v1396_v36 }
 0x2dc   : > { %v1581_v9 = vadd.f32 %v1557_v43, %v1460_v19 }
 0x2e0   : > { %v1537_v58 = vpop.f32.mrf.mxu1 }
 0x2e1   : > { %v1479_v25 = vpop.f32.mrf.mxu0  ;;  %v1739_v44 = vpop.f32.mrf.mxu3  ;;  %v1580_v2 = vadd.f32 %v1537_v58, %v1440_v51 }
 0x2e2   : > { %v1480_v23 = vadd.f32 %v1479_v25, %v1416_v39 }
 0x2e4   : > { %v1582_v20 = vadd.f32 %v1577_v45, %v1480_v23 }
 0x2e8   : > { %v1658_v13 = vpop.f32.mrf.mxu1 }
 0x2e9   : > { %v1638_v27 = vpop.f32.mrf.mxu0  ;;  %v1860_v6 = vpop.f32.mrf.mxu3  ;;  %v1682_v0 = vadd.f32 %v1658_v13, %v1581_v9 }
 0x2ea   : > { %v1681_v16 = vadd.f32 %v1638_v27, %v1580_v2 }
 0x2ec   : > { %v1782_v48 = vadd.f32 %v1739_v44, %v1681_v16 }
 0x2ed   : > { %v1678_v4 = vpop.f32.mrf.mxu2 }
 0x2ee   : > { %v1683_v11 = vadd.f32 %v1678_v4, %v1582_v20 }
 0x2f0   : > { %v1779_v14 = vpop.f32.mrf.mxu1 }
 0x2f1   : > { %v1759_v12 = vpop.f32.mrf.mxu0  ;;  %v1784_v63 = vadd.f32 %v1779_v14, %v1683_v11 }
 0x2f2   : > { %v1783_v31 = vadd.f32 %v1759_v12, %v1682_v0 }
 0x2f4   : > { %v1884_v47 = vadd.f32 %v1860_v6, %v1783_v31  ;;  %v8059_v31 = vld [vmem:[#allocation2 + $0x8] sm:$0xff] }
 0x2f5   : > { %v1840_v56 = vpop.f32.mrf.mxu2 }
 0x2f6   : > { %v1883_v17 = vadd.f32 %v1840_v56, %v1782_v48 }
 0x2f9   : > { %v1941_v42 = vpop.f32.mrf.mxu1 }
 0x2fa   : > { %v1984_v18 = vadd.f32 %v1941_v42, %v1883_v17 }
 0x2fb   : > { %v1880_v1 = vpop.f32.mrf.mxu0 }
 0x2fc   : > { %v1885_v37 = vadd.f32 %v1880_v1, %v1784_v63 }
 0x2fd   : > { %v1981_v21 = vpop.f32.mrf.mxu3 }
 0x2fe   : > { %v1961_v62 = vpop.f32.mrf.mxu2  ;;  %v1986_v33 = vadd.f32 %v1981_v21, %v1885_v37  ;;  %v6422_v37 = vpack.i.bf16 %v7919_v5, %v8059_v31  ;;  %v8086_v21 = vpop.permute.xlu2 %6388 }
 0x2ff   : > { %v1985_v32 = vadd.f32 %v1961_v62, %v1884_v47  ;;  %v8095_v47 = vpop.permute.xlu0 %6393 }
 0x301   : > { %v2062_v41 = vpop.f32.mrf.mxu1 }
 0x302   : > { %v2086_v59 = vadd.f32 %v2062_v41, %v1985_v32  ;;  %v7286_v41 = vld [vmem:[#allocation2] sm:$0xff] }
 0x303   : > { %v2042_v46 = vpop.f32.mrf.mxu0  ;;  %v6462_v16 = vpack.i.bf16 %v8059_v31, %v7286_v41 }
 0x304   : > { %v2085_v60 = vadd.f32 %v2042_v46, %v1984_v18  ;;  %v8089_v46 = vpop.permute.xlu1 %6383  ;;  %v3277_v18 = vld [vmem:[#allocation2 + $0x28] sm:$0xff] }
 0x306   : > { %v2082_v49 = vpop.f32.mrf.mxu2 }
 0x307   : > { %v2087_v7 = vadd.f32 %v2082_v49, %v1986_v33  ;;  %v8097_v33 = vpop.permute.xlu2 %6403  ;;  %v8104_v49 = vpop.permute.xlu0 %6408 }
 0x309   : > { %v2183_v15 = vpop.f32.mrf.mxu1 }
 0x30a   : > { %v2188_v22 = vadd.f32 %v2183_v15, %v2087_v7 }
 0x30b   : > { %v2163_v35 = vpop.f32.mrf.mxu0 }
 0x30c   : > { %v2187_v39 = vadd.f32 %v2163_v35, %v2086_v59  ;;  %v2197_v36 = vadd.f32 %v2193_v24, %v2188_v22  ;;  %v8099_v48 = vpop.permute.xlu1 %6398  ;;  %v3221_v22 = vld [vmem:[%s10170_s7] sm:$0xff] }
 0x30e   : > { %v2196_v10 = vadd.f32 %v2193_v24, %v2187_v39  ;;  %v2200_v58 = vmin.f32 %v2197_v36, 0.0  ;;  %vm2215_vm0 = vcmp.gt.f32.partialorder %v2197_v36, 0.0 }
 0x30f   : > { %v2143_v25 = vpop.f32.mrf.mxu3  ;;  %v8102_v32 = vpop.permute.xlu2 %6428 }
 0x310   : > { %v2199_v43 = vmin.f32 %v2196_v10, 0.0  ;;  %v2205_v45 = vmul.f32 1.442695, %v2200_v58  ;;  %v2186_v13 = vadd.f32 %v2143_v25, %v2085_v60  ;;  %vm2214_vm9 = vcmp.gt.f32.partialorder %v2196_v10, 0.0  ;;  %v8139_v25 = vld [vmem:[#allocation2 + $0x8] sm:$0xff] }
 0x311   : > { %v8127_v60 = vpack.i.bf16 %v7652_v50, %v3277_v18 }
 0x312   : > { %v2203_v27 = vmul.f32 1.442695, %v2199_v43  ;;  %7265 = vpow2.f32 %v2205_v45  ;;  %v2195_v4 = vadd.f32 %v2193_v24, %v2186_v13  ;;  %v3274_v43 = vld [vmem:[#allocation2 + $0x10] sm:$0xff]  ;;  %v8152_v13 = vld [vmem:[#allocation2 + $0x38] sm:$0xff] }
 0x313   : > { %v6658_v45 = vpack.i.bf16 %v3274_v43, %v8139_v25 }
 0x314   : > { %7267 = vpow2.f32 %v2203_v27  ;;  %v2198_v44 = vmin.f32 %v2195_v4, 0.0  ;;  %vm2213_vm10 = vcmp.gt.f32.partialorder %v2195_v4, 0.0  ;;  %v8108_v7 = vpop.permute.xlu1 %6413 }
 0x316   : > { %v2201_v14 = vmul.f32 1.442695, %v2198_v44 }
 0x318   : > { %v7266_v12 = vpop.eup %7265  ;;  %7269 = vpow2.f32 %v2201_v14 }
 0x319   : > { %v5912_v23 = vadd.f32 -1.0, %v7266_v12 }
 0x31a   : > { %v7268_v56 = vpop.eup %7267 }
 0x31b   : > { %v2212_v19 = vmul.f32 0.2, %v5912_v23  ;;  %v5911_v6 = vadd.f32 -1.0, %v7268_v56 }
 0x31d   : > { %v2218_v20 = vsel %vm2215_vm0, %v2197_v36, %v2212_v19  ;;  %v2211_v42 = vmul.f32 0.2, %v5911_v6 }
 0x31e   : > { %v7270_v11 = vpop.eup %7269  ;;  %v2221_v1 = vmul.f32 %v2218_v20, %v7623_v40 }
 0x31f   : > { %v2217_v9 = vsel %vm2214_vm9, %v2196_v10, %v2211_v42  ;;  %v5910_v51 = vadd.f32 -1.0, %v7270_v11 }
 0x320   : > { %2229 = vrot.lane.b32.xlu0 %v2221_v1, %s7332_s18  ;;  %v2220_v0 = vmul.f32 %v2217_v9, %v7617_v30 }
 0x321   : > { %v2210_v62 = vmul.f32 0.2, %v5910_v51 }
 0x322   : > { %2227 = vrot.lane.b32.xlu2 %v2220_v0, %s7332_s18 }
 0x323   : > { %v2216_v63 = vsel %vm2213_vm10, %v2195_v4, %v2210_v62  ;;  %v8159_v4 = vpack.i.bf16 %v3277_v18, %v7722_v55  ;;  %v6416_v18 = vunpack.i.h.bf16 %v8108_v7  ;;  %vm3359_vm10 = vcmask 326656  }
 0x324   : > { %v2219_v2 = vmul.f32 %v2216_v63, %v7615_v29  ;;  %v8227_v63 = vld [vmem:[%s10169_s6] sm:$0xff] }
 0x326   : > { %2225 = vrot.lane.b32.xlu1 %v2219_v2, %s7332_s18 }
 0x328   : > { %6433 = vrot.lane.b32.xlu0 %v7734_v57, %s7325_s29 }
 0x32a   : > { %6448 = vrot.lane.b32.xlu2 %v7730_v3, %s7326_s30 }
 0x32e   : > { %6418 = vrot.lane.b32.xlu1 %v7750_v61, %s7324_s28 }
 0x330   : > { %6453 = vrot.lane.b32.xlu0 %v7734_v57, %s7326_s30  ;;  %v6472_v57 = vpack.i.bf16 %v7906_v26, %v7722_v55 }
 0x336   : > { %6423 = vrot.lane.b32.xlu1 %v6422_v37, %s7325_s29 }
 0x338   : > { %6473 = vrot.lane.b32.xlu0 %v6472_v57, %s7327_s13 }
 0x33e   : > { %6438 = vrot.lane.b32.xlu1 %v7750_v61, %s7325_s29 }
 0x340   : > { %6493 = vrot.lane.b32.xlu0 %v6472_v57, %s7328_s14 }
 0x346   : > { %6443 = vrot.lane.b32.xlu1 %v6422_v37, %s7326_s30  ;;  %v8236_v37 = vpack.i.bf16 %v7726_v8, %v3274_v43 }
 0x34e   : > { %6458 = vrot.lane.b32.xlu1 %v7750_v61, %s7326_s30  ;;  %v8082_v61 = vpack.i.bf16 %v7726_v8, %v7919_v5 }
 0x350   : > { %6468 = vrot.lane.b32.xlu2 %v8082_v61, %s7327_s13 }
 0x356   : > { %6463 = vrot.lane.b32.xlu1 %v6462_v16, %s7327_s13 }
 0x358   : > { %6488 = vrot.lane.b32.xlu2 %v8082_v61, %s7328_s14 }
 0x35e   : > { %6478 = vrot.lane.b32.xlu1 %v7658_v52, %s7327_s13 }
 0x366   : > { %6483 = vrot.lane.b32.xlu1 %v6462_v16, %s7328_s14 }
 0x36e   : > { %6498 = vrot.lane.b32.xlu1 %v7658_v52, %s7328_s14 }
 0x376   : > { %6503 = vrot.lane.b32.xlu1 %v6462_v16, %s7329_s15 }
 0x37c   : > { %v2228_v17 = vpop.permute.xlu2 %2227 }
 0x37e   : > { %6563 = vrot.lane.b32.xlu1 %v7658_v52, %s7329_s15 }
 0x384   : > { %v8188_v23 = vpop.permute.xlu2 %6448 }
 0x386   : > { %6573 = vrot.lane.b32.xlu1 %v6462_v16, %s7330_s16 }
 0x38e   : > { %6588 = vrot.lane.b32.xlu1 %v7658_v52, %s7330_s16  ;;  %v8119_v52 = vld [vmem:[#allocation2] sm:$0xff] }
 0x392   : > { %v2230_v15 = vpop.permute.xlu0 %2229 }
 0x393   : > { %v2232_v59 = vsel %vm1290_vm12, %v2228_v17, %v2230_v15  ;;  %v6678_v15 = vpack.i.bf16 %v8139_v25, %v8119_v52  ;;  %v6306_v25 = vunpack.i.h.bf16 %v7844_v54  ;;  %v8272_v54 = vld [vmem:[%s10169_s6 + $0x8] sm:$0xff] }
 0x394   : > { %2238 = vst.msk [vmem:[#allocation2 + $0x58] sm:$0xff] %vm1299_vm14, %v2232_v59 }
 0x396   : > { %3224 = vperm.xlu1 %6617, %v3221_v22   ;;  %v6390_v22 = vunpack.i.l.bf16 %v8086_v21 }
 0x398   : > { %v2226_v24 = vpop.permute.xlu1 %2225 }
 0x399   : > { %v8116_v35 = vsel %vm1290_vm12, %v2226_v24, %v2228_v17  ;;  %2236 = vst.msk [vmem:[#allocation2 + $0x48] sm:$0xff] %vm1296_vm13, %v2226_v24  ;;  %v6415_v17 = vunpack.i.l.bf16 %v8108_v7  ;;  %v6396_v24 = vunpack.i.h.bf16 %v8095_v47 }
 0x39a   : > { %2237 = vst [vmem:[#allocation2 + $0x50] sm:$0xff] %v8116_v35  ;;  %v8197_v6 = vpop.permute.xlu0 %6433 }
 0x39b   : > { %v8122_v39 = vld [vmem:[#allocation2 + $0x58] sm:$0xff] }
 0x39c   : > { %v6522_v36 = vpack.i.bf16 %v8119_v52, %v8122_v39  ;;  %v6597_v55 = vpack.i.bf16 %v8122_v39, %v8116_v35  ;;  %v2294_v52 = vsel %vm466_vm1, %v6396_v24, %v6415_v17 }
 0x39e   : > { %6523 = vrot.lane.b32.xlu0 %v6522_v36, %s7323_s27  ;;  %6629 = vrot.lane.b32.xlu1 %v8127_v60, %s7323_s27 }
 0x3a0   : > { %v2249_v10 = vld [vmem:[#allocation2 + $0x48] sm:$0xff]  ;;  %v8168_v44 = vpop.permute.xlu1 %6418 }
 0x3a1   : > { %2389 = vmatpush.msrb.mxu1 %v2249_v10  ;;  %v6507_v58 = vpack.i.bf16 %v2249_v10, %v7669_v53  ;;  %v8148_v53 = vld [vmem:[#allocation2 + $0x40] sm:$0xff] }
 0x3a2   : > { %v6673_v27 = vpack.i.bf16 %v8148_v53, %v8152_v13  ;;  %v8207_v11 = vpop.permute.xlu0 %6453 }
 0x3a3   : > { %6508 = vrot.lane.b32.xlu2 %v6507_v58, %s7327_s13  ;;  %2390 = vmatpush.msrb.mxu1 %v7652_v50  ;;  %v8146_v50 = vpack.i.bf16 %v8116_v35, %v2249_v10 }
 0x3a5   : > { %2391 = vmatpush.msrb.mxu1 %v7726_v8 }
 0x3a6   : > { %6533 = vrot.lane.b32.xlu0 %v6522_v36, %s7324_s28  ;;  %6644 = vrot.lane.b32.xlu1 %v7730_v3, %s7324_s28 }
 0x3a7   : > { %2392 = vmatpush.msrb.mxu1 %v7286_v41 }
 0x3a8   : > { %v8179_v14 = vpop.permute.xlu1 %6423  ;;  %5917 = vmatmul.msk.f32.vlgmr.msrb.gmra.mxu1 %vm2310_vm11, %v8227_v63 }
 0x3aa   : > { %v8195_v19 = vpop.permute.xlu2 %6468  ;;  %v8213_v9 = vpop.permute.xlu0 %6473 }
 0x3ab   : > { %6513 = vrot.lane.b32.xlu2 %v6507_v58, %s7328_s14 }
 0x3ae   : > { %6543 = vrot.lane.b32.xlu0 %v6522_v36, %s7325_s29  ;;  %6659 = vrot.lane.b32.xlu1 %v6658_v45, %s7325_s29  ;;  %v6385_v36 = vunpack.i.l.bf16 %v8089_v46 }
 0x3b0   : > { %v8184_v12 = vpop.permute.xlu1 %6438 }
 0x3b2   : > { %v8205_v42 = vpop.permute.xlu2 %6488  ;;  %v8231_v2 = vpop.permute.xlu0 %6493 }
 0x3b3   : > { %6518 = vrot.lane.b32.xlu2 %v8146_v50, %s7323_s27 }
 0x3b6   : > { %6558 = vrot.lane.b32.xlu0 %v6472_v57, %s7329_s15  ;;  %6674 = vrot.lane.b32.xlu1 %v6673_v27, %s7325_s29 }
 0x3b8   : > { %v8190_v56 = vpop.permute.xlu1 %6443 }
 0x3bb   : > { %6528 = vrot.lane.b32.xlu2 %v8146_v50, %s7324_s28 }
 0x3be   : > { %6583 = vrot.lane.b32.xlu0 %v6472_v57, %s7330_s16  ;;  %6689 = vrot.lane.b32.xlu1 %v8159_v4, %s7326_s30 }
 0x3c0   : > { %v8200_v20 = vpop.permute.xlu1 %6458 }
 0x3c3   : > { %6538 = vrot.lane.b32.xlu2 %v8146_v50, %s7325_s29 }
 0x3c6   : > { %2685 = vrot.lane.b32.xlu0 %v8122_v39, %s7326_s30  ;;  %6704 = vrot.lane.b32.xlu1 %v8146_v50, %s7324_s28 }
 0x3c8   : > { %v8210_v1 = vpop.permute.xlu1 %6463 }
 0x3cb   : > { %6548 = vrot.lane.b32.xlu2 %v8146_v50, %s7326_s30 }
 0x3ce   : > { %6598 = vrot.lane.b32.xlu0 %v6597_v55, %s7327_s13 }
 0x3d0   : > { %v8218_v0 = vpop.permute.xlu1 %6478 }
 0x3d3   : > { %6553 = vrot.lane.b32.xlu2 %v8082_v61, %s7329_s15 }
 0x3d6   : > { %6603 = vrot.lane.b32.xlu0 %v6597_v55, %s7328_s14 }
 0x3d8   : > { %v8238_v41 = vpop.permute.xlu1 %6483 }
 0x3db   : > { %6568 = vrot.lane.b32.xlu2 %v6507_v58, %s7329_s15 }
 0x3de   : > { %6608 = vrot.lane.b32.xlu0 %v6597_v55, %s7329_s15 }
 0x3e0   : > { %v8261_v43 = vpop.permute.xlu1 %6498 }
 0x3e3   : > { %6578 = vrot.lane.b32.xlu2 %v8082_v61, %s7330_s16 }
 0x3e6   : > { %6613 = vrot.lane.b32.xlu0 %v6597_v55, %s7330_s16 }
 0x3eb   : > { %6593 = vrot.lane.b32.xlu2 %v6507_v58, %s7330_s16  ;;  %v6395_v58 = vunpack.i.l.bf16 %v8095_v47  ;;  %v2295_v47 = vsel %vm466_vm1, %v6415_v17, %v6416_v18 }
 0x3ee   : > { %6624 = vrot.lane.b32.xlu0 %v7730_v3, %s7323_s27 }
 0x3f3   : > { %6619 = vrot.lane.b32.xlu2 %v6658_v45, %s7323_s27 }
 0x3f6   : > { %6639 = vrot.lane.b32.xlu0 %v6658_v45, %s7324_s28 }
 0x3fb   : > { %6634 = vrot.lane.b32.xlu2 %v6673_v27, %s7323_s27 }
 0x3fd   : > { %v8215_v51 = vpop.permute.xlu2 %6508 }
 0x3fe   : > { %6654 = vrot.lane.b32.xlu0 %v6673_v27, %s7324_s28 }
 0x403   : > { %6649 = vrot.lane.b32.xlu2 %v8127_v60, %s7324_s28 }
 0x405   : > { %v8222_v62 = vpop.permute.xlu2 %6513 }
 0x406   : > { %6669 = vrot.lane.b32.xlu0 %v8127_v60, %s7325_s29  ;;  %v6391_v60 = vunpack.i.h.bf16 %v8086_v21  ;;  %v6386_v21 = vunpack.i.h.bf16 %v8089_v46 }
 0x408   : > { %v2292_v45 = vsel %vm466_vm1, %v6390_v22, %v6391_v60  ;;  %v2293_v46 = vsel %vm466_vm1, %v6391_v60, %v6395_v58  ;;  %v8282_v22 = vld [vmem:[#allocation2 + $0x30] sm:$0xff]  ;;  %v7288_v60 = vld [vmem:[#allocation2 + $0x38] sm:$0xff] }
 0x409   : > { %v8286_v24 = vpack.i.bf16 %v8152_v13, %v8282_v22  ;;  %v6400_v13 = vunpack.i.l.bf16 %v8099_v48 }
 0x40b   : > { %6664 = vrot.lane.b32.xlu2 %v7730_v3, %s7325_s29 }
 0x40d   : > { %v6519_v16 = vpop.permute.xlu2 %6518 }
 0x40e   : > { %v6521_v57 = vunpack.i.h.bf16 %v6519_v16  ;;  %v6520_v61 = vunpack.i.l.bf16 %v6519_v16  ;;  %6684 = vrot.lane.b32.xlu0 %v8236_v37, %s7326_s30  ;;  %v2290_v16 = vsel %vm466_vm1, %v6306_v25, %v6385_v36 }
 0x410   : > { %v8247_v59 = vpop.permute.xlu0 %6523  ;;  %v2296_v8 = vsel %vm466_vm1, %v6520_v61, %v6521_v57  ;;  %v6420_v61 = vunpack.i.l.bf16 %v8168_v44 }
 0x411   : > { %v6525_v3 = vunpack.i.l.bf16 %v8247_v59  ;;  %2326 = vmatpush.msrb.mxu2 %v2296_v8  ;;  %v2291_v8 = vsel %vm466_vm1, %v6385_v36, %v6386_v21 }
 0x413   : > { %2366 = vmatpush.msra.mxu0 %v6525_v3  ;;  %6679 = vrot.lane.b32.xlu2 %v6678_v15, %s7326_s30  ;;  %v2297_v10 = vsel %vm466_vm1, %v6521_v57, %v6525_v3  ;;  %v6405_v3 = vunpack.i.l.bf16 %v8097_v33 }
 0x414   : > { %2327 = vmatpush.msrb.mxu2 %v2294_v52  ;;  %2346 = vmatpush.msra.mxu3 %v2297_v10  ;;  %v6406_v52 = vunpack.i.h.bf16 %v8097_v33  ;;  %v6410_v10 = vunpack.i.l.bf16 %v8104_v49  ;;  %v8306_v33 = vpop.permute.xlu1 %6503 }
 0x415   : > { %2367 = vmatpush.msra.mxu0 %v6416_v18  ;;  %v6529_v7 = vpop.permute.xlu2 %6528  ;;  %v6411_v18 = vunpack.i.h.bf16 %v8104_v49  ;;  %v7290_v49 = vld [vmem:[#allocation2 + $0x40] sm:$0xff] }
 0x416   : > { %v6531_v27 = vunpack.i.h.bf16 %v6529_v7  ;;  %v6530_v55 = vunpack.i.l.bf16 %v6529_v7  ;;  %2328 = vmatpush.msrb.mxu2 %v2292_v45  ;;  %6699 = vrot.lane.b32.xlu0 %v8146_v50, %s7323_s27 }
 0x417   : > { %2347 = vmatpush.msra.mxu3 %v2295_v47  ;;  %2368 = vmatpush.msra.mxu0 %v6395_v58  ;;  %v8300_v58 = vld [vmem:[#allocation2 + $0x20] sm:$0xff] }
 0x418   : > { %2329 = vmatpush.msrb.mxu2 %v2290_v16  ;;  %v8274_v57 = vpop.permute.xlu0 %6533  ;;  %v2469_v17 = vsel %vm618_vm2, %v6530_v55, %v6531_v27  ;;  %v2466_v16 = vsel %vm618_vm2, %v6406_v52, %v6410_v10 }
 0x419   : > { %v6535_v15 = vunpack.i.l.bf16 %v8274_v57  ;;  %2348 = vmatpush.msra.mxu3 %v2293_v46  ;;  %2369 = vmatpush.msra.mxu0 %v6386_v21  ;;  %v6331_v21 = vunpack.i.h.bf16 %v7814_v28  ;;  %v6440_v46 = vunpack.i.l.bf16 %v8184_v12 }
 0x41a   : > { %2409 = vmatpush.msra.mxu2 %v8116_v35  ;;  %v6421_v35 = vunpack.i.h.bf16 %v8168_v44  ;;  %v2467_v44 = vsel %vm618_vm2, %v6411_v18, %v6420_v61  ;;  %v6425_v18 = vunpack.i.l.bf16 %v8179_v14  ;;  %5916 = vmatmul.msk.f32.vlgmr.msra.gmra.mxu0 %vm2310_vm11, %v8272_v54 }
 0x41b   : > { %5914 = vmatmul.msk.f32.vlgmr.msrb.gmra.mxu2 %vm2310_vm11, %v8272_v54  ;;  %2349 = vmatpush.msra.mxu3 %v2291_v8  ;;  %v2470_v36 = vsel %vm618_vm2, %v6531_v27, %v6535_v15  ;;  %v6401_v27 = vunpack.i.h.bf16 %v8099_v48  ;;  %v2463_v48 = vsel %vm618_vm2, %v6331_v21, %v6400_v13  ;;  %v6441_v8 = vunpack.i.h.bf16 %v8184_v12 }
 0x41c   : > { %2410 = vmatpush.msra.mxu2 %v7288_v60  ;;  %2498 = vmatpush.msrb.mxu0 %v2469_v17  ;;  %v2468_v55 = vsel %vm618_vm2, %v6420_v61, %v6421_v35  ;;  %v6436_v17 = vunpack.i.h.bf16 %v8197_v6  ;;  %v6435_v12 = vunpack.i.l.bf16 %v8197_v6  ;;  %v6451_v21 = vunpack.i.h.bf16 %v8188_v23 }
 0x41d   : > { %6694 = vrot.lane.b32.xlu2 %v8286_v24, %s7326_s30  ;;  %2429 = vmatpush.msrb.mxu3 %v8122_v39  ;;  %v6539_v25 = vpop.permute.xlu2 %6538  ;;  %v2465_v39 = vsel %vm618_vm2, %v6405_v3, %v6406_v52  ;;  %v2464_v61 = vsel %vm618_vm2, %v6400_v13, %v6401_v27  ;;  %v6426_v52 = vunpack.i.h.bf16 %v8179_v14  ;;  %v2580_v6 = vsel %vm709_vm3, %v6440_v46, %v6441_v8 }
 0x41e   : > { %2411 = vmatpush.msra.mxu2 %v8300_v58  ;;  %2499 = vmatpush.msrb.mxu0 %v2467_v44  ;;  %v6541_v7 = vunpack.i.h.bf16 %v6539_v25  ;;  %v6540_v45 = vunpack.i.l.bf16 %v6539_v25  ;;  %v8345_v44 = vpop.permute.xlu1 %6563  ;;  %v6456_v25 = vunpack.i.h.bf16 %v8207_v11  ;;  %v6450_v14 = vunpack.i.l.bf16 %v8188_v23 }
 0x41f   : > { %2518 = vmatpush.msra.mxu1 %v2470_v36  ;;  %2430 = vmatpush.msrb.mxu3 %v7290_v49  ;;  %v2576_v49 = vsel %vm709_vm3, %v6425_v18, %v6426_v52 }
 0x420   : > { %2412 = vmatpush.msra.mxu2 %v8059_v31  ;;  %2500 = vmatpush.msrb.mxu0 %v2465_v39  ;;  %v8311_v47 = vpop.permute.xlu0 %6543  ;;  %v2581_v31 = vsel %vm709_vm3, %v6540_v45, %v6541_v7  ;;  %v5920_v45 = vld [vmem:[%s10169_s6 + $0x10] sm:$0xff] }
 0x421   : > { %2519 = vmatpush.msra.mxu1 %v2468_v55  ;;  %2431 = vmatpush.msrb.mxu3 %v7906_v26  ;;  %v6545_v28 = vunpack.i.l.bf16 %v8311_v47  ;;  %v6431_v26 = vunpack.i.h.bf16 %v8102_v32 }
 0x422   : > { %2538 = vmatpush.msrb.mxu2 %v6535_v15  ;;  %2501 = vmatpush.msrb.mxu0 %v2463_v48  ;;  %v6430_v15 = vunpack.i.l.bf16 %v8102_v32  ;;  %v2579_v32 = vsel %vm709_vm3, %v6436_v17, %v6440_v46  ;;  %v2689_v48 = vsel %vm800_vm4, %v6450_v14, %v6451_v21 }
 0x423   : > { %2520 = vmatpush.msra.mxu1 %v2466_v16  ;;  %2432 = vmatpush.msrb.mxu3 %v7919_v5  ;;  %v2582_v5 = vsel %vm709_vm3, %v6541_v7, %v6545_v28  ;;  %v2578_v7 = vsel %vm709_vm3, %v6431_v26, %v6435_v12 }
 0x424   : > { %2539 = vmatpush.msrb.mxu2 %v6421_v35  ;;  %5915 = vmatmul.msk.f32.vlgmr.msra.gmra.mxu3 %vm2310_vm11, %v8272_v54  ;;  %v2577_v36 = vsel %vm709_vm3, %v6430_v15, %v6431_v26  ;;  %v5928_v26 = vld [vmem:[%s10169_s6 + $0x20] sm:$0xff]  ;;  %v6455_v15 = vunpack.i.l.bf16 %v8207_v11 }
 0x425   : > { %2521 = vmatpush.msra.mxu1 %v2464_v61  ;;  %2610 = vmatpush.msra.mxu3 %v2581_v31  ;;  %v8330_v3 = vpop.permute.xlu2 %6548  ;;  %v6461_v31 = vunpack.i.h.bf16 %v8200_v20 }
 0x426   : > { %6709 = vrot.lane.b32.xlu2 %v8146_v50, %s7325_s29  ;;  %2540 = vmatpush.msrb.mxu2 %v6410_v10  ;;  %v6551_v35 = vunpack.i.h.bf16 %v8330_v3  ;;  %v6550_v60 = vunpack.i.l.bf16 %v8330_v3  ;;  %v6341_v50 = vunpack.i.h.bf16 %v7923_v34  ;;  %v6460_v10 = vunpack.i.l.bf16 %v8200_v20  ;;  %v8376_v46 = vpop.permute.xlu1 %6573 }
 0x427   : > { %2650 = vmatpush.msrb.mxu1 %v6545_v28  ;;  %2611 = vmatpush.msra.mxu3 %v2579_v32  ;;  %v6346_v28 = vunpack.i.h.bf16 %v7956_v38  ;;  %v6481_v32 = vunpack.i.h.bf16 %v8218_v0 }
 0x428   : > { %2630 = vmatpush.msra.mxu0 %v2582_v5  ;;  %2541 = vmatpush.msrb.mxu2 %v6401_v27  ;;  %v8341_v13 = vpop.permute.xlu0 %6558  ;;  %v2693_v54 = vsel %vm800_vm4, %v6550_v60, %v6551_v35  ;;  %v2575_v34 = vsel %vm709_vm3, %v6341_v50, %v6425_v18  ;;  %v6445_v27 = vunpack.i.l.bf16 %v8190_v56  ;;  %v2691_v39 = vsel %vm800_vm4, %v6456_v25, %v6460_v10 }
 0x429   : > { %2651 = vmatpush.msrb.mxu1 %v6441_v8  ;;  %2612 = vmatpush.msra.mxu3 %v2577_v36  ;;  %v6446_v8 = vunpack.i.h.bf16 %v8190_v56  ;;  %v2692_v20 = vsel %vm800_vm4, %v6460_v10, %v6461_v31  ;;  %v2690_v18 = vsel %vm800_vm4, %v6451_v21, %v6455_v15  ;;  %v6480_v56 = vunpack.i.l.bf16 %v8218_v0 }
 0x42a   : > { %2631 = vmatpush.msra.mxu0 %v2580_v6  ;;  %5918 = vmatmul.msk.f32.vlgmr.msra.gmra.mxu2 %vm2310_vm11, %v8227_v63  ;;  %v2687_v16 = vsel %vm800_vm4, %v6346_v28, %v6445_v27  ;;  %v6511_v60 = vunpack.i.h.bf16 %v8215_v51  ;;  %v6476_v10 = vunpack.i.h.bf16 %v8213_v9  ;;  %v6475_v6 = vunpack.i.l.bf16 %v8213_v9  ;;  %v5932_v28 = vld [vmem:[%s10169_s6 + $0x28] sm:$0xff] }
 0x42b   : > { %2652 = vmatpush.msrb.mxu1 %v6435_v12  ;;  %2613 = vmatpush.msra.mxu3 %v2575_v34  ;;  %v2688_v11 = vsel %vm800_vm4, %v6445_v27, %v6446_v8  ;;  %v6510_v12 = vunpack.i.l.bf16 %v8215_v51  ;;  %v6466_v34 = vunpack.i.h.bf16 %v8210_v1  ;;  %v6470_v25 = vunpack.i.l.bf16 %v8195_v19 }
 0x42c   : > { %2632 = vmatpush.msra.mxu0 %v2578_v7  ;;  %2722 = vmatpush.msra.mxu2 %v2693_v54  ;;  %v6465_v51 = vunpack.i.l.bf16 %v8210_v1  ;;  %v2803_v7 = vsel %vm891_vm5, %v6480_v56, %v6481_v32  ;;  %v6501_v27 = vunpack.i.h.bf16 %v8261_v43  ;;  %v6500_v1 = vunpack.i.l.bf16 %v8261_v43 }
 0x42d   : > { %2653 = vmatpush.msrb.mxu1 %v6426_v52  ;;  %v8362_v55 = vpop.permute.xlu2 %6553  ;;  %5919 = vmatmul.msk.f32.vlgmr.msrb.gmra.mxu3 %vm2310_vm11, %v8227_v63  ;;  %v5924_v63 = vld [vmem:[%s10169_s6 + $0x18] sm:$0xff]  ;;  %v6471_v52 = vunpack.i.h.bf16 %v8195_v19  ;;  %v2804_v9 = vsel %vm891_vm5, %v6481_v32, %v6510_v12  ;;  %v2802_v19 = vsel %vm891_vm5, %v6475_v6, %v6476_v10  ;;  %v6491_v43 = vunpack.i.h.bf16 %v8205_v42 }
 0x42e   : > { %2633 = vmatpush.msra.mxu0 %v2576_v49  ;;  %2723 = vmatpush.msra.mxu2 %v2691_v39  ;;  %v8393_v5 = vpop.permute.xlu1 %6588  ;;  %v2800_v39 = vsel %vm891_vm5, %v6466_v34, %v6470_v25  ;;  %v6490_v32 = vunpack.i.l.bf16 %v8205_v42 }
 0x42f   : > { %5921 = vmatmul.msk.f32.vlgmr.msrb.gmra.mxu0 %vm2310_vm11, %v5920_v45  ;;  %5922 = vmatmul.msk.f32.vlgmr.msra.gmra.mxu1 %vm2310_vm11, %v5920_v45  ;;  %v2801_v21 = vsel %vm891_vm5, %v6471_v52, %v6475_v6  ;;  %v5936_v52 = vld [vmem:[%s10169_s6 + $0x30] sm:$0xff] }
 0x430   : > { %2724 = vmatpush.msra.mxu2 %v2689_v48  ;;  %v8370_v23 = vpop.permute.xlu0 %6583  ;;  %v6516_v48 = vunpack.i.h.bf16 %v8222_v62 }
 0x432   : > { %2725 = vmatpush.msra.mxu2 %v2687_v16 }
 0x433   : > { %5923 = vmatmul.msk.f32.vlgmr.msrb.gmra.mxu2 %vm2310_vm11, %v5920_v45 }
 0x435   : > { %v8379_v38 = vpop.permute.xlu2 %6568  ;;  %5925 = vmatmul.msk.f32.vlgmr.msra.gmra.mxu3 %vm2310_vm11, %v5924_v63 }
 0x436   : > { %v8417_v45 = vpop.permute.xlu1 %3224 }
 0x437   : > { %5926 = vmatmul.msk.f32.vlgmr.msra.gmra.mxu0 %vm2310_vm11, %v5924_v63  ;;  %5927 = vmatmul.msk.f32.vlgmr.msrb.gmra.mxu1 %vm2310_vm11, %v5924_v63 }
 0x438   : > { %v2686_v61 = vpop.permute.xlu0 %2685 }
 0x439   : > { %2762 = vmatpush.msrb.mxu0 %v2686_v61  ;;  %v2694_v17 = vsel %vm800_vm4, %v6551_v35, %v2686_v61  ;;  %v6515_v61 = vunpack.i.l.bf16 %v8222_v62  ;;  %v6485_v62 = vunpack.i.l.bf16 %v8238_v41 }
 0x43a   : > { %2742 = vmatpush.msrb.mxu3 %v2694_v17 }
 0x43b   : > { %2763 = vmatpush.msrb.mxu0 %v6461_v31  ;;  %5929 = vmatmul.msk.f32.vlgmr.msra.gmra.mxu2 %vm2310_vm11, %v5928_v26  ;;  %v2799_v31 = vsel %vm891_vm5, %v6465_v51, %v6466_v34  ;;  %v2916_v56 = vsel %vm982_vm6, %v6501_v27, %v6515_v61  ;;  %v6561_v51 = vunpack.i.h.bf16 %v8341_v13 }
 0x43c   : > { %2743 = vmatpush.msrb.mxu3 %v2692_v20 }
 0x43d   : > { %v8395_v3 = vpop.permute.xlu2 %6578  ;;  %2764 = vmatpush.msrb.mxu0 %v6455_v15 }
 0x43e   : > { %2744 = vmatpush.msrb.mxu3 %v2690_v18  ;;  %v2915_v18 = vsel %vm982_vm6, %v6500_v1, %v6501_v27  ;;  %v6505_v27 = vunpack.i.l.bf16 %v8306_v33  ;;  %v6555_v1 = vunpack.i.l.bf16 %v8362_v55 }
 0x43f   : > { %2765 = vmatpush.msrb.mxu0 %v6446_v8  ;;  %v6496_v8 = vunpack.i.h.bf16 %v8231_v2 }
 0x440   : > { %v6599_v35 = vpop.permute.xlu0 %6598  ;;  %2745 = vmatpush.msrb.mxu3 %v2688_v11  ;;  %5931 = vmatmul.msk.f32.vlgmr.msrb.gmra.mxu0 %vm2310_vm11, %v5928_v26  ;;  %v6486_v11 = vunpack.i.h.bf16 %v8238_v41 }
 0x441   : > { %v6601_v50 = vunpack.i.h.bf16 %v6599_v35  ;;  %v6600_v36 = vunpack.i.l.bf16 %v6599_v35  ;;  %5930 = vmatmul.msk.f32.vlgmr.msrb.gmra.mxu3 %vm2310_vm11, %v5928_v26  ;;  %v6495_v26 = vunpack.i.l.bf16 %v8231_v2 }
 0x442   : > { %v2911_v42 = vsel %vm982_vm6, %v6485_v62, %v6486_v11  ;;  %v2912_v6 = vsel %vm982_vm6, %v6486_v11, %v6490_v32 }
 0x443   : > { %2874 = vmatpush.msra.mxu3 %v6601_v50  ;;  %v2805_v0 = vsel %vm891_vm5, %v6511_v60, %v6600_v36  ;;  %v2806_v54 = vsel %vm891_vm5, %v6600_v36, %v6601_v50  ;;  %v2913_v2 = vsel %vm982_vm6, %v6491_v43, %v6495_v26  ;;  %v2914_v60 = vsel %vm982_vm6, %v6495_v26, %v6496_v8 }
 0x444   : > { %2834 = vmatpush.msra.mxu1 %v2805_v0  ;;  %2854 = vmatpush.msrb.mxu2 %v2806_v54  ;;  %v6571_v50 = vunpack.i.h.bf16 %v8379_v38  ;;  %v6565_v0 = vunpack.i.l.bf16 %v8345_v44  ;;  %v6570_v54 = vunpack.i.l.bf16 %v8379_v38  ;;  %v6506_v38 = vunpack.i.h.bf16 %v8306_v33 }
 0x445   : > { %v8413_v14 = vpop.permute.xlu2 %6593  ;;  %2875 = vmatpush.msra.mxu3 %v6510_v12  ;;  %v8447_v12 = vpop.permute.xlu1 %6629  ;;  %v6590_v43 = vunpack.i.l.bf16 %v8393_v5 }
 0x446   : > { %2835 = vmatpush.msra.mxu1 %v2803_v7  ;;  %2855 = vmatpush.msrb.mxu2 %v2804_v9  ;;  %v6560_v7 = vunpack.i.l.bf16 %v8341_v13  ;;  %v6556_v9 = vunpack.i.h.bf16 %v8362_v55  ;;  %v6595_v62 = vunpack.i.l.bf16 %v8413_v14 }
 0x447   : > { %2876 = vmatpush.msra.mxu3 %v6476_v10  ;;  %v6566_v10 = vunpack.i.h.bf16 %v8345_v44 }
 0x448   : > { %v6604_v49 = vpop.permute.xlu0 %6603  ;;  %2836 = vmatpush.msra.mxu1 %v2801_v21  ;;  %2856 = vmatpush.msrb.mxu2 %v2802_v19  ;;  %v6632_v21 = vunpack.i.h.bf16 %v8447_v12  ;;  %v3025_v33 = vsel %vm1073_vm7, %v6556_v9, %v6560_v7  ;;  %v3026_v55 = vsel %vm1073_vm7, %v6560_v7, %v6561_v51 }
 0x449   : > { %v6606_v16 = vunpack.i.h.bf16 %v6604_v49  ;;  %v6605_v63 = vunpack.i.l.bf16 %v6604_v49  ;;  %2877 = vmatpush.msra.mxu3 %v6470_v25  ;;  %v3027_v13 = vsel %vm1073_vm7, %v6565_v0, %v6566_v10  ;;  %v3028_v49 = vsel %vm1073_vm7, %v6566_v10, %v6570_v54 }
 0x44a   : > { %2837 = vmatpush.msra.mxu1 %v2799_v31  ;;  %2857 = vmatpush.msrb.mxu2 %v2800_v39  ;;  %v5940_v31 = vld [vmem:[%s10169_s6 + $0x38] sm:$0xff] }
 0x44b   : > { %5935 = vmatmul.msk.f32.vlgmr.msra.gmra.mxu3 %vm2310_vm11, %v5932_v28  ;;  %5933 = vmatmul.msk.f32.vlgmr.msra.gmra.mxu1 %vm2310_vm11, %v5932_v28  ;;  %v2917_v15 = vsel %vm982_vm6, %v6516_v48, %v6605_v63  ;;  %v2918_v17 = vsel %vm982_vm6, %v6605_v63, %v6606_v16  ;;  %v6596_v63 = vunpack.i.h.bf16 %v8413_v14 }
 0x44c   : > { %5934 = vmatmul.msk.f32.vlgmr.msrb.gmra.mxu2 %vm2310_vm11, %v5932_v28  ;;  %2946 = vmatpush.msra.mxu0 %v2917_v15  ;;  %v3023_v15 = vsel %vm1073_vm7, %v6505_v27, %v6506_v38 }
 0x44d   : > { %2986 = vmatpush.msra.mxu2 %v6606_v16  ;;  %2966 = vmatpush.msrb.mxu1 %v2918_v17  ;;  %v8439_v20 = vpop.permute.xlu2 %6619  ;;  %v8488_v26 = vpop.permute.xlu1 %6644  ;;  %v3024_v17 = vsel %vm1073_vm7, %v6506_v38, %v6555_v1 }
 0x44e   : > { %2947 = vmatpush.msra.mxu0 %v2915_v18 }
 0x44f   : > { %2987 = vmatpush.msra.mxu2 %v6515_v61  ;;  %2967 = vmatpush.msrb.mxu1 %v2916_v56  ;;  %v6591_v61 = vunpack.i.h.bf16 %v8393_v5  ;;  %v6585_v56 = vunpack.i.l.bf16 %v8370_v23 }
 0x450   : > { %v6609_v35 = vpop.permute.xlu0 %6608  ;;  %2948 = vmatpush.msra.mxu0 %v2913_v2  ;;  %v6581_v2 = vunpack.i.h.bf16 %v8395_v3 }
 0x451   : > { %2988 = vmatpush.msra.mxu2 %v6496_v8  ;;  %v6611_v36 = vunpack.i.h.bf16 %v6609_v35  ;;  %v6610_v41 = vunpack.i.l.bf16 %v6609_v35  ;;  %2968 = vmatpush.msrb.mxu1 %v2914_v60  ;;  %v10179_v8 = vunpack.i.h.bf16 %v8488_v26  ;;  %v6576_v35 = vunpack.i.h.bf16 %v8376_v46 }
 0x452   : > { %2949 = vmatpush.msra.mxu0 %v2911_v42  ;;  %v6575_v60 = vunpack.i.l.bf16 %v8376_v46  ;;  %v10183_v46 = vunpack.i.l.bf16 %v8447_v12 }
 0x453   : > { %2989 = vmatpush.msra.mxu2 %v6490_v32  ;;  %2969 = vmatpush.msrb.mxu1 %v2912_v6  ;;  %v3029_v34 = vsel %vm1073_vm7, %v6571_v50, %v6610_v41  ;;  %v3030_v25 = vsel %vm1073_vm7, %v6610_v41, %v6611_v36  ;;  %v6586_v32 = vunpack.i.h.bf16 %v8370_v23  ;;  %v6580_v50 = vunpack.i.l.bf16 %v8395_v3  ;;  %v5944_v6 = vld [vmem:[%s10169_s6 + $0x40] sm:$0xff] }
 0x454   : > { %5937 = vmatmul.msk.f32.vlgmr.msra.gmra.mxu0 %vm2310_vm11, %v5936_v52  ;;  %5938 = vmatmul.msk.f32.vlgmr.msrb.gmra.mxu1 %vm2310_vm11, %v5936_v52  ;;  %v3140_v23 = vsel %vm1164_vm8, %v6591_v61, %v6595_v62 }
 0x455   : > { %5939 = vmatmul.msk.f32.vlgmr.msra.gmra.mxu2 %vm2310_vm11, %v5936_v52  ;;  %3098 = vmatpush.msra.mxu1 %v6611_v36  ;;  %v8466_v44 = vpop.permute.xlu2 %6634  ;;  %v3139_v36 = vsel %vm1164_vm8, %v6590_v43, %v6591_v61  ;;  %v3137_v52 = vsel %vm1164_vm8, %v6581_v2, %v6585_v56  ;;  %v3138_v10 = vsel %vm1164_vm8, %v6585_v56, %v6586_v32  ;;  %v2394_v61 = vpop.f32.mrf.mxu1 }
 0x456   : > { %3058 = vmatpush.msrb.mxu3 %v3029_v34  ;;  %3078 = vmatpush.msrb.mxu0 %v3030_v25  ;;  %v10184_v19 = vunpack.i.l.bf16 %v8466_v44  ;;  %v3136_v34 = vsel %vm1164_vm8, %v6576_v35, %v6580_v50 }
 0x457   : > { %3099 = vmatpush.msra.mxu1 %v6570_v54  ;;  %v3135_v54 = vsel %vm1164_vm8, %v6575_v60, %v6576_v35 }
 0x458   : > { %3059 = vmatpush.msrb.mxu3 %v3027_v13  ;;  %3079 = vmatpush.msrb.mxu0 %v3028_v49  ;;  %v6614_v39 = vpop.permute.xlu0 %6613  ;;  %v8478_v28 = vsel %vm466_vm1, %v6632_v21, %v10184_v19 }
 0x459   : > { %3100 = vmatpush.msra.mxu1 %v6561_v51  ;;  %v6616_v48 = vunpack.i.h.bf16 %v6614_v39  ;;  %v6615_v16 = vunpack.i.l.bf16 %v6614_v39  ;;  %v8540_v51 = vpop.permute.xlu1 %6659 }
 0x45a   : > { %3060 = vmatpush.msrb.mxu3 %v3025_v33  ;;  %3080 = vmatpush.msrb.mxu0 %v3026_v55 }
 0x45b   : > { %3101 = vmatpush.msra.mxu1 %v6555_v1  ;;  %v3141_v18 = vsel %vm1164_vm8, %v6596_v63, %v6615_v16  ;;  %v3142_v11 = vsel %vm1164_vm8, %v6615_v16, %v6616_v48 }
 0x45c   : > { %3061 = vmatpush.msrb.mxu3 %v3023_v15  ;;  %3081 = vmatpush.msrb.mxu0 %v3024_v17 }
 0x45d   : > { %5941 = vmatmul.msk.f32.vlgmr.msrb.gmra.mxu3 %vm2310_vm11, %v5940_v31  ;;  %5942 = vmatmul.msk.f32.vlgmr.msrb.gmra.mxu0 %vm2310_vm11, %v5940_v31  ;;  %v8498_v5 = vpop.permute.xlu2 %6649 }
 0x45e   : > { %5943 = vmatmul.msk.f32.vlgmr.msra.gmra.mxu1 %vm2310_vm11, %v5940_v31  ;;  %3210 = vmatpush.msra.mxu0 %v6616_v48  ;;  %v10180_v14 = vunpack.i.l.bf16 %v8498_v5  ;;  %v6652_v9 = vunpack.i.h.bf16 %v8498_v5 }
 0x45f   : > { %3170 = vmatpush.msrb.mxu2 %v3141_v18  ;;  %3190 = vmatpush.msra.mxu3 %v3142_v11 }
 0x460   : > { %3211 = vmatpush.msra.mxu0 %v6595_v62  ;;  %v8510_v41 = vpop.permute.xlu0 %6624  ;;  %v8517_v42 = vsel %vm618_vm2, %v10179_v8, %v10180_v14 }
 0x461   : > { %10255 = vst [vmem:[#allocation6_spill] sm:$0xff] %v8517_v42  ;;  %3171 = vmatpush.msrb.mxu2 %v3139_v36  ;;  %3191 = vmatpush.msra.mxu3 %v3140_v23  ;;  %v10182_v3 = vunpack.i.h.bf16 %v8510_v41  ;;  %v8551_v27 = vpop.permute.xlu1 %6674 }
 0x462   : > { %3212 = vmatpush.msra.mxu0 %v6586_v32  ;;  %10256 = vst [vmem:[#allocation7_spill] sm:$0xff] %v8551_v27  ;;  %v10177_v39 = vunpack.i.l.bf16 %v8551_v27 }
 0x463   : > { %3172 = vmatpush.msrb.mxu2 %v3137_v52  ;;  %3192 = vmatpush.msra.mxu3 %v3138_v10  ;;  %v8531_v0 = vsel %vm466_vm1, %v10182_v3, %v10183_v46 }
 0x464   : > { %3213 = vmatpush.msra.mxu0 %v6580_v50 }
 0x465   : > { %3173 = vmatpush.msrb.mxu2 %v3135_v54  ;;  %3193 = vmatpush.msra.mxu3 %v3136_v34  ;;  %v8553_v1 = vpop.permute.xlu2 %6664 }
 0x466   : > { %5945 = vmatmul.msk.f32.vlgmr.msrb.gmra.mxu2 %vm2310_vm11, %v5944_v6  ;;  %5946 = vmatmul.msk.f32.vlgmr.msra.gmra.mxu3 %vm2310_vm11, %v5944_v6  ;;  %v10178_v13 = vunpack.i.h.bf16 %v8553_v1 }
 0x467   : > { %5947 = vmatmul.msk.f32.vlgmr.msra.gmra.mxu0 %vm2310_vm11, %v5944_v6 }
 0x468   : > { %v8538_v25 = vpop.permute.xlu0 %6639 }
 0x470   : > { %v8542_v7 = vpop.permute.xlu0 %6654 }
 0x471   : > { %v10181_v38 = vunpack.i.l.bf16 %v8542_v7 }
 0x473   : > { %v8549_v21 = vsel %vm618_vm2, %v6652_v9, %v10181_v38 }
 0x478   : > { %v8556_v49 = vpop.permute.xlu0 %6669 }
 0x479   : > { %10257 = vst [vmem:[#allocation8_spill] sm:$0xff] %v8556_v49  ;;  %v6672_v48 = vunpack.i.h.bf16 %v8556_v49  ;;  %v10176_v16 = vunpack.i.l.bf16 %v8556_v49 }
 0x47b   : > { %v8564_v33 = vsel %vm709_vm3, %v6672_v48, %v10177_v39  ;;  %v8571_v55 = vsel %vm709_vm3, %v10178_v13, %v10176_v16 }
 0x47c   : > { %10258 = vst [vmem:[#allocation9_spill] sm:$0xff] %v8571_v55 }
 0x497   : > { %v2371_v63 = vpop.f32.mrf.mxu0 }
 0x49e   : > { %v2331_v31 = vpop.f32.mrf.mxu2 }
 0x49f   : > { %v2395_v54 = vadd.f32 %v2394_v61, %v2331_v31 }
 0x4a7   : > { %v2351_v43 = vpop.f32.mrf.mxu3 }
 0x4ac   : > { %v2503_v15 = vpop.f32.mrf.mxu0  ;;  %v2523_v62 = vpop.f32.mrf.mxu1 }
 0x4ad   : > { %v2414_v17 = vpop.f32.mrf.mxu2  ;;  %v2546_v39 = vadd.f32 %v2503_v15, %v2395_v54 }
 0x4ae   : > { %v2415_v34 = vadd.f32 %v2414_v17, %v2351_v43 }
 0x4b0   : > { %v2434_v18 = vpop.f32.mrf.mxu3  ;;  %v2547_v13 = vadd.f32 %v2523_v62, %v2415_v34 }
 0x4b1   : > { %v2435_v23 = vadd.f32 %v2434_v18, %v2371_v63 }
 0x4b4   : > { %v2635_v11 = vpop.f32.mrf.mxu0  ;;  %v2655_v56 = vpop.f32.mrf.mxu1 }
 0x4b5   : > { %v2659_v46 = vadd.f32 %v2635_v11, %v2547_v13 }
 0x4b6   : > { %v2543_v32 = vpop.f32.mrf.mxu2 }
 0x4b7   : > { %v2548_v6 = vadd.f32 %v2543_v32, %v2435_v23 }
 0x4b8   : > { %v2615_v2 = vpop.f32.mrf.mxu3 }
 0x4b9   : > { %v2660_v48 = vadd.f32 %v2655_v56, %v2548_v6  ;;  %v2658_v19 = vadd.f32 %v2615_v2, %v2546_v39 }
 0x4bd   : > { %v2767_v35 = vpop.f32.mrf.mxu0 }
 0x4be   : > { %v2727_v60 = vpop.f32.mrf.mxu2  ;;  %v2772_v14 = vadd.f32 %v2767_v35, %v2660_v48  ;;  %v8579_v48 = vld [vmem:[#allocation2 + $0x58] sm:$0xff] }
 0x4bf   : > { %v2770_v18 = vadd.f32 %v2727_v60, %v2658_v19 }
 0x4c4   : > { %v2747_v36 = vpop.f32.mrf.mxu3 }
 0x4c5   : > { %v2771_v55 = vadd.f32 %v2747_v36, %v2659_v46 }
 0x4c8   : > { %v2839_v50 = vpop.f32.mrf.mxu1 }
 0x4c9   : > { %v2882_v31 = vadd.f32 %v2839_v50, %v2770_v18  ;;  %v8584_v18 = vld [vmem:[#allocation2 + $0x50] sm:$0xff] }
 0x4ce   : > { %v2879_v16 = vpop.f32.mrf.mxu3 }
 0x4cf   : > { %v2859_v10 = vpop.f32.mrf.mxu2  ;;  %v2884_v3 = vadd.f32 %v2879_v16, %v2772_v14 }
 0x4d0   : > { %v2883_v42 = vadd.f32 %v2859_v10, %v2771_v55 }
 0x4d1   : > { %v2951_v52 = vpop.f32.mrf.mxu0  ;;  %v2971_v9 = vpop.f32.mrf.mxu1 }
 0x4d2   : > { %v2994_v17 = vadd.f32 %v2951_v52, %v2882_v31  ;;  %v2995_v56 = vadd.f32 %v2971_v9, %v2883_v42  ;;  %v8592_v31 = vld [vmem:[#allocation2 + $0x48] sm:$0xff] }
 0x4d8   : > { %v2991_v38 = vpop.f32.mrf.mxu2 }
 0x4d9   : > { %v2996_v49 = vadd.f32 %v2991_v38, %v2884_v3 }
 0x4da   : > { %v3083_v8 = vpop.f32.mrf.mxu0 }
 0x4db   : > { %v3103_v27 = vpop.f32.mrf.mxu1  ;;  %v3107_v62 = vadd.f32 %v3083_v8, %v2995_v56 }
 0x4dc   : > { %v3108_v32 = vadd.f32 %v3103_v27, %v2996_v49 }
 0x4e0   : > { %v3063_v63 = vpop.f32.mrf.mxu3 }
 0x4e1   : > { %v3106_v35 = vadd.f32 %v3063_v63, %v2994_v17  ;;  %v8598_v17 = vld [vmem:[#allocation2 + $0x8] sm:$0xff] }
 0x4e4   : > { %v3215_v61 = vpop.f32.mrf.mxu0 }
 0x4e5   : > { %v3220_v43 = vadd.f32 %v3215_v61, %v3108_v32  ;;  %v8588_v32 = vpack.i.bf16 %v8579_v48, %v8584_v18  ;;  %v6713_v61 = vpack.i.bf16 %v8592_v31, %v8148_v53  ;;  %v8614_v53 = vld [vmem:[#allocation2 + $0x28] sm:$0xff] }
 0x4e7   : > { %v3229_v15 = vadd.f32 %v8417_v45, %v3220_v43  ;;  %v8596_v43 = vld [vmem:[#allocation2] sm:$0xff] }
 0x4e8   : > { %v8602_v56 = vpack.i.bf16 %v8598_v17, %v8596_v43 }
 0x4e9   : > { %v3232_v23 = vmin.f32 %v3229_v15, 0.0  ;;  %v3175_v14 = vpop.f32.mrf.mxu2  ;;  %v3195_v13 = vpop.f32.mrf.mxu3  ;;  %vm3247_vm15 = vcmp.gt.f32.partialorder %v3229_v15, 0.0 }
 0x4ea   : > { %v3218_v39 = vadd.f32 %v3175_v14, %v3106_v35  ;;  %v3219_v3 = vadd.f32 %v3195_v13, %v3107_v62  ;;  %v8635_v62 = vpop.permute.xlu0 %6684  ;;  %v8646_v13 = vpop.permute.xlu1 %6689 }
 0x4eb   : > { %v3237_v46 = vmul.f32 1.442695, %v3232_v23  ;;  %v10189_v23 = vunpack.i.l.bf16 %v8635_v62 }
 0x4ec   : > { %v3227_v38 = vadd.f32 %v8417_v45, %v3218_v39  ;;  %v3228_v19 = vadd.f32 %v8417_v45, %v3219_v3  ;;  %v10192_v39 = vunpack.i.l.bf16 %v8646_v13 }
 0x4ed   : > { %7271 = vpow2.f32 %v3237_v46 }
 0x4ee   : > { %v3230_v27 = vmin.f32 %v3227_v38, 0.0  ;;  %v3231_v49 = vmin.f32 %v3228_v19, 0.0  ;;  %vm3245_vm0 = vcmp.gt.f32.partialorder %v3227_v38, 0.0  ;;  %vm3246_vm9 = vcmp.gt.f32.partialorder %v3228_v19, 0.0 }
 0x4f0   : > { %v3233_v16 = vmul.f32 1.442695, %v3230_v27  ;;  %v3235_v55 = vmul.f32 1.442695, %v3231_v49 }
 0x4f2   : > { %7273 = vpow2.f32 %v3233_v16  ;;  %v8665_v16 = vpop.permute.xlu1 %6704 }
 0x4f3   : > { %v7272_v42 = vpop.eup %7271  ;;  %7275 = vpow2.f32 %v3235_v55  ;;  %v7296_v55 = vld [vmem:[#allocation2 + $0x18] sm:$0xff] }
 0x4f4   : > { %v5950_v8 = vadd.f32 -1.0, %v7272_v42  ;;  %v8672_v42 = vpop.permute.xlu0 %6699 }
 0x4f6   : > { %v3244_v11 = vmul.f32 0.2, %v5950_v8 }
 0x4f8   : > { %v7274_v2 = vpop.eup %7273  ;;  %v3250_v60 = vsel %vm3247_vm15, %v3229_v15, %v3244_v11  ;;  %v8618_v15 = vpack.i.bf16 %v8614_v53, %v8300_v58 }
 0x4f9   : > { %v7276_v50 = vpop.eup %7275  ;;  %v5948_v36 = vadd.f32 -1.0, %v7274_v2  ;;  %v3253_v52 = vmul.f32 %v3250_v60, %v7623_v40  ;;  %v4404_v40 = vld [vmem:[#allocation2 + $0x28] sm:$0xff] }
 0x4fa   : > { %v5949_v10 = vadd.f32 -1.0, %v7276_v50 }
 0x4fb   : > { %3261 = vrot.lane.b32.xlu1 %v3253_v52, %s7332_s18  ;;  %v3242_v45 = vmul.f32 0.2, %v5948_v36 }
 0x4fc   : > { %v3243_v6 = vmul.f32 0.2, %v5949_v10 }
 0x4fd   : > { %v3248_v54 = vsel %vm3245_vm0, %v3227_v38, %v3242_v45 }
 0x4fe   : > { %v3249_v34 = vsel %vm3246_vm9, %v3228_v19, %v3243_v6  ;;  %v3251_v9 = vmul.f32 %v3248_v54, %v7615_v29  ;;  %v4401_v29 = vld [vmem:[#allocation2 + $0x10] sm:$0xff] }
 0x4ff   : > { %v3252_v63 = vmul.f32 %v3249_v34, %v7617_v30 }
 0x500   : > { %3257 = vrot.lane.b32.xlu2 %v3251_v9, %s7332_s18 }
 0x501   : > { %3259 = vrot.lane.b32.xlu0 %v3252_v63, %s7332_s18 }
 0x503   : > { %6719 = vrot.lane.b32.xlu1 %v8588_v32, %s7326_s30 }
 0x508   : > { %6729 = vrot.lane.b32.xlu2 %v8236_v37, %s7327_s13 }
 0x509   : > { %6714 = vrot.lane.b32.xlu0 %v6713_v61, %s7326_s30 }
 0x50b   : > { %6724 = vrot.lane.b32.xlu1 %v8602_v56, %s7327_s13 }
 0x510   : > { %6744 = vrot.lane.b32.xlu2 %v6713_v61, %s7327_s13 }
 0x511   : > { %6734 = vrot.lane.b32.xlu0 %v8159_v4, %s7327_s13  ;;  %v8633_v4 = vpop.permute.xlu2 %6679 }
 0x512   : > { %v10193_v35 = vunpack.i.h.bf16 %v8633_v4 }
 0x513   : > { %6739 = vrot.lane.b32.xlu1 %v8286_v24, %s7327_s13 }
 0x514   : > { %v8644_v14 = vsel %vm800_vm4, %v10193_v35, %v10189_v23 }
 0x518   : > { %6764 = vrot.lane.b32.xlu2 %v8618_v15, %s7328_s14 }
 0x519   : > { %6749 = vrot.lane.b32.xlu0 %v8588_v32, %s7327_s13  ;;  %v8650_v3 = vpop.permute.xlu2 %6694 }
 0x51a   : > { %v10197_v45 = vunpack.i.h.bf16 %v8650_v3 }
 0x51b   : > { %6759 = vrot.lane.b32.xlu1 %v8236_v37, %s7328_s14 }
 0x520   : > { %6779 = vrot.lane.b32.xlu2 %v8588_v32, %s7328_s14 }
 0x521   : > { %6754 = vrot.lane.b32.xlu0 %v8602_v56, %s7328_s14  ;;  %v8657_v38 = vpop.permute.xlu2 %6709 }
 0x523   : > { %6774 = vrot.lane.b32.xlu1 %v6713_v61, %s7328_s14 }
 0x529   : > { %6769 = vrot.lane.b32.xlu0 %v8286_v24, %s7328_s14  ;;  %v6687_v24 = vunpack.i.h.bf16 %v8635_v62 }
 0x52b   : > { %v8655_v46 = vsel %vm800_vm4, %v6687_v24, %v10192_v39 }
 0x55a   : > { %v3258_v19 = vpop.permute.xlu2 %3257 }
 0x55b   : > { %3268 = vst.msk [vmem:[#allocation2 + $0x60] sm:$0xff] %vm1296_vm13, %v3258_v19 }
 0x562   : > { %v8660_v27 = vld [vmem:[#allocation2 + $0x60] sm:$0xff]  ;;  %v8686_v52 = vpop.permute.xlu2 %6729 }
 0x563   : > { %3437 = vmatpush.msrb.mxu0 %v8660_v27  ;;  %v6793_v49 = vpack.i.bf16 %v8660_v27, %v8579_v48  ;;  %v6818_v8 = vpack.i.bf16 %v8660_v27, %v8300_v58  ;;  %10259 = vst [vmem:[#allocation10_spill] sm:$0xff] %v8686_v52 }
 0x565   : > { %6794 = vrot.lane.b32.xlu0 %v6793_v49, %s7325_s29  ;;  %6789 = vrot.lane.b32.xlu2 %v6793_v49, %s7324_s28 }
 0x566   : > { %6784 = vrot.lane.b32.xlu1 %v6793_v49, %s7323_s27  ;;  %3438 = vmatpush.msrb.mxu0 %v8592_v31 }
 0x568   : > { %3439 = vmatpush.msrb.mxu0 %v8282_v22 }
 0x56a   : > { %3440 = vmatpush.msrb.mxu0 %v7296_v55  ;;  %v8708_v63 = vpop.permute.xlu2 %6744 }
 0x56b   : > { %v10188_v24 = vunpack.i.l.bf16 %v8708_v63 }
 0x56c   : > { %3441 = vmatpush.msrb.mxu0 %v8596_v43 }
 0x56d   : > { %v3262_v11 = vpop.permute.xlu1 %3261 }
 0x56e   : > { %6819 = vrot.lane.b32.xlu1 %v6818_v8, %s7329_s15 }
 0x573   : > { %v3260_v2 = vpop.permute.xlu0 %3259 }
 0x574   : > { %v8679_v60 = vsel %vm1290_vm12, %v3258_v19, %v3260_v2  ;;  %v3264_v50 = vsel %vm1290_vm12, %v3260_v2, %v3262_v11  ;;  %v6848_v11 = vpack.i.bf16 %v8282_v22, %v8579_v48  ;;  %v8748_v2 = vld [vmem:[#allocation2 + $0x38] sm:$0xff] }
 0x575   : > { %3269 = vst [vmem:[#allocation2 + $0x68] sm:$0xff] %v8679_v60  ;;  %v8683_v36 = vpop.permute.xlu1 %6719  ;;  %v8716_v49 = vpack.i.bf16 %v8679_v60, %v8660_v27 }
 0x576   : > { %3270 = vst.msk [vmem:[#allocation2 + $0x70] sm:$0xff] %vm1299_vm14, %v3264_v50 }
 0x57b   : > { %v8688_v58 = vpop.permute.xlu0 %6714 }
 0x57c   : > { %v10190_v10 = vunpack.i.l.bf16 %v8688_v58 }
 0x57d   : > { %v8692_v6 = vpop.permute.xlu1 %6724  ;;  %v8694_v54 = vld [vmem:[#allocation2 + $0x70] sm:$0xff] }
 0x57e   : > { %v6823_v34 = vpack.i.bf16 %v8694_v54, %v8679_v60  ;;  %v8703_v9 = vsel %vm800_vm4, %v10197_v45, %v10190_v10  ;;  %v6893_v10 = vpack.i.bf16 %v7296_v55, %v8282_v22  ;;  %v8785_v55 = vld [vmem:[#allocation2 + $0x10] sm:$0xff] }
 0x580   : > { %6824 = vrot.lane.b32.xlu1 %v6823_v34, %s7325_s29  ;;  %6809 = vrot.lane.b32.xlu0 %v6823_v34, %s7324_s28 }
 0x581   : > { %6799 = vrot.lane.b32.xlu2 %v6823_v34, %s7323_s27 }
 0x585   : > { %v8710_v61 = vpop.permute.xlu1 %6739 }
 0x586   : > { %v10191_v19 = vunpack.i.h.bf16 %v8710_v61 }
 0x588   : > { %6834 = vrot.lane.b32.xlu1 %v8716_v49, %s7327_s13  ;;  %6814 = vrot.lane.b32.xlu0 %v8236_v37, %s7329_s15  ;;  %v8727_v8 = vsel %vm891_vm5, %v10191_v19, %v10188_v24  ;;  %v6843_v37 = vpack.i.bf16 %v8584_v18, %v8592_v31  ;;  %v6732_v24 = vunpack.i.h.bf16 %v8686_v52  ;;  %v10195_v19 = vunpack.i.h.bf16 %v8692_v6 }
 0x589   : > { %6804 = vrot.lane.b32.xlu2 %v8602_v56, %s7329_s15  ;;  %v8746_v56 = vld [vmem:[#allocation2 + $0x40] sm:$0xff] }
 0x58a   : > { %v6853_v50 = vpack.i.bf16 %v8746_v56, %v8748_v2 }
 0x590   : > { %6849 = vrot.lane.b32.xlu1 %v6848_v11, %s7329_s15  ;;  %3762 = vrot.lane.b32.xlu0 %v8694_v54, %s7326_s30  ;;  %v8760_v11 = vpop.permute.xlu0 %6734 }
 0x591   : > { %6829 = vrot.lane.b32.xlu2 %v8716_v49, %s7326_s30  ;;  %v10196_v23 = vunpack.i.l.bf16 %v8760_v11 }
 0x593   : > { %v8774_v39 = vsel %vm891_vm5, %v6732_v24, %v10196_v23  ;;  %v6888_v24 = vpack.i.bf16 %v8592_v31, %v8660_v27  ;;  %v8808_v31 = vpop.permute.xlu2 %6764 }
 0x594   : > { %10264 = vst [vmem:[#allocation15_spill] sm:$0xff] %v8808_v31 }
 0x598   : > { %4008 = vrot.lane.b32.xlu1 %v8694_v54, %s7328_s14  ;;  %6839 = vrot.lane.b32.xlu0 %v8716_v49, %s7328_s14 }
 0x599   : > { %3885 = vrot.lane.b32.xlu2 %v8694_v54, %s7327_s13 }
 0x5a0   : > { %6874 = vrot.lane.b32.xlu1 %v6823_v34, %s7330_s16  ;;  %6844 = vrot.lane.b32.xlu0 %v6843_v37, %s7329_s15  ;;  %v10194_v37 = vunpack.i.l.bf16 %v8686_v52 }
 0x5a1   : > { %6854 = vrot.lane.b32.xlu2 %v6853_v50, %s7329_s15 }
 0x5a2   : > { %v8783_v22 = vsel %vm891_vm5, %v10195_v19, %v10194_v37  ;;  %v8802_v19 = vpop.permute.xlu1 %6759 }
 0x5a3   : > { %10262 = vst [vmem:[#allocation13_spill] sm:$0xff] %v8802_v19  ;;  %v10203_v27 = vunpack.i.l.bf16 %v8802_v19  ;;  %v6762_v45 = vunpack.i.h.bf16 %v8802_v19 }
 0x5a8   : > { %6879 = vrot.lane.b32.xlu1 %v8618_v15, %s7330_s16  ;;  %4113 = vrot.lane.b32.xlu0 %v8614_v53, %s7329_s15  ;;  %v4399_v15 = vld [vmem:[#allocation2] sm:$0xff] }
 0x5a9   : > { %6859 = vrot.lane.b32.xlu2 %v6823_v34, %s7329_s15  ;;  %v4400_v34 = vld [vmem:[#allocation2 + $0x8] sm:$0xff] }
 0x5aa   : > { %v8776_v35 = vpack.i.bf16 %v4400_v34, %v4399_v15  ;;  %v4406_v15 = vld [vmem:[#allocation2 + $0x38] sm:$0xff]  ;;  %v4347_v34 = vld [vmem:[%s10172_s9] sm:$0xff] }
 0x5ac   : > { %10260 = vst [vmem:[#allocation11_spill] sm:$0xff] %v8776_v35 }
 0x5b0   : > { %6894 = vrot.lane.b32.xlu1 %v6893_v10, %s7330_s16  ;;  %6869 = vrot.lane.b32.xlu0 %v6853_v50, %s7330_s16  ;;  %v8789_v10 = vpop.permute.xlu0 %6749  ;;  %v4405_v50 = vld [vmem:[#allocation2 + $0x30] sm:$0xff] }
 0x5b1   : > { %6864 = vrot.lane.b32.xlu2 %v8588_v32, %s7330_s16  ;;  %v6883_v32 = vpack.i.bf16 %v8785_v55, %v8598_v17  ;;  %v8800_v37 = vpack.i.bf16 %v4406_v15, %v4405_v50  ;;  %v4402_v50 = vld [vmem:[#allocation2 + $0x18] sm:$0xff]  ;;  %v10204_v15 = vunpack.i.l.bf16 %v8808_v31  ;;  %v6626_v31 = vunpack.i.l.bf16 %v8510_v41 }
 0x5b3   : > { %10261 = vst [vmem:[#allocation12_spill] sm:$0xff] %v8800_v37 }
 0x5b8   : > { %6899 = vrot.lane.b32.xlu1 %v8776_v35, %s7323_s27  ;;  %6889 = vrot.lane.b32.xlu0 %v6888_v24, %s7330_s16  ;;  %v8804_v23 = vpop.permute.xlu0 %6754  ;;  %v4403_v24 = vld [vmem:[#allocation2 + $0x20] sm:$0xff] }
 0x5b9   : > { %6884 = vrot.lane.b32.xlu2 %v6883_v32, %s7330_s16  ;;  %10263 = vst [vmem:[#allocation14_spill] sm:$0xff] %v8804_v23  ;;  %v10202_v32 = vunpack.i.h.bf16 %v8804_v23  ;;  %v8816_v30 = vpack.i.bf16 %v4404_v40, %v4403_v24  ;;  %v8840_v40 = vld [vmem:[#allocation2 + $0x50] sm:$0xff]  ;;  %v8842_v24 = vld [vmem:[#allocation2 + $0x48] sm:$0xff]  ;;  %v6637_v23 = vunpack.i.h.bf16 %v8466_v44 }
 0x5ba   : > { %10269 = vst [vmem:[#allocation20_spill] sm:$0xff] %v8840_v40 }
 0x5bb   : > { %10265 = vst [vmem:[#allocation16_spill] sm:$0xff] %v8816_v30  ;;  %v8825_v52 = vsel %vm982_vm6, %v10202_v32, %v10203_v27  ;;  %v8851_v27 = vpop.permute.xlu1 %6774 }
 0x5bc   : > { %10267 = vst [vmem:[#allocation18_spill] sm:$0xff] %v8825_v52 }
 0x5bd   : > { %10270 = vst [vmem:[#allocation21_spill] sm:$0xff] %v8842_v24 }
 0x5c0   : > { %6914 = vrot.lane.b32.xlu1 %v8800_v37, %s7323_s27  ;;  %4350 = vperm.xlu0 %6201, %v4347_v34   ;;  %v8818_v34 = vpack.i.bf16 %v4402_v50, %v4401_v29  ;;  %v8838_v29 = vpop.permute.xlu2 %6779  ;;  %v8846_v50 = vpack.i.bf16 %v8579_v48, %v8840_v40 }
 0x5c1   : > { %4226 = vrot.lane.b32.xlu2 %v8596_v43, %s7330_s16  ;;  %v8830_v43 = vsel %vm982_vm6, %v6762_v45, %v10204_v15  ;;  %v4407_v45 = vld [vmem:[#allocation2 + $0x40] sm:$0xff] }
 0x5c2   : > { %10266 = vst [vmem:[#allocation17_spill] sm:$0xff] %v8818_v34  ;;  %v8849_v32 = vpack.i.bf16 %v8842_v24, %v4407_v45  ;;  %v8870_v24 = vld [vmem:[%s10171_s8] sm:$0xff] }
 0x5c3   : > { %10268 = vst [vmem:[#allocation19_spill] sm:$0xff] %v8830_v43  ;;  %5955 = vmatmul.msk.f32.vlgmr.msrb.gmra.mxu0 %vm3359_vm10, %v8870_v24 }
 0x5c8   : > { %6929 = vrot.lane.b32.xlu1 %v8776_v35, %s7324_s28  ;;  %6909 = vrot.lane.b32.xlu0 %v8816_v30, %s7323_s27  ;;  %v8859_v15 = vpop.permute.xlu2 %6789  ;;  %v6701_v35 = vunpack.i.l.bf16 %v8672_v42 }
 0x5c9   : > { %6904 = vrot.lane.b32.xlu2 %v8818_v34, %s7323_s27 }
 0x5d0   : > { %6944 = vrot.lane.b32.xlu1 %v8800_v37, %s7324_s28  ;;  %6924 = vrot.lane.b32.xlu0 %v8846_v50, %s7323_s27 }
 0x5d1   : > { %6919 = vrot.lane.b32.xlu2 %v8849_v32, %s7323_s27 }
 0x5d8   : > { %6959 = vrot.lane.b32.xlu1 %v8716_v49, %s7323_s27  ;;  %6939 = vrot.lane.b32.xlu0 %v8816_v30, %s7324_s28  ;;  %v6785_v45 = vpop.permute.xlu1 %6784  ;;  %v6702_v49 = vunpack.i.h.bf16 %v8672_v42 }
 0x5d9   : > { %6934 = vrot.lane.b32.xlu2 %v8818_v34, %s7324_s28  ;;  %v6787_v40 = vunpack.i.h.bf16 %v6785_v45  ;;  %v6786_v19 = vunpack.i.l.bf16 %v6785_v45  ;;  %v6526_v45 = vunpack.i.h.bf16 %v8247_v59 }
 0x5da   : > { %v3340_v42 = vsel %vm466_vm1, %v6701_v35, %v6702_v49  ;;  %v10271_v35 = vunpack.i.l.bf16 %v8466_v44  ;;  %v5951_v44 = vld [vmem:[%s10171_s8 + $0x8] sm:$0xff] }
 0x5db   : > { %v6800_v37 = vpop.permute.xlu2 %6799 }
 0x5dc   : > { %v6802_v30 = vunpack.i.h.bf16 %v6800_v37  ;;  %v6801_v52 = vunpack.i.l.bf16 %v6800_v37  ;;  %v3341_v37 = vsel %vm466_vm1, %v6702_v49, %v6786_v19  ;;  %v10273_v49 = vunpack.i.h.bf16 %v8510_v41 }
 0x5de   : > { %3414 = vmatpush.msrb.mxu3 %v6802_v30  ;;  %v3342_v34 = vsel %vm466_vm1, %v6787_v40, %v6801_v52  ;;  %v3343_v43 = vsel %vm466_vm1, %v6801_v52, %v6802_v30  ;;  %v6621_v30 = vunpack.i.l.bf16 %v8439_v20  ;;  %v8887_v52 = vpop.permute.xlu0 %6769  ;;  %v3339_v40 = vsel %vm466_vm1, %v10271_v35, %v6637_v23 }
 0x5df   : > { %3374 = vmatpush.msrb.mxu1 %v3342_v34  ;;  %3394 = vmatpush.msra.mxu2 %v3343_v43  ;;  %v6622_v34 = vunpack.i.h.bf16 %v8439_v20  ;;  %v6646_v35 = vunpack.i.l.bf16 %v8488_v26 }
 0x5e0   : > { %3415 = vmatpush.msrb.mxu3 %v6786_v19  ;;  %6954 = vrot.lane.b32.xlu0 %v8846_v50, %s7324_s28  ;;  %v10272_v19 = vunpack.i.l.bf16 %v8447_v12  ;;  %v3334_v20 = vsel %vm466_vm1, %v6526_v45, %v6621_v30 }
 0x5e1   : > { %6949 = vrot.lane.b32.xlu2 %v8849_v32, %s7324_s28  ;;  %3375 = vmatpush.msrb.mxu1 %v3340_v42  ;;  %v3336_v42 = vsel %vm466_vm1, %v6626_v31, %v10273_v49  ;;  %v3335_v59 = vsel %vm466_vm1, %v6621_v30, %v6622_v34 }
 0x5e2   : > { %3395 = vmatpush.msra.mxu2 %v3341_v37  ;;  %3416 = vmatpush.msrb.mxu3 %v6637_v23  ;;  %v6792_v23 = vunpack.i.h.bf16 %v8859_v15  ;;  %v6711_v37 = vunpack.i.l.bf16 %v8657_v38 }
 0x5e3   : > { %v8890_v43 = vpop.permute.xlu2 %6804  ;;  %3376 = vmatpush.msrb.mxu1 %v8478_v28  ;;  %v8914_v28 = vpop.permute.xlu1 %6819 }
 0x5e4   : > { %3396 = vmatpush.msra.mxu2 %v3339_v40  ;;  %3417 = vmatpush.msrb.mxu3 %v10272_v19  ;;  %v6666_v19 = vunpack.i.l.bf16 %v8553_v1 }
 0x5e5   : > { %3377 = vmatpush.msrb.mxu1 %v3336_v42  ;;  %v6642_v42 = vunpack.i.h.bf16 %v8538_v25 }
 0x5e6   : > { %3397 = vmatpush.msra.mxu2 %v8531_v0  ;;  %3418 = vmatpush.msrb.mxu3 %v6622_v34  ;;  %v8912_v12 = vpop.permute.xlu0 %6794  ;;  %v7300_v0 = vld [vmem:[#allocation2 + $0x20] sm:$0xff] }
 0x5e7   : > { %3378 = vmatpush.msrb.mxu1 %v3334_v20  ;;  %5954 = vmatmul.msk.f32.vlgmr.msrb.gmra.mxu3 %vm3359_vm10, %v5951_v44  ;;  %v6641_v20 = vunpack.i.l.bf16 %v8538_v25  ;;  %v6536_v25 = vunpack.i.h.bf16 %v8274_v57  ;;  %v10278_v57 = vunpack.i.h.bf16 %v8553_v1 }
 0x5e8   : > { %3398 = vmatpush.msra.mxu2 %v3335_v59  ;;  %5952 = vmatmul.msk.f32.vlgmr.msrb.gmra.mxu1 %vm3359_vm10, %v5951_v44 }
 0x5e9   : > { %3457 = vmatpush.msra.mxu1 %v8679_v60  ;;  %5953 = vmatmul.msk.f32.vlgmr.msra.gmra.mxu2 %vm3359_vm10, %v5951_v44  ;;  %v6791_v60 = vunpack.i.l.bf16 %v8859_v15  ;;  %v6657_v15 = vunpack.i.h.bf16 %v8542_v7  ;;  %v10274_v44 = vunpack.i.l.bf16 %v8542_v7 }
 0x5ea   : > { %3477 = vmatpush.msrb.mxu2 %v8694_v54 }
 0x5eb   : > { %3458 = vmatpush.msra.mxu1 %v8584_v18  ;;  %v8919_v41 = vpop.permute.xlu2 %6829  ;;  %v6707_v18 = vunpack.i.h.bf16 %v8665_v16  ;;  %v3523_v59 = vsel %vm618_vm2, %v10274_v44, %v6657_v15  ;;  %v6722_v44 = vunpack.i.h.bf16 %v8683_v36 }
 0x5ec   : > { %3478 = vmatpush.msrb.mxu2 %v8579_v48  ;;  %v6706_v48 = vunpack.i.l.bf16 %v8665_v16  ;;  %v6712_v16 = vunpack.i.h.bf16 %v8657_v38 }
 0x5ed   : > { %3459 = vmatpush.msra.mxu1 %v8748_v2  ;;  %v3525_v45 = vsel %vm618_vm2, %v6707_v18, %v6791_v60 }
 0x5ee   : > { %3479 = vmatpush.msrb.mxu2 %v8746_v56  ;;  %v3524_v40 = vsel %vm618_vm2, %v6706_v48, %v6707_v18  ;;  %v3647_v49 = vsel %vm709_vm3, %v6711_v37, %v6712_v16  ;;  %v6661_v18 = vunpack.i.l.bf16 %v8540_v51  ;;  %v6832_v48 = vunpack.i.h.bf16 %v8919_v41 }
 0x5ef   : > { %3460 = vmatpush.msra.mxu1 %v7300_v0  ;;  %v6546_v0 = vunpack.i.h.bf16 %v8311_v47  ;;  %v10275_v47 = vunpack.i.l.bf16 %v8498_v5  ;;  %v6796_v37 = vunpack.i.l.bf16 %v8912_v12  ;;  %v3518_v5 = vsel %vm618_vm2, %v6536_v25, %v6641_v20  ;;  %v10282_v25 = vld [vmem:[#allocation9_spill] sm:$0xff] }
 0x5f0   : > { %3480 = vmatpush.msrb.mxu2 %v8614_v53 }
 0x5f1   : > { %3461 = vmatpush.msra.mxu1 %v8598_v17  ;;  %v6797_v17 = vunpack.i.h.bf16 %v8912_v12  ;;  %v3641_v1 = vsel %vm709_vm3, %v6546_v0, %v6661_v18  ;;  %v5958_v12 = vld [vmem:[%s10171_s8 + $0x10] sm:$0xff] }
 0x5f2   : > { %3481 = vmatpush.msrb.mxu2 %v8785_v55  ;;  %5956 = vmatmul.msk.f32.vlgmr.msra.gmra.mxu1 %vm3359_vm10, %v8870_v24  ;;  %v8932_v54 = vpop.permute.xlu1 %6824  ;;  %v6810_v56 = vpop.permute.xlu0 %6809 }
 0x5f3   : > { %5957 = vmatmul.msk.f32.vlgmr.msrb.gmra.mxu2 %vm3359_vm10, %v8870_v24  ;;  %v6826_v53 = vunpack.i.l.bf16 %v8932_v54  ;;  %v6812_v2 = vunpack.i.h.bf16 %v6810_v56  ;;  %v6811_v55 = vunpack.i.l.bf16 %v6810_v56  ;;  %v8938_v31 = vpop.permute.xlu2 %3885  ;;  %v6827_v7 = vunpack.i.h.bf16 %v8932_v54 }
 0x5f4   : > { %v3643_v54 = vsel %vm709_vm3, %v6666_v19, %v10278_v57 }
 0x5f5   : > { %3597 = vmatpush.msrb.mxu1 %v6812_v2  ;;  %v3526_v30 = vsel %vm618_vm2, %v6792_v23, %v6811_v55  ;;  %v3527_v34 = vsel %vm618_vm2, %v6811_v55, %v6812_v2  ;;  %v3649_v24 = vsel %vm709_vm3, %v6797_v17, %v6826_v53  ;;  %v6831_v23 = vunpack.i.l.bf16 %v8919_v41 }
 0x5f6   : > { %3557 = vmatpush.msra.mxu3 %v3526_v30  ;;  %3577 = vmatpush.msra.mxu0 %v3527_v34  ;;  %v10276_v41 = vunpack.i.h.bf16 %v8488_v26  ;;  %v6717_v55 = vunpack.i.h.bf16 %v8688_v58  ;;  %v6696_v26 = vunpack.i.l.bf16 %v8650_v3  ;;  %v10279_v34 = vld [vmem:[#allocation7_spill] sm:$0xff] }
 0x5f7   : > { %3680 = vmatpush.msra.mxu2 %v3649_v24  ;;  %3598 = vmatpush.msrb.mxu1 %v6791_v60  ;;  %v3772_v30 = vsel %vm800_vm4, %v6831_v23, %v6832_v48  ;;  %v6677_v24 = vunpack.i.h.bf16 %v10279_v34  ;;  %v6662_v23 = vunpack.i.h.bf16 %v8540_v51 }
 0x5f8   : > { %3558 = vmatpush.msra.mxu3 %v3524_v40  ;;  %3578 = vmatpush.msra.mxu0 %v3525_v45  ;;  %v3520_v2 = vsel %vm618_vm2, %v6646_v35, %v10276_v41  ;;  %v3650_v35 = vsel %vm709_vm3, %v6826_v53, %v6827_v7  ;;  %v3648_v45 = vsel %vm709_vm3, %v6712_v16, %v6796_v37  ;;  %v10281_v16 = vunpack.i.l.bf16 %v10279_v34 }
 0x5f9   : > { %3681 = vmatpush.msra.mxu2 %v3647_v49  ;;  %3599 = vmatpush.msrb.mxu1 %v6657_v15  ;;  %v6721_v15 = vunpack.i.l.bf16 %v8683_v36  ;;  %v10285_v41 = vunpack.i.h.bf16 %v8633_v4  ;;  %v3642_v57 = vsel %vm709_vm3, %v6661_v18, %v6662_v23  ;;  %v6726_v34 = vunpack.i.l.bf16 %v8692_v6 }
 0x5fa   : > { %v8962_v60 = vpop.permute.xlu1 %6834  ;;  %v8964_v56 = vpop.permute.xlu0 %6814  ;;  %3559 = vmatpush.msra.mxu3 %v8549_v21  ;;  %3579 = vmatpush.msra.mxu0 %v3523_v59  ;;  %v10277_v21 = vld [vmem:[#allocation6_spill] sm:$0xff]  ;;  %v3646_v0 = vsel %vm709_vm3, %v10281_v16, %v6677_v24 }
 0x5fb   : > { %v8969_v17 = vpop.permute.xlu2 %6854  ;;  %3682 = vmatpush.msra.mxu2 %v8564_v33  ;;  %3600 = vmatpush.msrb.mxu1 %v10275_v47  ;;  %v3519_v33 = vsel %vm618_vm2, %v6641_v20, %v6642_v42  ;;  %v3770_v40 = vsel %vm800_vm4, %v6717_v55, %v6721_v15  ;;  %v6681_v20 = vunpack.i.l.bf16 %v8633_v4  ;;  %v6837_v36 = vunpack.i.h.bf16 %v8962_v60 }
 0x5fc   : > { %3560 = vmatpush.msra.mxu3 %v3520_v2  ;;  %3580 = vmatpush.msra.mxu0 %v10277_v21  ;;  %v3771_v55 = vsel %vm800_vm4, %v6721_v15, %v6722_v44  ;;  %v6692_v21 = vunpack.i.h.bf16 %v8646_v13  ;;  %v6737_v15 = vunpack.i.h.bf16 %v8760_v11 }
 0x5fd   : > { %3683 = vmatpush.msra.mxu2 %v3643_v54  ;;  %3601 = vmatpush.msrb.mxu1 %v6642_v42  ;;  %v10280_v42 = vunpack.i.h.bf16 %v8650_v3  ;;  %v5962_v3 = vld [vmem:[%s10171_s8 + $0x18] sm:$0xff]  ;;  %v3764_v2 = vsel %vm800_vm4, %v6681_v20, %v10285_v41  ;;  %v3896_v4 = vsel %vm891_vm5, %v6837_v36, %v8938_v31  ;;  %v6777_v20 = vunpack.i.h.bf16 %v8851_v27 }
 0x5fe   : > { %3561 = vmatpush.msra.mxu3 %v3518_v5  ;;  %3581 = vmatpush.msra.mxu0 %v3519_v33  ;;  %v6741_v33 = vunpack.i.l.bf16 %v8710_v61 }
 0x5ff   : > { %3684 = vmatpush.msra.mxu2 %v3641_v1  ;;  %3803 = vmatpush.msra.mxu1 %v3772_v30  ;;  %v3768_v53 = vsel %vm800_vm4, %v6696_v26, %v10280_v42  ;;  %v5966_v30 = vld [vmem:[%s10171_s8 + $0x20] sm:$0xff]  ;;  %v6782_v42 = vunpack.i.h.bf16 %v8838_v29 }
 0x600   : > { %3700 = vmatpush.msrb.mxu3 %v3650_v35  ;;  %3720 = vmatpush.msrb.mxu0 %v6827_v7  ;;  %v10283_v7 = vld [vmem:[#allocation8_spill] sm:$0xff]  ;;  %v10289_v35 = vunpack.i.l.bf16 %v8760_v11  ;;  %v10290_v11 = vunpack.i.h.bf16 %v8692_v6  ;;  %v6772_v6 = vunpack.i.h.bf16 %v8887_v52 }
 0x601   : > { %3804 = vmatpush.msra.mxu1 %v3770_v40  ;;  %5959 = vmatmul.msk.f32.vlgmr.msra.gmra.mxu3 %vm3359_vm10, %v5958_v12  ;;  %v10284_v47 = vunpack.i.l.bf16 %v10283_v7  ;;  %v10294_v7 = vld [vmem:[#allocation10_spill] sm:$0xff] }
 0x602   : > { %5960 = vmatmul.msk.f32.vlgmr.msra.gmra.mxu0 %vm3359_vm10, %v5958_v12  ;;  %3701 = vmatpush.msrb.mxu3 %v3648_v45  ;;  %v9002_v19 = vpop.permute.xlu1 %6849  ;;  %v3763_v49 = vpop.permute.xlu0 %3762 }
 0x603   : > { %3721 = vmatpush.msrb.mxu0 %v6796_v37  ;;  %v3773_v59 = vsel %vm800_vm4, %v6832_v48, %v3763_v49  ;;  %v9010_v38 = vpop.permute.xlu2 %6859  ;;  %3805 = vmatpush.msra.mxu1 %v3768_v53  ;;  %v6836_v48 = vunpack.i.l.bf16 %v8962_v60  ;;  %v6751_v60 = vunpack.i.l.bf16 %v8789_v10  ;;  %v6781_v53 = vunpack.i.l.bf16 %v8838_v29 }
 0x604   : > { %3702 = vmatpush.msrb.mxu3 %v3646_v0  ;;  %3823 = vmatpush.msrb.mxu2 %v3773_v59  ;;  %v6861_v16 = vunpack.i.l.bf16 %v9010_v38 }
 0x605   : > { %3722 = vmatpush.msrb.mxu0 %v6677_v24  ;;  %3806 = vmatpush.msra.mxu1 %v8655_v46  ;;  %v6752_v46 = vunpack.i.h.bf16 %v8789_v10  ;;  %v3895_v54 = vsel %vm891_vm5, %v6836_v48, %v6837_v36  ;;  %v6747_v10 = vunpack.i.h.bf16 %v8708_v63  ;;  %v10288_v24 = vunpack.i.l.bf16 %v8688_v58 }
 0x606   : > { %5961 = vmatmul.msk.f32.vlgmr.msrb.gmra.mxu1 %vm3359_vm10, %v5958_v12  ;;  %5963 = vmatmul.msk.f32.vlgmr.msra.gmra.mxu2 %vm3359_vm10, %v5962_v3  ;;  %v4016_v0 = vsel %vm982_vm6, %v6777_v20, %v6781_v53  ;;  %v6822_v48 = vunpack.i.h.bf16 %v8914_v28 }
 0x607   : > { %3703 = vmatpush.msrb.mxu3 %v10282_v25  ;;  %3723 = vmatpush.msrb.mxu0 %v10284_v47  ;;  %v3894_v18 = vsel %vm891_vm5, %v6751_v60, %v6752_v46  ;;  %v3893_v1 = vsel %vm891_vm5, %v6747_v10, %v6751_v60  ;;  %v10295_v47 = vunpack.i.l.bf16 %v10294_v7 }
 0x608   : > { %3807 = vmatpush.msra.mxu1 %v3764_v2  ;;  %3824 = vmatpush.msrb.mxu2 %v3771_v55  ;;  %v10296_v2 = vld [vmem:[#allocation14_spill] sm:$0xff]  ;;  %v4141_v60 = vsel %vm1073_vm7, %v6822_v48, %v6861_v16 }
 0x609   : > { %3704 = vmatpush.msrb.mxu3 %v3642_v57  ;;  %3724 = vmatpush.msrb.mxu0 %v6662_v23  ;;  %v6756_v55 = vunpack.i.l.bf16 %v10296_v2  ;;  %v6852_v57 = vunpack.i.h.bf16 %v9002_v19 }
 0x60a   : > { %3946 = vmatpush.msrb.mxu1 %v3896_v4  ;;  %3825 = vmatpush.msrb.mxu2 %v8703_v9  ;;  %v4009_v37 = vpop.permute.xlu1 %4008  ;;  %v6840_v5 = vpop.permute.xlu0 %6839  ;;  %v10286_v9 = vunpack.i.l.bf16 %v8646_v13  ;;  %v10287_v13 = vunpack.i.h.bf16 %v8710_v61  ;;  %v6862_v4 = vunpack.i.h.bf16 %v9010_v38  ;;  %v10299_v38 = vld [vmem:[#allocation13_spill] sm:$0xff] }
 0x60b   : > { %3843 = vmatpush.msra.mxu3 %v3763_v49  ;;  %3926 = vmatpush.msra.mxu0 %v3895_v54  ;;  %v9043_v51 = vpop.permute.xlu2 %6864  ;;  %v6842_v40 = vunpack.i.h.bf16 %v6840_v5  ;;  %v6841_v45 = vunpack.i.l.bf16 %v6840_v5  ;;  %v3887_v49 = vsel %vm891_vm5, %v6726_v34, %v10290_v11  ;;  %v10298_v5 = vld [vmem:[#allocation19_spill] sm:$0xff]  ;;  %v6857_v34 = vunpack.i.h.bf16 %v8969_v17 }
 0x60c   : > { %5964 = vmatmul.msk.f32.vlgmr.msrb.gmra.mxu3 %vm3359_vm10, %v5962_v3  ;;  %5965 = vmatmul.msk.f32.vlgmr.msrb.gmra.mxu0 %vm3359_vm10, %v5962_v3  ;;  %v3767_v26 = vsel %vm800_vm4, %v10286_v9, %v6692_v21  ;;  %v3891_v12 = vsel %vm891_vm5, %v6741_v33, %v10287_v13  ;;  %v10293_v3 = vld [vmem:[#allocation15_spill] sm:$0xff]  ;;  %v6856_v9 = vunpack.i.l.bf16 %v8969_v17  ;;  %v6806_v13 = vunpack.i.l.bf16 %v8890_v43 }
 0x60d   : > { %3947 = vmatpush.msrb.mxu1 %v3894_v18  ;;  %3826 = vmatpush.msrb.mxu2 %v3767_v26  ;;  %v4018_v29 = vsel %vm982_vm6, %v6841_v45, %v6842_v40  ;;  %v4019_v59 = vsel %vm982_vm6, %v6842_v40, %v4009_v37  ;;  %v6767_v23 = vunpack.i.h.bf16 %v10293_v3  ;;  %v10297_v54 = vunpack.i.l.bf16 %v10293_v3  ;;  %v5974_v33 = vld [vmem:[%s10171_s8 + $0x30] sm:$0xff] }
 0x60e   : > { %3844 = vmatpush.msra.mxu3 %v6722_v44  ;;  %3927 = vmatpush.msra.mxu0 %v3893_v1  ;;  %v10292_v44 = vunpack.i.l.bf16 %v8708_v63  ;;  %v6817_v18 = vunpack.i.h.bf16 %v8964_v56  ;;  %v10300_v26 = vunpack.i.l.bf16 %v10299_v38  ;;  %v6807_v40 = vunpack.i.h.bf16 %v8890_v43  ;;  %v5978_v43 = vld [vmem:[%s10171_s8 + $0x38] sm:$0xff] }
 0x60f   : > { %3948 = vmatpush.msrb.mxu1 %v8727_v8  ;;  %3827 = vmatpush.msrb.mxu2 %v8644_v14  ;;  %v3890_v8 = vsel %vm891_vm5, %v10289_v35, %v6737_v15  ;;  %v4137_v35 = vsel %vm1073_vm7, %v6852_v57, %v6856_v9 }
 0x610   : > { %3845 = vmatpush.msra.mxu3 %v10288_v24  ;;  %3928 = vmatpush.msra.mxu0 %v3891_v12  ;;  %v10302_v12 = vld [vmem:[#allocation18_spill] sm:$0xff]  ;;  %v6851_v24 = vunpack.i.l.bf16 %v9002_v19 }
 0x611   : > { %5967 = vmatmul.msk.f32.vlgmr.msra.gmra.mxu1 %vm3359_vm10, %v5966_v30  ;;  %5968 = vmatmul.msk.f32.vlgmr.msrb.gmra.mxu2 %vm3359_vm10, %v5966_v30 }
 0x612   : > { %3949 = vmatpush.msrb.mxu1 %v3890_v8  ;;  %3966 = vmatpush.msra.mxu2 %v8938_v31  ;;  %v9070_v14 = vpop.permute.xlu1 %6874  ;;  %v9072_v61 = vpop.permute.xlu0 %6844  ;;  %v5970_v31 = vld [vmem:[%s10171_s8 + $0x28] sm:$0xff]  ;;  %v4142_v8 = vsel %vm1073_vm7, %v6861_v16, %v6862_v4 }
 0x613   : > { %3846 = vmatpush.msra.mxu3 %v6692_v21  ;;  %3929 = vmatpush.msra.mxu0 %v8774_v39  ;;  %v9075_v58 = vpop.permute.xlu2 %6884  ;;  %v10291_v39 = vunpack.i.l.bf16 %v8635_v62  ;;  %v6776_v62 = vunpack.i.l.bf16 %v8851_v27  ;;  %v6847_v27 = vunpack.i.h.bf16 %v9072_v61  ;;  %v6846_v25 = vunpack.i.l.bf16 %v9072_v61 }
 0x614   : > { %3950 = vmatpush.msrb.mxu1 %v8783_v22  ;;  %3967 = vmatpush.msra.mxu2 %v6752_v46  ;;  %v6771_v22 = vunpack.i.l.bf16 %v8887_v52  ;;  %v4017_v52 = vsel %vm982_vm6, %v6781_v53, %v6782_v42  ;;  %v6877_v17 = vunpack.i.h.bf16 %v9070_v14  ;;  %v6876_v19 = vunpack.i.l.bf16 %v9070_v14 }
 0x615   : > { %3847 = vmatpush.msra.mxu3 %v10291_v39  ;;  %3930 = vmatpush.msra.mxu0 %v3887_v49  ;;  %v4015_v21 = vsel %vm982_vm6, %v6772_v6, %v6776_v62  ;;  %v4139_v10 = vsel %vm1073_vm7, %v6846_v25, %v6847_v27  ;;  %v4140_v11 = vsel %vm1073_vm7, %v6847_v27, %v6851_v24  ;;  %v6866_v14 = vunpack.i.l.bf16 %v9043_v51 }
 0x616   : > { %4089 = vmatpush.msra.mxu1 %v4009_v37  ;;  %5969 = vmatmul.msk.f32.vlgmr.msra.gmra.mxu3 %vm3359_vm10, %v5966_v30  ;;  %v4014_v41 = vsel %vm982_vm6, %v6771_v22, %v6772_v6  ;;  %v4013_v37 = vsel %vm982_vm6, %v10297_v54, %v6767_v23  ;;  %v6821_v30 = vunpack.i.l.bf16 %v8914_v28  ;;  %v4133_v49 = vsel %vm1073_vm7, %v6806_v13, %v6807_v40 }
 0x617   : > { %5971 = vmatmul.msk.f32.vlgmr.msra.gmra.mxu0 %vm3359_vm10, %v5970_v31  ;;  %3968 = vmatpush.msra.mxu2 %v10292_v44  ;;  %v4138_v53 = vsel %vm1073_vm7, %v6856_v9, %v6857_v34  ;;  %v6887_v44 = vunpack.i.h.bf16 %v9075_v58 }
 0x618   : > { %4049 = vmatpush.msrb.mxu3 %v4018_v29  ;;  %4069 = vmatpush.msrb.mxu0 %v4019_v59  ;;  %v4135_v45 = vsel %vm1073_vm7, %v6817_v18, %v6821_v30  ;;  %v6886_v29 = vunpack.i.l.bf16 %v9075_v58 }
 0x619   : > { %4090 = vmatpush.msra.mxu1 %v6782_v42  ;;  %3969 = vmatpush.msra.mxu2 %v6737_v15  ;;  %v10301_v15 = vunpack.i.h.bf16 %v10296_v2  ;;  %v6867_v42 = vunpack.i.h.bf16 %v9043_v51 }
 0x61a   : > { %4050 = vmatpush.msrb.mxu3 %v4016_v0  ;;  %4070 = vmatpush.msrb.mxu0 %v4017_v52  ;;  %v9102_v63 = vpop.permute.xlu1 %6879  ;;  %v9104_v36 = vpop.permute.xlu0 %4113  ;;  %v4257_v25 = vsel %vm1164_vm8, %v6886_v29, %v6887_v44 }
 0x61b   : > { %4091 = vmatpush.msra.mxu1 %v6776_v62  ;;  %3970 = vmatpush.msra.mxu2 %v10295_v47  ;;  %v9115_v46 = vpop.permute.xlu2 %4226  ;;  %v4010_v1 = vsel %vm982_vm6, %v6756_v55, %v10301_v15  ;;  %v4136_v22 = vsel %vm1073_vm7, %v6821_v30, %v9104_v36  ;;  %v6882_v51 = vunpack.i.h.bf16 %v9102_v63  ;;  %v4263_v59 = vsel %vm1164_vm8, %v6866_v14, %v6867_v42 }
 0x61c   : > { %5972 = vmatmul.msk.f32.vlgmr.msrb.gmra.mxu1 %vm3359_vm10, %v5970_v31  ;;  %4051 = vmatpush.msrb.mxu3 %v4014_v41  ;;  %v6881_v52 = vunpack.i.l.bf16 %v9102_v63  ;;  %v5982_v41 = vld [vmem:[%s10171_s8 + $0x40] sm:$0xff]  ;;  %v4256_v54 = vsel %vm1164_vm8, %v9115_v46, %v6886_v29 }
 0x61d   : > { %4071 = vmatpush.msrb.mxu0 %v4015_v21  ;;  %5973 = vmatmul.msk.f32.vlgmr.msra.gmra.mxu2 %vm3359_vm10, %v5970_v31  ;;  %v6816_v31 = vunpack.i.l.bf16 %v8964_v56  ;;  %v4265_v56 = vsel %vm1164_vm8, %v6876_v19, %v6877_v17 }
 0x61e   : > { %4092 = vmatpush.msra.mxu1 %v6767_v23  ;;  %4172 = vmatpush.msrb.mxu2 %v4141_v60 }
 0x61f   : > { %4052 = vmatpush.msrb.mxu3 %v10298_v5  ;;  %4072 = vmatpush.msrb.mxu0 %v4013_v37  ;;  %v4134_v62 = vsel %vm1073_vm7, %v6807_v40, %v6816_v31 }
 0x620   : > { %4093 = vmatpush.msra.mxu1 %v10300_v26  ;;  %4173 = vmatpush.msrb.mxu2 %v4139_v10 }
 0x621   : > { %4053 = vmatpush.msrb.mxu3 %v4010_v1  ;;  %4073 = vmatpush.msrb.mxu0 %v10302_v12 }
 0x622   : > { %5975 = vmatmul.msk.f32.vlgmr.msrb.gmra.mxu3 %vm3359_vm10, %v5974_v33  ;;  %5976 = vmatmul.msk.f32.vlgmr.msrb.gmra.mxu0 %vm3359_vm10, %v5974_v33  ;;  %v9145_v61 = vpop.permute.xlu1 %6894  ;;  %v9147_v28 = vpop.permute.xlu0 %6869 }
 0x623   : > { %4174 = vmatpush.msrb.mxu2 %v4137_v35  ;;  %4192 = vmatpush.msra.mxu3 %v4142_v8  ;;  %v9163_v20 = vpop.permute.xlu2 %6904  ;;  %v6872_v39 = vunpack.i.h.bf16 %v9147_v28  ;;  %v6871_v6 = vunpack.i.l.bf16 %v9147_v28  ;;  %v6896_v58 = vunpack.i.l.bf16 %v9145_v61  ;;  %v6897_v63 = vunpack.i.h.bf16 %v9145_v61 }
 0x624   : > { %4212 = vmatpush.msra.mxu0 %v6862_v4  ;;  %5977 = vmatmul.msk.f32.vlgmr.msra.gmra.mxu1 %vm3359_vm10, %v5974_v33 }
 0x625   : > { %4175 = vmatpush.msrb.mxu2 %v4135_v45  ;;  %4193 = vmatpush.msra.mxu3 %v4140_v11  ;;  %v4261_v3 = vsel %vm1164_vm8, %v6871_v6, %v6872_v39  ;;  %v4260_v2 = vsel %vm1164_vm8, %v6896_v58, %v6871_v6  ;;  %v4258_v4 = vsel %vm1164_vm8, %v6897_v63, %v6881_v52 }
 0x626   : > { %4213 = vmatpush.msra.mxu0 %v6851_v24 }
 0x627   : > { %4176 = vmatpush.msrb.mxu2 %v4133_v49  ;;  %4194 = vmatpush.msra.mxu3 %v4138_v53 }
 0x628   : > { %4214 = vmatpush.msra.mxu0 %v6857_v34  ;;  %5979 = vmatmul.msk.f32.vlgmr.msrb.gmra.mxu2 %vm3359_vm10, %v5978_v43 }
 0x629   : > { %4315 = vmatpush.msra.mxu2 %v4265_v56  ;;  %4195 = vmatpush.msra.mxu3 %v4136_v22 }
 0x62a   : > { %4215 = vmatpush.msra.mxu0 %v9104_v36  ;;  %v9177_v16 = vpop.permute.xlu1 %6899  ;;  %v6890_v0 = vpop.permute.xlu0 %6889  ;;  %v4259_v36 = vsel %vm1164_vm8, %v6881_v52, %v6882_v51 }
 0x62b   : > { %4316 = vmatpush.msra.mxu2 %v4263_v59  ;;  %4196 = vmatpush.msra.mxu3 %v4134_v62  ;;  %v6892_v23 = vunpack.i.h.bf16 %v6890_v0  ;;  %v6891_v48 = vunpack.i.l.bf16 %v6890_v0  ;;  %v9189_v47 = vpop.permute.xlu2 %6919 }
 0x62c   : > { %4216 = vmatpush.msra.mxu0 %v6816_v31  ;;  %5980 = vmatmul.msk.f32.vlgmr.msra.gmra.mxu3 %vm3359_vm10, %v5978_v43  ;;  %v10229_v60 = vunpack.i.l.bf16 %v9189_v47  ;;  %v6922_v33 = vunpack.i.h.bf16 %v9189_v47 }
 0x62d   : > { %5981 = vmatmul.msk.f32.vlgmr.msra.gmra.mxu0 %vm3359_vm10, %v5978_v43  ;;  %4335 = vmatpush.msrb.mxu3 %v6877_v17  ;;  %v4264_v27 = vsel %vm1164_vm8, %v6891_v48, %v6876_v19  ;;  %v4262_v7 = vsel %vm1164_vm8, %v6892_v23, %v6866_v14 }
 0x62e   : > { %4317 = vmatpush.msra.mxu2 %v4261_v3  ;;  %4295 = vmatpush.msrb.mxu1 %v4264_v27 }
 0x62f   : > { %4336 = vmatpush.msrb.mxu3 %v6867_v42 }
 0x630   : > { %4318 = vmatpush.msra.mxu2 %v4259_v36  ;;  %4296 = vmatpush.msrb.mxu1 %v4262_v7 }
 0x631   : > { %4337 = vmatpush.msrb.mxu3 %v6872_v39 }
 0x632   : > { %4319 = vmatpush.msra.mxu2 %v4257_v25  ;;  %v9195_v55 = vpop.permute.xlu1 %6914  ;;  %v9197_v21 = vpop.permute.xlu0 %4350  ;;  %4297 = vmatpush.msrb.mxu1 %v4260_v2 }
 0x633   : > { %4338 = vmatpush.msrb.mxu3 %v6882_v51  ;;  %5984 = vmatmul.msk.f32.vlgmr.msra.gmra.mxu2 %vm3359_vm10, %v5982_v41  ;;  %v10228_v57 = vunpack.i.h.bf16 %v9195_v55 }
 0x634   : > { %4298 = vmatpush.msrb.mxu1 %v4258_v4 }
 0x635   : > { %4339 = vmatpush.msrb.mxu3 %v6887_v44  ;;  %v9210_v37 = vsel %vm466_vm1, %v10228_v57, %v10229_v60 }
 0x636   : > { %5985 = vmatmul.msk.f32.vlgmr.msrb.gmra.mxu3 %vm3359_vm10, %v5982_v41  ;;  %4299 = vmatpush.msrb.mxu1 %v4256_v54 }
 0x637   : > { %5983 = vmatmul.msk.f32.vlgmr.msrb.gmra.mxu1 %vm3359_vm10, %v5982_v41 }
 0x63a   : > { %v9214_v5 = vpop.permute.xlu0 %6909 }
 0x640   : > { %v3443_v15 = vpop.f32.mrf.mxu0 }
 0x642   : > { %v9216_v10 = vpop.permute.xlu0 %6924 }
 0x643   : > { %v10230_v46 = vunpack.i.l.bf16 %v9216_v10 }
 0x645   : > { %v9223_v18 = vsel %vm466_vm1, %v6922_v33, %v10230_v46 }
 0x665   : > { %v3380_v9 = vpop.f32.mrf.mxu1 }
 0x666   : > { %v3444_v17 = vadd.f32 %v3443_v15, %v3380_v9 }
 0x66a   : > { %v3420_v26 = vpop.f32.mrf.mxu3 }
 0x66c   : > { %v3400_v38 = vpop.f32.mrf.mxu2 }
 0x66f   : > { %v3463_v1 = vpop.f32.mrf.mxu1 }
 0x670   : > { %v3464_v19 = vadd.f32 %v3463_v1, %v3400_v38 }
 0x676   : > { %v3483_v30 = vpop.f32.mrf.mxu2 }
 0x677   : > { %v3484_v14 = vadd.f32 %v3483_v30, %v3420_v26 }
 0x67f   : > { %v3583_v12 = vpop.f32.mrf.mxu0 }
 0x680   : > { %v3607_v43 = vadd.f32 %v3583_v12, %v3464_v19 }
 0x683   : > { %v3603_v34 = vpop.f32.mrf.mxu1 }
 0x684   : > { %v3563_v13 = vpop.f32.mrf.mxu3  ;;  %v3608_v6 = vadd.f32 %v3603_v34, %v3484_v14 }
 0x685   : > { %v3606_v31 = vadd.f32 %v3563_v13, %v3444_v17 }
 0x689   : > { %v3686_v24 = vpop.f32.mrf.mxu2  ;;  %v3726_v8 = vpop.f32.mrf.mxu0 }
 0x68a   : > { %v3729_v53 = vadd.f32 %v3686_v24, %v3606_v31  ;;  %v3731_v29 = vadd.f32 %v3726_v8, %v3608_v6 }
 0x68e   : > { %v3809_v61 = vpop.f32.mrf.mxu1 }
 0x68f   : > { %v3706_v35 = vpop.f32.mrf.mxu3  ;;  %v3852_v51 = vadd.f32 %v3809_v61, %v3729_v53 }
 0x690   : > { %v3730_v39 = vadd.f32 %v3706_v35, %v3607_v43 }
 0x694   : > { %v3829_v28 = vpop.f32.mrf.mxu2  ;;  %v3932_v45 = vpop.f32.mrf.mxu0 }
 0x695   : > { %v3853_v44 = vadd.f32 %v3829_v28, %v3730_v39  ;;  %v3975_v62 = vadd.f32 %v3932_v45, %v3852_v51  ;;  %v10305_v39 = vld [vmem:[#allocation5_spill] sm:$0xff] }
 0x699   : > { %v3849_v40 = vpop.f32.mrf.mxu3  ;;  %v3952_v11 = vpop.f32.mrf.mxu1 }
 0x69a   : > { %v3854_v52 = vadd.f32 %v3849_v40, %v3731_v29  ;;  %v3976_v3 = vadd.f32 %v3952_v11, %v3853_v44  ;;  %v10306_v44 = vld [vmem:[#allocation17_spill] sm:$0xff]  ;;  %v10307_v29 = vld [vmem:[#allocation16_spill] sm:$0xff] }
 0x69f   : > { %v4075_v56 = vpop.f32.mrf.mxu0 }
 0x6a0   : > { %v3972_v49 = vpop.f32.mrf.mxu2  ;;  %v4099_v58 = vadd.f32 %v4075_v56, %v3976_v3  ;;  %v9234_v56 = vld [vmem:[#allocation2 + $0x60] sm:$0xff] }
 0x6a1   : > { %v4095_v22 = vpop.f32.mrf.mxu1  ;;  %v3977_v48 = vadd.f32 %v3972_v49, %v3854_v52  ;;  %v10303_v49 = vld [vmem:[#allocation3_spill] sm:$0xff]  ;;  %v9266_v52 = vld [vmem:[#allocation2 + $0x8] sm:$0xff] }
 0x6a3   : > { %v4100_v41 = vadd.f32 %v4095_v22, %v3977_v48  ;;  %v9236_v22 = vld [vmem:[#allocation2 + $0x68] sm:$0xff]  ;;  %v9278_v48 = vld [vmem:[#allocation2 + $0x38] sm:$0xff] }
 0x6a4   : > { %v9240_v51 = vpack.i.bf16 %v9236_v22, %v9234_v56 }
 0x6a5   : > { %v4055_v42 = vpop.f32.mrf.mxu3 }
 0x6a6   : > { %v4098_v23 = vadd.f32 %v4055_v42, %v3975_v62  ;;  %v10304_v42 = vld [vmem:[#allocation4_spill] sm:$0xff] }
 0x6a7   : > { %v10309_v62 = vld [vmem:[#allocation12_spill] sm:$0xff] }
 0x6aa   : > { %v4218_v63 = vpop.f32.mrf.mxu0 }
 0x6ab   : > { %v4178_v59 = vpop.f32.mrf.mxu2  ;;  %v4223_v33 = vadd.f32 %v4218_v63, %v4100_v41  ;;  %v9300_v63 = vpop.permute.xlu2 %6934 }
 0x6ac   : > { %v4221_v36 = vadd.f32 %v4178_v59, %v4098_v23  ;;  %v10308_v59 = vld [vmem:[#allocation11_spill] sm:$0xff]  ;;  %v10219_v41 = vunpack.i.l.bf16 %v9300_v63 }
 0x6ad   : > { %v9276_v23 = vld [vmem:[#allocation2 + $0x30] sm:$0xff] }
 0x6af   : > { %v4198_v0 = vpop.f32.mrf.mxu3 }
 0x6b0   : > { %v4222_v25 = vadd.f32 %v4198_v0, %v4099_v58  ;;  %v9264_v0 = vld [vmem:[#allocation2] sm:$0xff]  ;;  %v10226_v58 = vunpack.i.l.bf16 %v9163_v20 }
 0x6b1   : > { %v9270_v3 = vpack.i.bf16 %v9266_v52, %v9264_v0 }
 0x6b4   : > { %v4301_v27 = vpop.f32.mrf.mxu1 }
 0x6b5   : > { %v4344_v7 = vadd.f32 %v4301_v27, %v4221_v36  ;;  %v10223_v36 = vunpack.i.h.bf16 %v9177_v16  ;;  %v6907_v27 = vunpack.i.h.bf16 %v9163_v20 }
 0x6b6   : > { %v4321_v2 = vpop.f32.mrf.mxu2 }
 0x6b7   : > { %v4345_v4 = vadd.f32 %v4321_v2, %v4222_v25  ;;  %v4353_v54 = vadd.f32 %v9197_v21, %v4344_v7  ;;  %v9302_v25 = vpop.permute.xlu1 %6929  ;;  %v10227_v7 = vunpack.i.l.bf16 %v9214_v5 }
 0x6b8   : > { %v10220_v2 = vunpack.i.h.bf16 %v9302_v25 }
 0x6b9   : > { %v4354_v9 = vadd.f32 %v9197_v21, %v4345_v4  ;;  %v4341_v38 = vpop.f32.mrf.mxu3  ;;  %v4356_v26 = vmin.f32 %v4353_v54, 0.0  ;;  %vm4371_vm15 = vcmp.gt.f32.partialorder %v4353_v54, 0.0  ;;  %v10310_v4 = vld [vmem:[#allocation20_spill] sm:$0xff] }
 0x6ba   : > { %v4346_v15 = vadd.f32 %v4341_v38, %v4223_v33  ;;  %v9312_v33 = vsel %vm466_vm1, %v6907_v27, %v10227_v7  ;;  %v10311_v38 = vld [vmem:[#allocation21_spill] sm:$0xff]  ;;  %v9392_v27 = vld [vmem:[#allocation2 + $0x48] sm:$0xff] }
 0x6bb   : > { %v4357_v1 = vmin.f32 %v4354_v9, 0.0  ;;  %v4359_v30 = vmul.f32 1.442695, %v4356_v26  ;;  %vm4372_vm0 = vcmp.gt.f32.partialorder %v4354_v9, 0.0  ;;  %v7068_v26 = vpack.i.bf16 %v10310_v4, %v10311_v38  ;;  %v9469_v7 = vld [vmem:[#allocation2 + $0x28] sm:$0xff] }
 0x6bc   : > { %v4355_v13 = vadd.f32 %v9197_v21, %v4346_v15  ;;  %v9325_v15 = vpop.permute.xlu0 %6939 }
 0x6bd   : > { %v4361_v12 = vmul.f32 1.442695, %v4357_v1  ;;  %7277 = vpow2.f32 %v4359_v30  ;;  %v6937_v1 = vunpack.i.h.bf16 %v9300_v63  ;;  %v10222_v30 = vunpack.i.l.bf16 %v9325_v15 }
 0x6be   : > { %v4358_v34 = vmin.f32 %v4355_v13, 0.0  ;;  %vm4373_vm9 = vcmp.gt.f32.partialorder %v4355_v13, 0.0 }
 0x6bf   : > { %7279 = vpow2.f32 %v4361_v12  ;;  %v9331_v12 = vld [vmem:[#allocation2 + $0x18] sm:$0xff] }
 0x6c0   : > { %v4363_v24 = vmul.f32 1.442695, %v4358_v34 }
 0x6c2   : > { %7281 = vpow2.f32 %v4363_v24  ;;  %v9340_v24 = vsel %vm618_vm2, %v6937_v1, %v10222_v30  ;;  %v7053_v1 = vpack.i.bf16 %v9392_v27, %v9236_v22 }
 0x6c3   : > { %v7278_v35 = vpop.eup %7277 }
 0x6c4   : > { %v5986_v8 = vadd.f32 -1.0, %v7278_v35  ;;  %v9344_v35 = vld [vmem:[#allocation2 + $0x70] sm:$0xff] }
 0x6c5   : > { %v7280_v61 = vpop.eup %7279 }
 0x6c6   : > { %v5987_v28 = vadd.f32 -1.0, %v7280_v61  ;;  %v4368_v40 = vmul.f32 0.2, %v5986_v8  ;;  %v9346_v8 = vld [vmem:[#allocation2 + $0x10] sm:$0xff] }
 0x6c7   : > { %v7043_v61 = vpack.i.bf16 %v9331_v12, %v9346_v8 }
 0x6c8   : > { %v7282_v17 = vpop.eup %7281  ;;  %v4369_v19 = vmul.f32 0.2, %v5987_v28  ;;  %v4374_v45 = vsel %vm4371_vm15, %v4353_v54, %v4368_v40  ;;  %v7058_v54 = vpack.i.bf16 %v9276_v23, %v10310_v4  ;;  %v7138_v28 = vpack.i.bf16 %v9344_v35, %v9236_v22  ;;  %v9353_v40 = vpop.permute.xlu1 %6944 }
 0x6c9   : > { %v5988_v11 = vadd.f32 -1.0, %v7282_v17  ;;  %v4377_v43 = vmul.f32 %v4374_v45, %v10303_v49  ;;  %v9356_v17 = vpop.permute.xlu2 %6949 }
 0x6ca   : > { %v4375_v21 = vsel %vm4372_vm0, %v4354_v9, %v4369_v19  ;;  %v9319_v9 = vsel %vm618_vm2, %v10220_v2, %v10219_v41  ;;  %v9433_v41 = vld [vmem:[#allocation2 + $0x58] sm:$0xff] }
 0x6cb   : > { %v4370_v31 = vmul.f32 0.2, %v5988_v11  ;;  %v4378_v14 = vmul.f32 %v4375_v21, %v10304_v42  ;;  %4383 = vrot.lane.b32.xlu1 %v4377_v43, %s7332_s18  ;;  %v9360_v11 = vpop.permute.xlu0 %6954  ;;  %v7103_v2 = vpack.i.bf16 %v9433_v41, %v9344_v35 }
 0x6cd   : > { %v4376_v53 = vsel %vm4373_vm9, %v4355_v13, %v4370_v31  ;;  %4385 = vrot.lane.b32.xlu2 %v4378_v14, %s7332_s18  ;;  %v9329_v13 = vld [vmem:[#allocation2 + $0x20] sm:$0xff] }
 0x6ce   : > { %v4379_v6 = vmul.f32 %v4376_v53, %v10305_v39  ;;  %v9335_v34 = vpack.i.bf16 %v9329_v13, %v9331_v12 }
 0x6d0   : > { %4387 = vrot.lane.b32.xlu0 %v4379_v6, %s7332_s18  ;;  %v9358_v19 = vpop.permute.xlu1 %6959 }
 0x6d3   : > { %6964 = vrot.lane.b32.xlu1 %v9240_v51, %s7324_s28 }
 0x6d5   : > { %6974 = vrot.lane.b32.xlu2 %v10306_v44, %s7325_s29 }
 0x6d8   : > { %6979 = vrot.lane.b32.xlu0 %v10307_v29, %s7325_s29 }
 0x6db   : > { %6969 = vrot.lane.b32.xlu1 %v10308_v59, %s7325_s29 }
 0x6dd   : > { %6989 = vrot.lane.b32.xlu2 %v8849_v32, %s7325_s29 }
 0x6e0   : > { %6994 = vrot.lane.b32.xlu0 %v8846_v50, %s7325_s29 }
 0x6e3   : > { %6984 = vrot.lane.b32.xlu1 %v10309_v62, %s7325_s29 }
 0x6e5   : > { %7009 = vrot.lane.b32.xlu2 %v10306_v44, %s7326_s30 }
 0x6e8   : > { %7014 = vrot.lane.b32.xlu0 %v10307_v29, %s7326_s30  ;;  %v9382_v29 = vld [vmem:[#allocation2 + $0x40] sm:$0xff] }
 0x6e9   : > { %v7173_v59 = vpack.i.bf16 %v9382_v29, %v9278_v48  ;;  %v7123_v57 = vpack.i.bf16 %v9469_v7, %v9382_v29 }
 0x6eb   : > { %6999 = vrot.lane.b32.xlu1 %v9240_v51, %s7325_s29 }
 0x6ed   : > { %7024 = vrot.lane.b32.xlu2 %v8849_v32, %s7326_s30  ;;  %v9282_v32 = vpack.i.bf16 %v9278_v48, %v9276_v23 }
 0x6f0   : > { %7029 = vrot.lane.b32.xlu0 %v8846_v50, %s7326_s30  ;;  %v9293_v50 = vsel %vm466_vm1, %v10223_v36, %v10226_v58 }
 0x6f3   : > { %7004 = vrot.lane.b32.xlu1 %v9270_v3, %s7326_s30 }
 0x6f5   : > { %7044 = vrot.lane.b32.xlu2 %v7043_v61, %s7327_s13 }
 0x6fb   : > { %7019 = vrot.lane.b32.xlu1 %v9282_v32, %s7326_s30 }
 0x703   : > { %7034 = vrot.lane.b32.xlu1 %v9240_v51, %s7326_s30 }
 0x70b   : > { %7039 = vrot.lane.b32.xlu1 %v9270_v3, %s7327_s13 }
 0x713   : > { %7059 = vrot.lane.b32.xlu1 %v7058_v54, %s7327_s13 }
 0x71b   : > { %7069 = vrot.lane.b32.xlu1 %v7068_v26, %s7328_s14 }
 0x723   : > { %7109 = vrot.lane.b32.xlu1 %v9335_v34, %s7328_s14 }
 0x727   : > { %v4386_v45 = vpop.permute.xlu2 %4385 }
 0x72b   : > { %7139 = vrot.lane.b32.xlu1 %v7138_v28, %s7329_s15 }
 0x72f   : > { %v9369_v31 = vpop.permute.xlu2 %6974 }
 0x737   : > { %v9397_v54 = vpop.permute.xlu2 %6989 }
 0x73d   : > { %v4384_v49 = vpop.permute.xlu1 %4383 }
 0x73e   : > { %v9363_v43 = vsel %vm1290_vm12, %v4384_v49, %v4386_v45  ;;  %4394 = vst.msk [vmem:[#allocation2 + $0x78] sm:$0xff] %vm1296_vm13, %v4384_v49 }
 0x73f   : > { %v7153_v21 = vpack.i.bf16 %v9234_v56, %v9363_v43 }
 0x741   : > { %7154 = vrot.lane.b32.xlu1 %v7153_v21, %s7327_s13 }
 0x742   : > { %v4388_v42 = vpop.permute.xlu0 %4387 }
 0x743   : > { %v4390_v14 = vsel %vm1290_vm12, %v4386_v45, %v4388_v42  ;;  %v6992_v45 = vunpack.i.h.bf16 %v9397_v54  ;;  %v7193_v42 = vpack.i.bf16 %v9346_v8, %v9266_v52  ;;  %vm4504_vm12 = vcmask 392192  }
 0x744   : > { %4396 = vst.msk [vmem:[#allocation2 + $0x88] sm:$0xff] %vm1299_vm14, %v4390_v14 }
 0x745   : > { %v9373_v53 = vpop.permute.xlu1 %6964  ;;  %v9375_v39 = vld [vmem:[#allocation2 + $0x78] sm:$0xff] }
 0x746   : > { %4596 = vmatpush.msra.mxu3 %v9375_v39  ;;  %v7093_v6 = vpack.i.bf16 %v9375_v39, %v9329_v13  ;;  %v7048_v44 = vpack.i.bf16 %v9375_v39, %v9344_v35 }
 0x748   : > { %4597 = vmatpush.msra.mxu3 %v9234_v56  ;;  %7094 = vrot.lane.b32.xlu0 %v7093_v6, %s7327_s13  ;;  %v10224_v6 = vunpack.i.l.bf16 %v9397_v54 }
 0x749   : > { %7049 = vrot.lane.b32.xlu2 %v7048_v44, %s7323_s27  ;;  %7174 = vrot.lane.b32.xlu1 %v7173_v59, %s7329_s15  ;;  %v9430_v59 = vpop.permute.xlu2 %7009 }
 0x74a   : > { %v9390_v62 = vpop.permute.xlu0 %6979  ;;  %4598 = vmatpush.msra.mxu3 %v9392_v27  ;;  %10312 = vst [vmem:[#allocation6_spill] sm:$0xff] %v9430_v59 }
 0x74b   : > { %v9395_v4 = vld [vmem:[#allocation2 + $0x88] sm:$0xff] }
 0x74c   : > { %4599 = vmatpush.msra.mxu3 %v9276_v23  ;;  %v9404_v26 = vpack.i.bf16 %v9395_v4, %v9363_v43  ;;  %v7188_v61 = vpack.i.bf16 %v9344_v35, %v9395_v4 }
 0x74d   : > { %v9400_v38 = vpop.permute.xlu1 %6969 }
 0x74e   : > { %4600 = vmatpush.msra.mxu3 %v9331_v12 }
 0x750   : > { %7099 = vrot.lane.b32.xlu0 %v9404_v26, %s7323_s27  ;;  %4601 = vmatpush.msra.mxu3 %v9264_v0 }
 0x751   : > { %7054 = vrot.lane.b32.xlu2 %v7053_v1, %s7327_s13  ;;  %7189 = vrot.lane.b32.xlu1 %v7188_v61, %s7328_s14  ;;  %v9452_v36 = vpop.permute.xlu2 %7024 }
 0x752   : > { %v9416_v28 = vpop.permute.xlu0 %6994  ;;  %10313 = vst [vmem:[#allocation7_spill] sm:$0xff] %v9452_v36  ;;  %v10233_v60 = vunpack.i.l.bf16 %v9452_v36 }
 0x753   : > { %v10221_v49 = vunpack.i.l.bf16 %v9416_v28 }
 0x755   : > { %v9420_v21 = vpop.permute.xlu1 %6984  ;;  %v9427_v14 = vsel %vm709_vm3, %v6992_v45, %v10221_v49 }
 0x756   : > { %v10225_v1 = vunpack.i.h.bf16 %v9420_v21 }
 0x758   : > { %7104 = vrot.lane.b32.xlu0 %v7103_v2, %s7327_s13  ;;  %v9443_v45 = vsel %vm709_vm3, %v10225_v1, %v10224_v6  ;;  %v7027_v6 = vunpack.i.h.bf16 %v9452_v36 }
 0x759   : > { %7064 = vrot.lane.b32.xlu2 %v9240_v51, %s7328_s14  ;;  %7194 = vrot.lane.b32.xlu1 %v7193_v42, %s7329_s15 }
 0x75a   : > { %v9448_v49 = vpop.permute.xlu0 %7014 }
 0x75d   : > { %v9450_v30 = vpop.permute.xlu1 %6999 }
 0x760   : > { %7119 = vrot.lane.b32.xlu0 %v9404_v26, %s7324_s28 }
 0x761   : > { %7074 = vrot.lane.b32.xlu2 %v7048_v44, %s7324_s28  ;;  %7219 = vrot.lane.b32.xlu1 %v7188_v61, %s7330_s16 }
 0x762   : > { %v9458_v2 = vpop.permute.xlu0 %7029 }
 0x763   : > { %10314 = vst [vmem:[#allocation9_spill] sm:$0xff] %v9458_v2  ;;  %v10232_v1 = vunpack.i.l.bf16 %v9458_v2  ;;  %v7168_v2 = vpack.i.bf16 %v9346_v8, %v9469_v7 }
 0x765   : > { %v9462_v42 = vpop.permute.xlu1 %7004  ;;  %v9467_v58 = vsel %vm800_vm4, %v7027_v6, %v10232_v1  ;;  %v5705_v6 = vld [vmem:[%s10174_s11] sm:$0xff]  ;;  %v10234_v1 = vunpack.i.l.bf16 %v9369_v31 }
 0x766   : > { %10315 = vst [vmem:[#allocation8_spill] sm:$0xff] %v9462_v42  ;;  %v10243_v36 = vunpack.i.h.bf16 %v9462_v42 }
 0x767   : > { %10316 = vst [vmem:[#allocation15_spill] sm:$0xff] %v9467_v58  ;;  %v7163_v58 = vpack.i.bf16 %v9395_v4, %v9278_v48 }
 0x768   : > { %7124 = vrot.lane.b32.xlu0 %v7123_v57, %s7327_s13 }
 0x769   : > { %7079 = vrot.lane.b32.xlu2 %v7048_v44, %s7325_s29  ;;  %7224 = vrot.lane.b32.xlu1 %v9240_v51, %s7330_s16  ;;  %v7133_v51 = vpack.i.bf16 %v9382_v29, %v9433_v41 }
 0x76d   : > { %v9477_v61 = vpop.permute.xlu1 %7019 }
 0x76e   : > { %10317 = vst [vmem:[#allocation10_spill] sm:$0xff] %v9477_v61  ;;  %v10231_v46 = vunpack.i.h.bf16 %v9477_v61  ;;  %v7178_v61 = vpack.i.bf16 %v9329_v13, %v9375_v39 }
 0x770   : > { %7129 = vrot.lane.b32.xlu0 %v9404_v26, %s7325_s29  ;;  %v9488_v57 = vsel %vm800_vm4, %v10231_v46, %v10233_v60  ;;  %v6977_v46 = vunpack.i.h.bf16 %v9369_v31  ;;  %v10236_v60 = vunpack.i.l.bf16 %v9390_v62 }
 0x771   : > { %10318 = vst [vmem:[#allocation14_spill] sm:$0xff] %v9488_v57  ;;  %7084 = vrot.lane.b32.xlu2 %v9282_v32, %s7328_s14  ;;  %7244 = vrot.lane.b32.xlu1 %v9282_v32, %s7330_s16  ;;  %v10235_v32 = vunpack.i.h.bf16 %v9400_v38 }
 0x772   : > { %v9508_v57 = vsel %vm709_vm3, %v6977_v46, %v10236_v60  ;;  %v10242_v60 = vunpack.i.l.bf16 %v9448_v49 }
 0x778   : > { %7134 = vrot.lane.b32.xlu0 %v7133_v51, %s7328_s14  ;;  %v7158_v51 = vpack.i.bf16 %v9363_v43, %v9375_v39 }
 0x779   : > { %7089 = vrot.lane.b32.xlu2 %v7048_v44, %s7326_s30  ;;  %5709 = vperm.xlu1 %6617, %v5705_v6   ;;  %v9515_v44 = vsel %vm709_vm3, %v10235_v32, %v10234_v1  ;;  %v9523_v6 = vld [vmem:[#allocation2 + $0x50] sm:$0xff]  ;;  %v7012_v1 = vunpack.i.h.bf16 %v9430_v59  ;;  %v10244_v32 = vunpack.i.l.bf16 %v9430_v59 }
 0x77a   : > { %v7143_v46 = vpack.i.bf16 %v9433_v41, %v9523_v6 }
 0x780   : > { %7149 = vrot.lane.b32.xlu0 %v9404_v26, %s7326_s30 }
 0x781   : > { %7114 = vrot.lane.b32.xlu2 %v9270_v3, %s7328_s14 }
 0x788   : > { %7159 = vrot.lane.b32.xlu0 %v7158_v51, %s7328_s14  ;;  %v9540_v51 = vsel %vm800_vm4, %v7012_v1, %v10242_v60  ;;  %v9556_v1 = vpop.permute.xlu2 %7044  ;;  %v7183_v60 = vpack.i.bf16 %v9234_v56, %v9469_v7  ;;  %v7233_v56 = vpack.i.bf16 %v9382_v29, %v9363_v43 }
 0x789   : > { %7144 = vrot.lane.b32.xlu2 %v7143_v46, %s7329_s15  ;;  %10319 = vst [vmem:[#allocation19_spill] sm:$0xff] %v9540_v51  ;;  %v9547_v46 = vsel %vm800_vm4, %v10243_v36, %v10244_v32  ;;  %v7203_v36 = vpack.i.bf16 %v9276_v23, %v9392_v27  ;;  %v9577_v23 = vpop.permute.xlu1 %7034  ;;  %v6961_v32 = vunpack.i.l.bf16 %v9358_v19 }
 0x78a   : > { %10320 = vst [vmem:[#allocation13_spill] sm:$0xff] %v9547_v46 }
 0x78b   : > { %10321 = vst [vmem:[#allocation18_spill] sm:$0xff] %v9556_v1 }
 0x790   : > { %7164 = vrot.lane.b32.xlu0 %v7163_v58, %s7327_s13 }
 0x791   : > { %7179 = vrot.lane.b32.xlu2 %v7178_v61, %s7329_s15  ;;  %v7208_v61 = vpack.i.bf16 %v9264_v0, %v9331_v12  ;;  %v9583_v0 = vld [vmem:[%s10173_s10] sm:$0xff]  ;;  %v7238_v12 = vpack.i.bf16 %v9346_v8, %v9523_v6 }
 0x792   : > { %5997 = vmatmul.msk.f32.vlgmr.msra.gmra.mxu3 %vm4504_vm12, %v9583_v0 }
 0x798   : > { %7169 = vrot.lane.b32.xlu0 %v7168_v2, %s7328_s14  ;;  %v7213_v2 = vpack.i.bf16 %v9375_v39, %v9433_v41 }
 0x799   : > { %7199 = vrot.lane.b32.xlu2 %v9404_v26, %s7329_s15 }
 0x7a0   : > { %7184 = vrot.lane.b32.xlu0 %v7183_v60, %s7329_s15  ;;  %v7228_v60 = vpack.i.bf16 %v9392_v27, %v9469_v7  ;;  %v9596_v27 = vpop.permute.xlu1 %7039 }
 0x7a1   : > { %7204 = vrot.lane.b32.xlu2 %v7203_v36, %s7329_s15  ;;  %10323 = vst [vmem:[#allocation4_spill] sm:$0xff] %v9596_v27 }
 0x7a3   : > { %v7050_v58 = vpop.permute.xlu2 %7049 }
 0x7a4   : > { %v7052_v27 = vunpack.i.h.bf16 %v7050_v58  ;;  %v7051_v46 = vunpack.i.l.bf16 %v7050_v58  ;;  %v6912_v58 = vunpack.i.h.bf16 %v9214_v5 }
 0x7a8   : > { %7209 = vrot.lane.b32.xlu0 %v7208_v61, %s7329_s15  ;;  %v7047_v61 = vunpack.i.h.bf16 %v9556_v1  ;;  %v9619_v42 = vpop.permute.xlu1 %7059 }
 0x7a9   : > { %7214 = vrot.lane.b32.xlu2 %v7213_v2, %s7330_s16 }
 0x7ab   : > { %v9570_v26 = vpop.permute.xlu2 %7054 }
 0x7b0   : > { %7234 = vrot.lane.b32.xlu0 %v7233_v56, %s7330_s16  ;;  %v9603_v56 = vld [vmem:[%s10173_s10 + $0x8] sm:$0xff] }
 0x7b1   : > { %7229 = vrot.lane.b32.xlu2 %v7228_v60, %s7330_s16  ;;  %5998 = vmatmul.msk.f32.gmra.mxu3 %vm4504_vm12, %v9603_v56 }
 0x7b3   : > { %v9585_v36 = vpop.permute.xlu2 %7064 }
 0x7b4   : > { %10322 = vst [vmem:[#allocation3_spill] sm:$0xff] %v9585_v36  ;;  %v6927_v36 = vunpack.i.h.bf16 %v9216_v10 }
 0x7b8   : > { %7239 = vrot.lane.b32.xlu0 %v7238_v12, %s7330_s16  ;;  %v6962_v12 = vunpack.i.h.bf16 %v9358_v19 }
 0x7b9   : > { %7249 = vrot.lane.b32.xlu2 %v9335_v34, %s7330_s16 }
 0x7ba   : > { %v9594_v39 = vpop.permute.xlu0 %7094  ;;  %v4482_v19 = vsel %vm466_vm1, %v6961_v32, %v6962_v12  ;;  %v10326_v32 = vunpack.i.l.bf16 %v9189_v47  ;;  %v5989_v47 = vld [vmem:[%s10173_s10 + $0x10] sm:$0xff] }
 0x7bb   : > { %v10251_v2 = vunpack.i.l.bf16 %v9594_v39  ;;  %v9605_v60 = vpop.permute.xlu2 %7074 }
 0x7bd   : > { %v9612_v34 = vsel %vm891_vm5, %v7047_v61, %v10251_v2 }
 0x7be   : > { %10324 = vst [vmem:[#allocation5_spill] sm:$0xff] %v9612_v34 }
 0x7c0   : > { %7254 = vrot.lane.b32.xlu0 %v9270_v3, %s7330_s16  ;;  %v6916_v3 = vunpack.i.l.bf16 %v9195_v55 }
 0x7c2   : > { %v7100_v1 = vpop.permute.xlu0 %7099 }
 0x7c3   : > { %v7102_v59 = vunpack.i.h.bf16 %v7100_v1  ;;  %v7101_v51 = vunpack.i.l.bf16 %v7100_v1  ;;  %v9623_v34 = vpop.permute.xlu2 %7079  ;;  %v4483_v1 = vsel %vm466_vm1, %v6962_v12, %v7051_v46 }
 0x7c5   : > { %4567 = vmatpush.msrb.mxu2 %v7102_v59  ;;  %v4484_v61 = vsel %vm466_vm1, %v7052_v27, %v7101_v51  ;;  %v4485_v2 = vsel %vm466_vm1, %v7101_v51, %v7102_v59  ;;  %v10325_v27 = vunpack.i.l.bf16 %v9216_v10  ;;  %v10328_v10 = vunpack.i.l.bf16 %v9214_v5 }
 0x7c6   : > { %4521 = vmatpush.msrb.mxu0 %v4484_v61  ;;  %4544 = vmatpush.msra.mxu1 %v4485_v2  ;;  %v6901_v2 = vunpack.i.l.bf16 %v9177_v16  ;;  %v10330_v61 = vunpack.i.h.bf16 %v9177_v16  ;;  %v6967_v5 = vunpack.i.h.bf16 %v9373_v53  ;;  %v6966_v16 = vunpack.i.l.bf16 %v9373_v53 }
 0x7c7   : > { %4568 = vmatpush.msrb.mxu2 %v7051_v46  ;;  %v4481_v59 = vsel %vm466_vm1, %v10325_v27, %v6927_v36  ;;  %v10327_v46 = vunpack.i.h.bf16 %v9195_v55  ;;  %v10329_v55 = vunpack.i.l.bf16 %v9163_v20  ;;  %v6956_v53 = vunpack.i.l.bf16 %v9360_v11 }
 0x7c8   : > { %4522 = vmatpush.msrb.mxu0 %v4482_v19  ;;  %4545 = vmatpush.msra.mxu1 %v4483_v1 }
 0x7c9   : > { %4569 = vmatpush.msrb.mxu2 %v6927_v36  ;;  %v4478_v12 = vsel %vm466_vm1, %v6916_v3, %v10327_v46  ;;  %v4477_v36 = vsel %vm466_vm1, %v10328_v10, %v6912_v58  ;;  %v6931_v46 = vunpack.i.l.bf16 %v9302_v25 }
 0x7ca   : > { %v9632_v51 = vpop.permute.xlu0 %7104  ;;  %4523 = vmatpush.msrb.mxu0 %v9223_v18  ;;  %4546 = vmatpush.msra.mxu1 %v4481_v59  ;;  %v9649_v18 = vpop.permute.xlu1 %7069 }
 0x7cb   : > { %4570 = vmatpush.msrb.mxu2 %v10326_v32  ;;  %v9656_v3 = vpop.permute.xlu2 %7084  ;;  %v6942_v32 = vunpack.i.h.bf16 %v9325_v15 }
 0x7cc   : > { %4524 = vmatpush.msrb.mxu0 %v4478_v12  ;;  %4547 = vmatpush.msra.mxu1 %v9210_v37  ;;  %v4474_v37 = vsel %vm466_vm1, %v6901_v2, %v10330_v61  ;;  %v6951_v2 = vunpack.i.l.bf16 %v9356_v17 }
 0x7cd   : > { %4571 = vmatpush.msrb.mxu2 %v6912_v58 }
 0x7ce   : > { %4525 = vmatpush.msrb.mxu0 %v9312_v33  ;;  %4548 = vmatpush.msra.mxu1 %v4477_v36  ;;  %v7077_v33 = vunpack.i.h.bf16 %v9605_v60 }
 0x7cf   : > { %4572 = vmatpush.msrb.mxu2 %v10329_v55  ;;  %v7082_v55 = vunpack.i.h.bf16 %v9623_v34 }
 0x7d0   : > { %4526 = vmatpush.msrb.mxu0 %v4474_v37  ;;  %4549 = vmatpush.msra.mxu1 %v9293_v50  ;;  %v7076_v50 = vunpack.i.l.bf16 %v9605_v60  ;;  %v6947_v60 = vunpack.i.h.bf16 %v9353_v40  ;;  %v7081_v37 = vunpack.i.l.bf16 %v9623_v34 }
 0x7d1   : > { %5991 = vmatmul.msk.f32.vlgmr.msrb.gmra.mxu0 %vm4504_vm12, %v5989_v47  ;;  %5993 = vmatmul.msk.f32.vlgmr.msra.gmra.mxu1 %vm4504_vm12, %v5989_v47 }
 0x7d2   : > { %5995 = vmatmul.msk.f32.vlgmr.msrb.gmra.mxu2 %vm4504_vm12, %v5989_v47  ;;  %4619 = vmatpush.msra.mxu0 %v9363_v43  ;;  %v7120_v20 = vpop.permute.xlu0 %7119  ;;  %v6957_v43 = vunpack.i.h.bf16 %v9360_v11  ;;  %v6946_v11 = vunpack.i.l.bf16 %v9353_v40  ;;  %v9685_v59 = vpop.permute.xlu1 %7109  ;;  %v7002_v47 = vunpack.i.h.bf16 %v9450_v30 }
 0x7d3   : > { %4642 = vmatpush.msrb.mxu1 %v9395_v4  ;;  %v7122_v19 = vunpack.i.h.bf16 %v7120_v20  ;;  %v7121_v1 = vunpack.i.l.bf16 %v7120_v20  ;;  %v4702_v4 = vsel %vm618_vm2, %v6966_v16, %v6967_v5  ;;  %v6997_v20 = vunpack.i.h.bf16 %v9416_v28 }
 0x7d4   : > { %4620 = vmatpush.msra.mxu0 %v9236_v22  ;;  %v5990_v22 = vld [vmem:[%s10173_s10 + $0x18] sm:$0xff]  ;;  %v4698_v12 = vsel %vm618_vm2, %v6946_v11, %v6947_v60  ;;  %v4853_v16 = vsel %vm709_vm3, %v7002_v47, %v7081_v37  ;;  %v7057_v11 = vunpack.i.h.bf16 %v9570_v26 }
 0x7d5   : > { %4643 = vmatpush.msrb.mxu1 %v9344_v35  ;;  %v4704_v58 = vsel %vm618_vm2, %v7077_v33, %v7121_v1  ;;  %v4705_v27 = vsel %vm618_vm2, %v7121_v1, %v7122_v19  ;;  %v4703_v35 = vsel %vm618_vm2, %v6967_v5, %v7076_v50  ;;  %v10333_v33 = vunpack.i.l.bf16 %v9300_v63 }
 0x7d6   : > { %4621 = vmatpush.msra.mxu0 %v9523_v6  ;;  %4740 = vmatpush.msra.mxu2 %v4704_v58  ;;  %v6952_v6 = vunpack.i.h.bf16 %v9356_v17  ;;  %v4699_v17 = vsel %vm618_vm2, %v6947_v60, %v6951_v2  ;;  %v6971_v63 = vunpack.i.l.bf16 %v9400_v38 }
 0x7d7   : > { %4644 = vmatpush.msrb.mxu1 %v9433_v41  ;;  %4763 = vmatpush.msrb.mxu3 %v4705_v27  ;;  %v9688_v41 = vpop.permute.xlu2 %7089  ;;  %v6982_v27 = vunpack.i.h.bf16 %v9390_v62 }
 0x7d8   : > { %4622 = vmatpush.msra.mxu0 %v9278_v48  ;;  %4741 = vmatpush.msra.mxu2 %v4702_v4  ;;  %v4700_v40 = vsel %vm618_vm2, %v6952_v6, %v6956_v53  ;;  %v10338_v6 = vunpack.i.h.bf16 %v9400_v38 }
 0x7d9   : > { %4645 = vmatpush.msrb.mxu1 %v9382_v29  ;;  %4764 = vmatpush.msrb.mxu3 %v4703_v35  ;;  %v4701_v29 = vsel %vm618_vm2, %v6956_v53, %v6957_v43  ;;  %v7097_v53 = vunpack.i.h.bf16 %v9594_v39 }
 0x7da   : > { %5992 = vmatmul.msk.f32.gmra.mxu0 %vm4504_vm12, %v5990_v22  ;;  %5994 = vmatmul.msk.f32.gmra.mxu1 %vm4504_vm12, %v5990_v22  ;;  %v9692_v48 = vpop.permute.xlu0 %7124  ;;  %v4844_v60 = vsel %vm709_vm3, %v6971_v63, %v10338_v6  ;;  %v10350_v6 = vld [vmem:[#allocation19_spill] sm:$0xff] }
 0x7db   : > { %5996 = vmatmul.msk.f32.gmra.mxu2 %vm4504_vm12, %v5990_v22  ;;  %4623 = vmatpush.msra.mxu0 %v9329_v13  ;;  %v10331_v13 = vunpack.i.l.bf16 %v9325_v15  ;;  %v10336_v22 = vunpack.i.l.bf16 %v9397_v54  ;;  %v6011_v54 = vld [vmem:[%s10173_s10 + $0x30] sm:$0xff] }
 0x7dc   : > { %4742 = vmatpush.msra.mxu2 %v4700_v40  ;;  %4765 = vmatpush.msrb.mxu3 %v4701_v29  ;;  %v7056_v40 = vunpack.i.l.bf16 %v9570_v26  ;;  %v7092_v29 = vunpack.i.h.bf16 %v9688_v41  ;;  %v6020_v26 = vld [vmem:[%s10173_s10 + $0x48] sm:$0xff] }
 0x7dd   : > { %4624 = vmatpush.msra.mxu0 %v9266_v52  ;;  %4646 = vmatpush.msrb.mxu1 %v9469_v7  ;;  %v4697_v10 = vsel %vm618_vm2, %v10331_v13, %v6942_v32  ;;  %v10332_v52 = vunpack.i.h.bf16 %v9302_v25  ;;  %v9716_v7 = vld [vmem:[%s10173_s10 + $0x20] sm:$0xff] }
 0x7de   : > { %4743 = vmatpush.msra.mxu2 %v4698_v12  ;;  %4766 = vmatpush.msrb.mxu3 %v4699_v17  ;;  %v7091_v12 = vunpack.i.l.bf16 %v9688_v41 }
 0x7df   : > { %4786 = vmatpush.msrb.mxu0 %v7122_v19  ;;  %4647 = vmatpush.msrb.mxu1 %v9346_v8  ;;  %v4694_v36 = vsel %vm618_vm2, %v6931_v46, %v10332_v52  ;;  %v7001_v8 = vunpack.i.l.bf16 %v9450_v30  ;;  %v9727_v5 = vpop.permute.xlu2 %7114  ;;  %v9746_v19 = vld [vmem:[%s10173_s10 + $0x28] sm:$0xff] }
 0x7e0   : > { %4744 = vmatpush.msra.mxu2 %v9340_v24  ;;  %4767 = vmatpush.msrb.mxu3 %v4697_v10  ;;  %v9721_v24 = vpop.permute.xlu1 %7139  ;;  %v10340_v10 = vld [vmem:[#allocation9_spill] sm:$0xff] }
 0x7e1   : > { %4787 = vmatpush.msrb.mxu0 %v7076_v50  ;;  %v4852_v34 = vsel %vm709_vm3, %v7001_v8, %v7002_v47  ;;  %v10334_v50 = vunpack.i.l.bf16 %v9416_v28  ;;  %v10335_v28 = vunpack.i.h.bf16 %v9420_v21  ;;  %v7032_v52 = vunpack.i.h.bf16 %v10340_v10  ;;  %v6012_v8 = vld [vmem:[%s10173_s10 + $0x38] sm:$0xff] }
 0x7e2   : > { %4745 = vmatpush.msra.mxu2 %v4694_v36  ;;  %4768 = vmatpush.msrb.mxu3 %v9319_v9  ;;  %v7130_v15 = vpop.permute.xlu0 %7129 }
 0x7e3   : > { %4788 = vmatpush.msrb.mxu0 %v6957_v43  ;;  %6001 = vmatmul.msk.f32.vlgmr.msrb.gmra.mxu1 %vm4504_vm12, %v9583_v0  ;;  %v7132_v25 = vunpack.i.h.bf16 %v7130_v15  ;;  %v7131_v61 = vunpack.i.l.bf16 %v7130_v15  ;;  %v4851_v58 = vsel %vm709_vm3, %v10334_v50, %v6997_v20  ;;  %v10346_v50 = vld [vmem:[#allocation8_spill] sm:$0xff] }
 0x7e4   : > { %5999 = vmatmul.msk.f32.vlgmr.msra.gmra.mxu0 %vm4504_vm12, %v9583_v0  ;;  %6005 = vmatmul.msk.f32.vlgmr.msra.gmra.mxu2 %vm4504_vm12, %v9716_v7  ;;  %v6986_v0 = vunpack.i.l.bf16 %v9420_v21 }
 0x7e5   : > { %6007 = vmatmul.msk.f32.vlgmr.msrb.gmra.mxu3 %vm4504_vm12, %v9716_v7  ;;  %4789 = vmatpush.msrb.mxu0 %v6951_v2  ;;  %v4854_v9 = vsel %vm709_vm3, %v7082_v55, %v7131_v61  ;;  %v4855_v30 = vsel %vm709_vm3, %v7131_v61, %v7132_v25  ;;  %v10339_v2 = vunpack.i.l.bf16 %v9369_v31  ;;  %v7061_v31 = vunpack.i.l.bf16 %v9619_v42  ;;  %v10341_v55 = vld [vmem:[#allocation10_spill] sm:$0xff] }
 0x7e6   : > { %4936 = vmatpush.msra.mxu3 %v7132_v25  ;;  %4890 = vmatpush.msra.mxu1 %v4854_v9  ;;  %v7021_v25 = vunpack.i.l.bf16 %v10341_v55  ;;  %v10343_v9 = vld [vmem:[#allocation7_spill] sm:$0xff] }
 0x7e7   : > { %4790 = vmatpush.msrb.mxu0 %v6942_v32  ;;  %4913 = vmatpush.msrb.mxu2 %v4855_v30  ;;  %v9770_v4 = vpop.permute.xlu2 %7144  ;;  %v5150_v36 = vsel %vm891_vm5, %v7057_v11, %v7061_v31  ;;  %v10344_v30 = vunpack.i.l.bf16 %v10343_v9  ;;  %v10354_v11 = vunpack.i.h.bf16 %v10346_v50 }
 0x7e8   : > { %4937 = vmatpush.msra.mxu3 %v7081_v37  ;;  %4891 = vmatpush.msra.mxu1 %v4852_v34  ;;  %v9755_v43 = vpop.permute.xlu1 %7154  ;;  %v10342_v37 = vld [vmem:[#allocation15_spill] sm:$0xff] }
 0x7e9   : > { %4791 = vmatpush.msrb.mxu0 %v10333_v33  ;;  %4914 = vmatpush.msrb.mxu2 %v4853_v16  ;;  %v7156_v35 = vunpack.i.l.bf16 %v9755_v43  ;;  %v10345_v16 = vunpack.i.l.bf16 %v10340_v10  ;;  %v10356_v10 = vld [vmem:[#allocation4_spill] sm:$0xff] }
 0x7ea   : > { %4938 = vmatpush.msra.mxu3 %v6997_v20  ;;  %v9748_v1 = vpop.permute.xlu0 %7134  ;;  %4892 = vmatpush.msra.mxu1 %v9427_v14  ;;  %v4848_v14 = vsel %vm709_vm3, %v6986_v0, %v10335_v28  ;;  %v7017_v20 = vunpack.i.h.bf16 %v9448_v49  ;;  %v7042_v9 = vunpack.i.h.bf16 %v10356_v10 }
 0x7eb   : > { %6002 = vmatmul.msk.f32.gmra.mxu1 %vm4504_vm12, %v9603_v56  ;;  %4915 = vmatpush.msrb.mxu2 %v4851_v58  ;;  %v5154_v38 = vsel %vm891_vm5, %v7097_v53, %v7156_v35  ;;  %v5001_v33 = vsel %vm800_vm4, %v10345_v16, %v7032_v52  ;;  %v7006_v58 = vunpack.i.l.bf16 %v10346_v50  ;;  %v7116_v16 = vunpack.i.l.bf16 %v9727_v5 }
 0x7ec   : > { %6000 = vmatmul.msk.f32.gmra.mxu0 %vm4504_vm12, %v9603_v56  ;;  %6006 = vmatmul.msk.f32.gmra.mxu2 %vm4504_vm12, %v9746_v19  ;;  %v10337_v56 = vunpack.i.l.bf16 %v9390_v62  ;;  %v7036_v62 = vunpack.i.l.bf16 %v9577_v23 }
 0x7ed   : > { %6008 = vmatmul.msk.f32.gmra.mxu3 %vm4504_vm12, %v9746_v19  ;;  %4893 = vmatpush.msra.mxu1 %v4848_v14 }
 0x7ee   : > { %4939 = vmatpush.msra.mxu3 %v10336_v22  ;;  %4916 = vmatpush.msrb.mxu2 %v9443_v45  ;;  %v4847_v21 = vsel %vm709_vm3, %v10337_v56, %v6982_v27  ;;  %v7157_v45 = vunpack.i.h.bf16 %v9755_v43  ;;  %v10349_v22 = vld [vmem:[#allocation14_spill] sm:$0xff]  ;;  %v7072_v56 = vunpack.i.h.bf16 %v9649_v18 }
 0x7ef   : > { %4894 = vmatpush.msra.mxu1 %v9508_v57  ;;  %v7037_v57 = vunpack.i.h.bf16 %v9577_v23  ;;  %v9817_v47 = vpop.permute.xlu2 %7179 }
 0x7f0   : > { %4940 = vmatpush.msra.mxu3 %v6982_v27  ;;  %4917 = vmatpush.msrb.mxu2 %v4847_v21  ;;  %v5152_v17 = vsel %vm891_vm5, %v7157_v45, %v7056_v40  ;;  %v10347_v27 = vunpack.i.h.bf16 %v10341_v55  ;;  %v7071_v21 = vunpack.i.l.bf16 %v9649_v18  ;;  %v10352_v45 = vld [vmem:[#allocation6_spill] sm:$0xff]  ;;  %v9983_v18 = vld [vmem:[%s10173_s10 + $0x60] sm:$0xff] }
 0x7f1   : > { %4895 = vmatpush.msra.mxu1 %v4844_v60  ;;  %v5003_v15 = vsel %vm800_vm4, %v7037_v57, %v7091_v12  ;;  %v10351_v60 = vunpack.i.l.bf16 %v9448_v49  ;;  %v7062_v49 = vunpack.i.h.bf16 %v9619_v42  ;;  %v10358_v42 = vld [vmem:[#allocation18_spill] sm:$0xff] }
 0x7f2   : > { %4941 = vmatpush.msra.mxu3 %v10339_v2  ;;  %4918 = vmatpush.msrb.mxu2 %v9515_v44  ;;  %v7150_v32 = vpop.permute.xlu0 %7149  ;;  %v9804_v44 = vpop.permute.xlu1 %7174  ;;  %v4998_v63 = vsel %vm800_vm4, %v7021_v25, %v10347_v27  ;;  %v4994_v2 = vsel %vm800_vm4, %v7006_v58, %v10354_v11  ;;  %v7147_v11 = vunpack.i.h.bf16 %v9770_v4 }
 0x7f3   : > { %6013 = vmatmul.msk.f32.vlgmr.msra.gmra.mxu1 %vm4504_vm12, %v6011_v54  ;;  %v7152_v23 = vunpack.i.h.bf16 %v7150_v32  ;;  %v7151_v46 = vunpack.i.l.bf16 %v7150_v32 }
 0x7f4   : > { %5190 = vmatpush.msrb.mxu3 %v5154_v38  ;;  %6009 = vmatmul.msk.f32.vlgmr.msrb.gmra.mxu0 %vm4504_vm12, %v9716_v7  ;;  %v5002_v7 = vsel %vm800_vm4, %v7036_v62, %v7037_v57  ;;  %v10353_v57 = vunpack.i.l.bf16 %v10352_v45  ;;  %v6019_v38 = vld [vmem:[%s10173_s10 + $0x40] sm:$0xff] }
 0x7f5   : > { %6015 = vmatmul.msk.f32.vlgmr.msrb.gmra.mxu2 %vm4504_vm12, %v6011_v54  ;;  %6017 = vmatmul.msk.f32.vlgmr.msra.gmra.mxu3 %vm4504_vm12, %v6011_v54  ;;  %v5004_v13 = vsel %vm800_vm4, %v7092_v29, %v7151_v46  ;;  %v5005_v41 = vsel %vm800_vm4, %v7151_v46, %v7152_v23  ;;  %v4997_v54 = vsel %vm800_vm4, %v10351_v60, %v7017_v20  ;;  %v7087_v46 = vunpack.i.h.bf16 %v9656_v3 }
 0x7f6   : > { %5086 = vmatpush.msra.mxu2 %v7152_v23  ;;  %5191 = vmatpush.msrb.mxu3 %v5152_v17  ;;  %v10355_v17 = vld [vmem:[#allocation13_spill] sm:$0xff]  ;;  %v7141_v60 = vunpack.i.l.bf16 %v9721_v24 }
 0x7f7   : > { %5040 = vmatpush.msra.mxu0 %v5004_v13  ;;  %5063 = vmatpush.msrb.mxu1 %v5005_v41  ;;  %v9867_v32 = vpop.permute.xlu2 %7199 }
 0x7f8   : > { %5087 = vmatpush.msra.mxu2 %v7091_v12  ;;  %5192 = vmatpush.msrb.mxu3 %v5150_v36  ;;  %v7086_v12 = vunpack.i.l.bf16 %v9656_v3  ;;  %v7106_v36 = vunpack.i.l.bf16 %v9632_v51  ;;  %v7202_v50 = vunpack.i.h.bf16 %v9867_v32  ;;  %v7201_v58 = vunpack.i.l.bf16 %v9867_v32 }
 0x7f9   : > { %5041 = vmatpush.msra.mxu0 %v5002_v7  ;;  %5064 = vmatpush.msrb.mxu1 %v5003_v15  ;;  %v5300_v7 = vsel %vm982_vm6, %v7071_v21, %v7072_v56  ;;  %v7112_v15 = vunpack.i.h.bf16 %v9685_v59  ;;  %v7126_v21 = vunpack.i.l.bf16 %v9692_v48 }
 0x7fa   : > { %5088 = vmatpush.msra.mxu2 %v7032_v52  ;;  %v9824_v61 = vpop.permute.xlu0 %7159  ;;  %v9846_v53 = vpop.permute.xlu1 %7189  ;;  %v7041_v52 = vunpack.i.l.bf16 %v10356_v10  ;;  %v5153_v43 = vsel %vm891_vm5, %v7056_v40, %v7106_v36 }
 0x7fb   : > { %5042 = vmatpush.msra.mxu0 %v10342_v37  ;;  %6014 = vmatmul.msk.f32.gmra.mxu1 %vm4504_vm12, %v6012_v8  ;;  %v7162_v34 = vunpack.i.h.bf16 %v9824_v61  ;;  %v7161_v0 = vunpack.i.l.bf16 %v9824_v61  ;;  %v7107_v37 = vunpack.i.h.bf16 %v9632_v51  ;;  %v9905_v51 = vld [vmem:[%s10173_s10 + $0x50] sm:$0xff] }
 0x7fc   : > { %5089 = vmatpush.msra.mxu2 %v10344_v30  ;;  %6010 = vmatmul.msk.f32.gmra.mxu0 %vm4504_vm12, %v9746_v19  ;;  %v10348_v19 = vld [vmem:[#allocation3_spill] sm:$0xff]  ;;  %v5298_v30 = vsel %vm982_vm6, %v7086_v12, %v7087_v46  ;;  %v5144_v40 = vsel %vm891_vm5, %v7041_v52, %v7042_v9  ;;  %v7137_v12 = vunpack.i.h.bf16 %v9748_v1 }
 0x7fd   : > { %6016 = vmatmul.msk.f32.gmra.mxu2 %vm4504_vm12, %v6012_v8  ;;  %6018 = vmatmul.msk.f32.gmra.mxu3 %vm4504_vm12, %v6012_v8  ;;  %v7067_v28 = vunpack.i.h.bf16 %v10348_v19  ;;  %v7066_v14 = vunpack.i.l.bf16 %v10348_v19  ;;  %v5304_v62 = vsel %vm982_vm6, %v7161_v0, %v7162_v34  ;;  %v7111_v8 = vunpack.i.l.bf16 %v9685_v59 }
 0x7fe   : > { %5065 = vmatpush.msrb.mxu1 %v5001_v33  ;;  %5043 = vmatpush.msra.mxu0 %v4998_v63  ;;  %v7117_v0 = vunpack.i.h.bf16 %v9727_v5  ;;  %v5151_v63 = vsel %vm891_vm5, %v7061_v31, %v7107_v37  ;;  %v7046_v31 = vunpack.i.l.bf16 %v10358_v42  ;;  %v10042_v5 = vld [vmem:[%s10173_s10 + $0x68] sm:$0xff] }
 0x7ff   : > { %5090 = vmatpush.msra.mxu2 %v7017_v20  ;;  %v5302_v23 = vsel %vm982_vm6, %v7066_v14, %v7067_v28  ;;  %v10357_v20 = vld [vmem:[#allocation5_spill] sm:$0xff]  ;;  %v5296_v33 = vsel %vm982_vm6, %v7111_v8, %v7112_v15  ;;  %v7192_v14 = vunpack.i.h.bf16 %v9846_v53  ;;  %v9935_v45 = vpop.permute.xlu2 %7204 }
 0x800   : > { %5066 = vmatpush.msrb.mxu1 %v10349_v22  ;;  %5044 = vmatpush.msra.mxu0 %v10350_v6  ;;  %v7191_v22 = vunpack.i.l.bf16 %v9846_v53  ;;  %v7142_v6 = vunpack.i.h.bf16 %v9721_v24 }
 0x801   : > { %5091 = vmatpush.msra.mxu2 %v10353_v57  ;;  %v7136_v57 = vunpack.i.l.bf16 %v9748_v1  ;;  %v5303_v61 = vsel %vm982_vm6, %v7067_v28, %v7192_v14  ;;  %v7177_v28 = vunpack.i.h.bf16 %v9804_v44 }
 0x802   : > { %5067 = vmatpush.msrb.mxu1 %v4997_v54  ;;  %5045 = vmatpush.msra.mxu0 %v4994_v2  ;;  %v9869_v29 = vpop.permute.xlu0 %7164  ;;  %v7127_v54 = vunpack.i.h.bf16 %v9692_v48  ;;  %v5305_v48 = vsel %vm982_vm6, %v7162_v34, %v7191_v22  ;;  %v7146_v2 = vunpack.i.l.bf16 %v9770_v4  ;;  %v5453_v34 = vsel %vm1073_vm7, %v7141_v60, %v7142_v6  ;;  %v6043_v4 = vld [vmem:[%s10173_s10 + $0x70] sm:$0xff] }
 0x803   : > { %5340 = vmatpush.msrb.mxu2 %v5304_v62  ;;  %v7167_v13 = vunpack.i.h.bf16 %v9869_v29  ;;  %v7166_v41 = vunpack.i.l.bf16 %v9869_v29  ;;  %v5294_v62 = vsel %vm982_vm6, %v7116_v16, %v7117_v0  ;;  %v10359_v29 = vunpack.i.l.bf16 %v9594_v39 }
 0x804   : > { %5068 = vmatpush.msrb.mxu1 %v10355_v17  ;;  %6021 = vmatmul.msk.f32.vlgmr.msra.gmra.mxu0 %vm4504_vm12, %v6019_v38  ;;  %v7181_v17 = vunpack.i.l.bf16 %v9817_v47  ;;  %v5301_v19 = vsel %vm982_vm6, %v7072_v56, %v7136_v57  ;;  %v5451_v39 = vsel %vm1073_vm7, %v7146_v2, %v7147_v11 }
 0x805   : > { %5341 = vmatpush.msrb.mxu2 %v5302_v23  ;;  %6023 = vmatmul.msk.f32.vlgmr.msrb.gmra.mxu1 %vm4504_vm12, %v6019_v38  ;;  %v5148_v55 = vsel %vm891_vm5, %v7062_v49, %v7166_v41  ;;  %v5155_v25 = vsel %vm891_vm5, %v7156_v35, %v7167_v13  ;;  %v9907_v35 = vpop.permute.xlu1 %7194  ;;  %v5149_v49 = vsel %vm891_vm5, %v7166_v41, %v7126_v21 }
 0x806   : > { %6025 = vmatmul.msk.f32.vlgmr.msra.gmra.mxu2 %vm4504_vm12, %v6019_v38  ;;  %5236 = vmatpush.msra.mxu1 %v7167_v13  ;;  %v5455_v38 = vsel %vm1073_vm7, %v7201_v58, %v7202_v50  ;;  %v5147_v23 = vsel %vm891_vm5, %v10359_v29, %v7127_v54  ;;  %v7176_v13 = vunpack.i.l.bf16 %v9804_v44  ;;  %v5145_v41 = vsel %vm891_vm5, %v7042_v9, %v7046_v31 }
 0x807   : > { %5342 = vmatpush.msrb.mxu2 %v5300_v7  ;;  %5193 = vmatpush.msrb.mxu3 %v5148_v55  ;;  %v5454_v7 = vsel %vm1073_vm7, %v7181_v17, %v7201_v58  ;;  %v7182_v55 = vunpack.i.h.bf16 %v9817_v47  ;;  %v7196_v9 = vunpack.i.l.bf16 %v9907_v35  ;;  %v5299_v47 = vsel %vm982_vm6, %v7087_v46, %v7137_v12 }
 0x808   : > { %5213 = vmatpush.msrb.mxu0 %v5155_v25  ;;  %5237 = vmatpush.msra.mxu1 %v7106_v36  ;;  %v6028_v25 = vld [vmem:[%s10173_s10 + $0x58] sm:$0xff]  ;;  %v5449_v16 = vsel %vm1073_vm7, %v7176_v13, %v7177_v28 }
 0x809   : > { %5343 = vmatpush.msrb.mxu2 %v5298_v30  ;;  %5194 = vmatpush.msrb.mxu3 %v10357_v20  ;;  %v7206_v20 = vunpack.i.l.bf16 %v9935_v45 }
 0x80a   : > { %5214 = vmatpush.msrb.mxu0 %v5153_v43  ;;  %5238 = vmatpush.msra.mxu1 %v7107_v37  ;;  %v9922_v27 = vpop.permute.xlu0 %7169  ;;  %v7197_v37 = vunpack.i.h.bf16 %v9907_v35  ;;  %v10010_v43 = vpop.permute.xlu2 %7214 }
 0x80b   : > { %5344 = vmatpush.msrb.mxu2 %v5296_v33  ;;  %5195 = vmatpush.msrb.mxu3 %v5144_v40  ;;  %v7171_v36 = vunpack.i.l.bf16 %v9922_v27  ;;  %v7172_v30 = vunpack.i.h.bf16 %v9922_v27  ;;  %v5450_v59 = vsel %vm1073_vm7, %v7206_v20, %v7146_v2  ;;  %v5728_v20 = vld [vmem:[#allocation2 + $0x28] sm:$0xff] }
 0x80c   : > { %5215 = vmatpush.msrb.mxu0 %v5151_v63  ;;  %6029 = vmatmul.msk.f32.vlgmr.msrb.gmra.mxu3 %vm4504_vm12, %v9905_v51  ;;  %v5724_v63 = vld [vmem:[#allocation2 + $0x8] sm:$0xff] }
 0x80d   : > { %6022 = vmatmul.msk.f32.gmra.mxu0 %vm4504_vm12, %v6020_v26  ;;  %6024 = vmatmul.msk.f32.gmra.mxu1 %vm4504_vm12, %v6020_v26  ;;  %v9987_v52 = vpop.permute.xlu1 %7219  ;;  %v5297_v3 = vsel %vm982_vm6, %v7112_v15, %v7171_v36  ;;  %v5295_v46 = vsel %vm982_vm6, %v7117_v0, %v7172_v30  ;;  %v7207_v15 = vunpack.i.h.bf16 %v9935_v45 }
 0x80e   : > { %6026 = vmatmul.msk.f32.gmra.mxu2 %vm4504_vm12, %v6020_v26  ;;  %5239 = vmatpush.msra.mxu1 %v7126_v21  ;;  %v5445_v26 = vsel %vm1073_vm7, %v7196_v9, %v7197_v37  ;;  %v7221_v1 = vunpack.i.l.bf16 %v9987_v52  ;;  %v7217_v21 = vunpack.i.h.bf16 %v10010_v43 }
 0x80f   : > { %5345 = vmatpush.msrb.mxu2 %v5294_v62  ;;  %5363 = vmatpush.msra.mxu3 %v5305_v48  ;;  %v5448_v32 = vsel %vm1073_vm7, %v7207_v15, %v7176_v13 }
 0x810   : > { %5216 = vmatpush.msrb.mxu0 %v5149_v49  ;;  %5240 = vmatpush.msra.mxu1 %v7127_v54 }
 0x811   : > { %5513 = vmatpush.msra.mxu2 %v5455_v38  ;;  %5364 = vmatpush.msra.mxu3 %v5303_v61 }
 0x812   : > { %5217 = vmatpush.msrb.mxu0 %v5147_v23  ;;  %5241 = vmatpush.msra.mxu1 %v7046_v31  ;;  %v9985_v56 = vpop.permute.xlu0 %7184  ;;  %v10053_v58 = vpop.permute.xlu2 %7229  ;;  %v6044_v23 = vld [vmem:[%s10173_s10 + $0x78] sm:$0xff] }
 0x813   : > { %5514 = vmatpush.msra.mxu2 %v5453_v34  ;;  %5365 = vmatpush.msra.mxu3 %v5301_v19  ;;  %v7187_v8 = vunpack.i.h.bf16 %v9985_v56  ;;  %v7186_v10 = vunpack.i.l.bf16 %v9985_v56  ;;  %v7231_v62 = vunpack.i.l.bf16 %v10053_v58  ;;  %v7232_v34 = vunpack.i.h.bf16 %v10053_v58 }
 0x814   : > { %5218 = vmatpush.msrb.mxu0 %v5145_v41  ;;  %5490 = vmatpush.msrb.mxu1 %v5454_v7 }
 0x815   : > { %5515 = vmatpush.msra.mxu2 %v5451_v39  ;;  %6031 = vmatmul.msk.f32.vlgmr.msrb.gmra.mxu0 %vm4504_vm12, %v9905_v51  ;;  %v5452_v33 = vsel %vm1073_vm7, %v7187_v8, %v7141_v60  ;;  %v7225_v40 = vpop.permute.xlu1 %7224  ;;  %v5727_v39 = vld [vmem:[#allocation2 + $0x20] sm:$0xff] }
 0x816   : > { %6033 = vmatmul.msk.f32.vlgmr.msra.gmra.mxu1 %vm4504_vm12, %v9905_v51  ;;  %6037 = vmatmul.msk.f32.vlgmr.msrb.gmra.mxu2 %vm4504_vm12, %v9983_v18  ;;  %v5447_v51 = vsel %vm1073_vm7, %v7182_v55, %v7186_v10  ;;  %v7227_v60 = vunpack.i.h.bf16 %v7225_v40  ;;  %v7226_v54 = vunpack.i.l.bf16 %v7225_v40 }
 0x817   : > { %5366 = vmatpush.msra.mxu3 %v5299_v47  ;;  %5386 = vmatpush.msra.mxu0 %v7191_v22  ;;  %v5725_v47 = vld [vmem:[#allocation2 + $0x10] sm:$0xff] }
 0x818   : > { %5516 = vmatpush.msra.mxu2 %v5449_v16  ;;  %6030 = vmatmul.msk.f32.gmra.mxu3 %vm4504_vm12, %v6028_v25  ;;  %v5602_v48 = vsel %vm1164_vm8, %v7226_v54, %v7227_v60 }
 0x819   : > { %5367 = vmatpush.msra.mxu3 %v5297_v3  ;;  %5387 = vmatpush.msra.mxu0 %v7192_v14  ;;  %v7216_v14 = vunpack.i.l.bf16 %v10010_v43 }
 0x81a   : > { %5491 = vmatpush.msrb.mxu1 %v5452_v33  ;;  %5517 = vmatpush.msra.mxu2 %v5447_v51  ;;  %v7210_v53 = vpop.permute.xlu0 %7209  ;;  %v7250_v49 = vpop.permute.xlu2 %7249 }
 0x81b   : > { %5368 = vmatpush.msra.mxu3 %v5295_v46  ;;  %5388 = vmatpush.msra.mxu0 %v7136_v57  ;;  %v7211_v0 = vunpack.i.l.bf16 %v7210_v53  ;;  %v7212_v27 = vunpack.i.h.bf16 %v7210_v53  ;;  %v7251_v29 = vunpack.i.l.bf16 %v7250_v49  ;;  %v7252_v19 = vunpack.i.h.bf16 %v7250_v49  ;;  %v4603_v51 = vpop.f32.mrf.mxu3 }
 0x81c   : > { %5492 = vmatpush.msrb.mxu1 %v5450_v59  ;;  %5518 = vmatpush.msra.mxu2 %v5445_v26 }
 0x81d   : > { %5536 = vmatpush.msrb.mxu3 %v7202_v50  ;;  %5389 = vmatpush.msra.mxu0 %v7137_v12  ;;  %v7222_v50 = vunpack.i.h.bf16 %v9987_v52  ;;  %v5446_v24 = vsel %vm1073_vm7, %v7211_v0, %v7182_v55  ;;  %v5444_v44 = vsel %vm1073_vm7, %v7212_v27, %v7196_v9  ;;  %v7245_v57 = vpop.permute.xlu1 %7244  ;;  %v5726_v52 = vld [vmem:[#allocation2 + $0x18] sm:$0xff]  ;;  %v5597_v7 = vsel %vm1164_vm8, %v7252_v19, %v7231_v62  ;;  %v6051_v55 = vld [vmem:[%s10173_s10 + $0x80] sm:$0xff]  ;;  %v5706_v9 = vld [vmem:[%s10174_s11 + $0x8] sm:$0xff] }
 0x81e   : > { %6032 = vmatmul.msk.f32.gmra.mxu0 %vm4504_vm12, %v6028_v25  ;;  %6034 = vmatmul.msk.f32.gmra.mxu1 %vm4504_vm12, %v6028_v25  ;;  %v7247_v2 = vunpack.i.h.bf16 %v7245_v57  ;;  %v7246_v38 = vunpack.i.l.bf16 %v7245_v57 }
 0x81f   : > { %5537 = vmatpush.msrb.mxu3 %v7142_v6  ;;  %6038 = vmatmul.msk.f32.gmra.mxu2 %vm4504_vm12, %v10042_v5  ;;  %v5603_v35 = vsel %vm1164_vm8, %v7227_v60, %v7222_v50 }
 0x820   : > { %5390 = vmatpush.msra.mxu0 %v7171_v36  ;;  %5686 = vmatpush.msrb.mxu2 %v7221_v1  ;;  %v5598_v41 = vsel %vm1164_vm8, %v7246_v38, %v7247_v2 }
 0x821   : > { %5493 = vmatpush.msrb.mxu1 %v5448_v32  ;;  %5538 = vmatpush.msrb.mxu3 %v7147_v11  ;;  %v5723_v11 = vld [vmem:[#allocation2] sm:$0xff] }
 0x822   : > { %6039 = vmatmul.msk.f32.vlgmr.msra.gmra.mxu3 %vm4504_vm12, %v9983_v18  ;;  %5391 = vmatpush.msra.mxu0 %v7172_v30  ;;  %v7235_v22 = vpop.permute.xlu0 %7234  ;;  %v6052_v30 = vld [vmem:[%s10173_s10 + $0x88] sm:$0xff] }
 0x823   : > { %5687 = vmatpush.msrb.mxu2 %v7222_v50  ;;  %5539 = vmatpush.msrb.mxu3 %v7177_v28  ;;  %v7236_v6 = vunpack.i.l.bf16 %v7235_v22  ;;  %v7237_v45 = vunpack.i.h.bf16 %v7235_v22 }
 0x824   : > { %5494 = vmatpush.msrb.mxu1 %v5446_v24  ;;  %5743 = vrot.lane.b32.xlu1 %v5724_v63, %s7326_s30 }
 0x825   : > { %5688 = vmatpush.msrb.mxu2 %v7216_v14  ;;  %5540 = vmatpush.msrb.mxu3 %v7186_v10  ;;  %v5604_v42 = vsel %vm1164_vm8, %v7217_v21, %v7236_v6  ;;  %v5605_v31 = vsel %vm1164_vm8, %v7236_v6, %v7221_v1  ;;  %v5599_v56 = vsel %vm1164_vm8, %v7247_v2, %v7237_v45 }
 0x826   : > { %5495 = vmatpush.msrb.mxu1 %v5444_v44  ;;  %6041 = vmatmul.msk.f32.vlgmr.msra.gmra.mxu0 %vm4504_vm12, %v9983_v18  ;;  %v5596_v18 = vsel %vm1164_vm8, %v7251_v29, %v7252_v19 }
 0x827   : > { %5541 = vmatpush.msrb.mxu3 %v7197_v37  ;;  %6045 = vmatmul.msk.f32.vlgmr.msrb.gmra.mxu1 %vm4504_vm12, %v6043_v4 }
 0x828   : > { %6047 = vmatmul.msk.f32.vlgmr.msra.gmra.mxu2 %vm4504_vm12, %v6043_v4  ;;  %5640 = vmatpush.msrb.mxu0 %v5604_v42 }
 0x829   : > { %5689 = vmatpush.msrb.mxu2 %v7237_v45  ;;  %5663 = vmatpush.msra.mxu1 %v5605_v31 }
 0x82a   : > { %6040 = vmatmul.msk.f32.gmra.mxu3 %vm4504_vm12, %v10042_v5  ;;  %5641 = vmatpush.msrb.mxu0 %v5602_v48  ;;  %v7240_v61 = vpop.permute.xlu0 %7239 }
 0x82b   : > { %5690 = vmatpush.msrb.mxu2 %v7231_v62  ;;  %5664 = vmatpush.msra.mxu1 %v5603_v35  ;;  %v7242_v12 = vunpack.i.h.bf16 %v7240_v61  ;;  %v7241_v17 = vunpack.i.l.bf16 %v7240_v61 }
 0x82c   : > { %5741 = vrot.lane.b32.xlu0 %v5723_v11, %s7326_s30  ;;  %5749 = vrot.lane.b32.xlu1 %v5727_v39, %s7326_s30  ;;  %v5710_v39 = vpop.permute.xlu1 %5709 }
 0x82d   : > { %5691 = vmatpush.msrb.mxu2 %v7242_v12  ;;  %v5600_v28 = vsel %vm1164_vm8, %v7232_v34, %v7241_v17  ;;  %v5601_v13 = vsel %vm1164_vm8, %v7241_v17, %v7216_v14  ;;  %5714 = vperm.xlu2 %7258, %v5706_v9  }
 0x82e   : > { %6042 = vmatmul.msk.f32.gmra.mxu0 %vm4504_vm12, %v10042_v5  ;;  %5665 = vmatpush.msra.mxu1 %v5601_v13 }
 0x82f   : > { %6046 = vmatmul.msk.f32.gmra.mxu1 %vm4504_vm12, %v6044_v23  ;;  %5642 = vmatpush.msrb.mxu0 %v5600_v28 }
 0x830   : > { %6048 = vmatmul.msk.f32.gmra.mxu2 %vm4504_vm12, %v6044_v23  ;;  %5666 = vmatpush.msra.mxu1 %v5599_v56 }
 0x831   : > { %5643 = vmatpush.msrb.mxu0 %v5598_v41 }
 0x832   : > { %6049 = vmatmul.msk.f32.vlgmr.msrb.gmra.mxu3 %vm4504_vm12, %v6043_v4  ;;  %v7255_v36 = vpop.permute.xlu0 %7254  ;;  %5667 = vmatpush.msra.mxu1 %v5597_v7 }
 0x833   : > { %5644 = vmatpush.msrb.mxu0 %v5596_v18  ;;  %v7257_v8 = vunpack.i.h.bf16 %v7255_v36  ;;  %v7256_v10 = vunpack.i.l.bf16 %v7255_v36 }
 0x834   : > { %5747 = vrot.lane.b32.xlu0 %v5726_v52, %s7326_s30  ;;  %v4606_v59 = vpop.f32.mrf.mxu3 }
 0x835   : > { %v5594_v25 = vsel %vm1164_vm8, %v7256_v10, %v7257_v8  ;;  %v5595_v37 = vsel %vm1164_vm8, %v7257_v8, %v7242_v12  ;;  %5745 = vrot.lane.b32.xlu2 %v5725_v47, %s7326_s30 }
 0x836   : > { %5645 = vmatpush.msrb.mxu0 %v5594_v25  ;;  %5668 = vmatpush.msra.mxu1 %v5595_v37 }
 0x837   : > { %6053 = vmatmul.msk.f32.vlgmr.msrb.gmra.mxu0 %vm4504_vm12, %v6051_v55  ;;  %6055 = vmatmul.msk.f32.vlgmr.msra.gmra.mxu1 %vm4504_vm12, %v6051_v55 }
 0x838   : > { %6057 = vmatmul.msk.f32.vlgmr.msrb.gmra.mxu2 %vm4504_vm12, %v6051_v55 }
 0x83a   : > { %6050 = vmatmul.msk.f32.gmra.mxu3 %vm4504_vm12, %v6044_v23 }
 0x83d   : > { %5751 = vrot.lane.b32.xlu2 %v5728_v20, %s7326_s30 }
 0x83f   : > { %6054 = vmatmul.msk.f32.gmra.mxu0 %vm4504_vm12, %v6052_v30  ;;  %6056 = vmatmul.msk.f32.gmra.mxu1 %vm4504_vm12, %v6052_v30 }
 0x840   : > { %6058 = vmatmul.msk.f32.gmra.mxu2 %vm4504_vm12, %v6052_v30 }
 0x84e   : > { %v4528_v43 = vpop.f32.mrf.mxu0  ;;  %v4551_v16 = vpop.f32.mrf.mxu1 }
 0x84f   : > { %v4604_v19 = vadd.f32 %v4603_v51, %v4528_v43 }
 0x855   : > { %v4574_v33 = vpop.f32.mrf.mxu2 }
 0x857   : > { %v4531_v3 = vpop.f32.mrf.mxu0  ;;  %v4554_v46 = vpop.f32.mrf.mxu1 }
 0x858   : > { %v4607_v25 = vadd.f32 %v4606_v59, %v4531_v3 }
 0x85e   : > { %v4577_v26 = vpop.f32.mrf.mxu2 }
 0x860   : > { %v4649_v53 = vpop.f32.mrf.mxu1 }
 0x861   : > { %v4626_v15 = vpop.f32.mrf.mxu0  ;;  %v4650_v5 = vadd.f32 %v4649_v53, %v4574_v33 }
 0x862   : > { %v4627_v0 = vadd.f32 %v4626_v15, %v4551_v16 }
 0x867   : > { %v4747_v1 = vpop.f32.mrf.mxu2 }
 0x868   : > { %v4652_v40 = vpop.f32.mrf.mxu1  ;;  %v4770_v58 = vpop.f32.mrf.mxu3  ;;  %v4799_v28 = vadd.f32 %v4747_v1, %v4604_v19 }
 0x869   : > { %v4629_v32 = vpop.f32.mrf.mxu0  ;;  %v10124_v50 = vadd.f32 %v4652_v40, %v4577_v26  ;;  %v4800_v41 = vadd.f32 %v4770_v58, %v4627_v0 }
 0x86a   : > { %v4630_v27 = vadd.f32 %v4629_v32, %v4554_v46 }
 0x86f   : > { %v4750_v24 = vpop.f32.mrf.mxu2 }
 0x870   : > { %v4897_v63 = vpop.f32.mrf.mxu1  ;;  %v4773_v22 = vpop.f32.mrf.mxu3  ;;  %v4802_v47 = vadd.f32 %v4750_v24, %v4607_v25 }
 0x871   : > { %v4793_v14 = vpop.f32.mrf.mxu0  ;;  %v4949_v56 = vadd.f32 %v4897_v63, %v4799_v28  ;;  %v4803_v16 = vadd.f32 %v4773_v22, %v4630_v27 }
 0x872   : > { %v4801_v37 = vadd.f32 %v4793_v14, %v4650_v5 }
 0x878   : > { %v4920_v21 = vpop.f32.mrf.mxu2  ;;  %v4900_v4 = vpop.f32.mrf.mxu1 }
 0x879   : > { %v4796_v6 = vpop.f32.mrf.mxu0  ;;  %v4943_v60 = vpop.f32.mrf.mxu3  ;;  %v4950_v52 = vadd.f32 %v4920_v21, %v4800_v41  ;;  %v4952_v26 = vadd.f32 %v4900_v4, %v4802_v47 }
 0x87a   : > { %v4951_v20 = vadd.f32 %v4943_v60, %v4801_v37  ;;  %v4804_v24 = vadd.f32 %v4796_v6, %v10124_v50 }
 0x880   : > { %v4923_v54 = vpop.f32.mrf.mxu2 }
 0x881   : > { %v5047_v44 = vpop.f32.mrf.mxu0  ;;  %v4946_v42 = vpop.f32.mrf.mxu3  ;;  %v4953_v40 = vadd.f32 %v4923_v54, %v4803_v16 }
 0x882   : > { %v5070_v45 = vpop.f32.mrf.mxu1  ;;  %v5099_v8 = vadd.f32 %v5047_v44, %v4949_v56  ;;  %v4954_v44 = vadd.f32 %v4946_v42, %v4804_v24 }
 0x883   : > { %v5100_v55 = vadd.f32 %v5070_v45, %v4950_v52 }
 0x887   : > { %v10130_v13 = vpop.permute.xlu2 %5714 }
 0x889   : > { %v5093_v31 = vpop.f32.mrf.mxu2 }
 0x88a   : > { %v5050_v57 = vpop.f32.mrf.mxu0  ;;  %v5073_v62 = vpop.f32.mrf.mxu1  ;;  %v5101_v53 = vadd.f32 %v5093_v31, %v4951_v20 }
 0x88b   : > { %v5102_v3 = vadd.f32 %v5050_v57, %v4952_v26  ;;  %v5103_v21 = vadd.f32 %v5073_v62, %v4953_v40 }
 0x88f   : > { %v5197_v11 = vpop.f32.mrf.mxu3  ;;  %v5746_v1 = vpop.permute.xlu2 %5745 }
 0x890   : > { %v5249_v9 = vadd.f32 %v5197_v11, %v5099_v8 }
 0x891   : > { %v10126_v48 = vpop.f32.mrf.mxu2 }
 0x892   : > { %v5220_v35 = vpop.f32.mrf.mxu0  ;;  %v5104_v50 = vadd.f32 %v10126_v48, %v4954_v44 }
 0x893   : > { %v5243_v2 = vpop.f32.mrf.mxu1  ;;  %v5250_v30 = vadd.f32 %v5220_v35, %v5100_v55 }
 0x894   : > { %v5251_v59 = vadd.f32 %v5243_v2, %v5101_v53 }
 0x896   : > { %v5744_v46 = vpop.permute.xlu1 %5743 }
 0x897   : > { %v5754_v57 = vsel %vm800_vm4, %v5744_v46, %v5746_v1  ;;  %v5752_v8 = vpop.permute.xlu2 %5751 }
 0x899   : > { %v5347_v38 = vpop.f32.mrf.mxu2 }
 0x89a   : > { %v5399_v43 = vadd.f32 %v5347_v38, %v5249_v9 }
 0x89b   : > { %v5200_v49 = vpop.f32.mrf.mxu3  ;;  %v5223_v61 = vpop.f32.mrf.mxu0 }
 0x89c   : > { %v10128_v34 = vpop.f32.mrf.mxu1  ;;  %v5252_v22 = vadd.f32 %v5200_v49, %v5102_v3  ;;  %v5253_v45 = vadd.f32 %v5223_v61, %v5103_v21 }
 0x89d   : > { %v5254_v19 = vadd.f32 %v10128_v34, %v5104_v50 }
 0x89e   : > { %v5742_v0 = vpop.permute.xlu0 %5741 }
 0x89f   : > { %v5753_v54 = vsel %vm800_vm4, %v5742_v0, %v5744_v46 }
 0x8a2   : > { %v5350_v29 = vpop.f32.mrf.mxu2 }
 0x8a3   : > { %v5393_v23 = vpop.f32.mrf.mxu0  ;;  %v5402_v11 = vadd.f32 %v5350_v29, %v5252_v22 }
 0x8a4   : > { %v5497_v12 = vpop.f32.mrf.mxu1  ;;  %v5401_v60 = vadd.f32 %v5393_v23, %v5251_v59  ;;  %v5750_v23 = vpop.permute.xlu1 %5749 }
 0x8a5   : > { %v5370_v17 = vpop.f32.mrf.mxu3  ;;  %v5549_v15 = vadd.f32 %v5497_v12, %v5399_v43 }
 0x8a6   : > { %v5400_v33 = vadd.f32 %v5370_v17, %v5250_v30  ;;  %v5748_v56 = vpop.permute.xlu0 %5747  ;;  %v5756_v30 = vsel %vm800_vm4, %v5750_v23, %v5752_v8 }
 0x8a7   : > { %v5755_v34 = vsel %vm800_vm4, %v5748_v56, %v5750_v23 }
 0x8ab   : > { %v5520_v18 = vpop.f32.mrf.mxu2  ;;  %v10132_v7 = vpop.f32.mrf.mxu0 }
 0x8ac   : > { %v5500_v10 = vpop.f32.mrf.mxu1  ;;  %v5550_v32 = vadd.f32 %v5520_v18, %v5400_v33  ;;  %v5404_v48 = vadd.f32 %v10132_v7, %v5254_v19 }
 0x8ad   : > { %v5373_v36 = vpop.f32.mrf.mxu3  ;;  %v5552_v6 = vadd.f32 %v5500_v10, %v5402_v11 }
 0x8ae   : > { %v5403_v2 = vadd.f32 %v5373_v36, %v5253_v45 }
 0x8b3   : > { %v5523_v51 = vpop.f32.mrf.mxu2 }
 0x8b4   : > { %v5647_v63 = vpop.f32.mrf.mxu0  ;;  %v5670_v14 = vpop.f32.mrf.mxu1  ;;  %v5553_v49 = vadd.f32 %v5523_v51, %v5403_v2 }
 0x8b5   : > { %v5543_v58 = vpop.f32.mrf.mxu3  ;;  %v5699_v5 = vadd.f32 %v5647_v63, %v5549_v15  ;;  %v5700_v27 = vadd.f32 %v5670_v14, %v5550_v32 }
 0x8b6   : > { %v5551_v35 = vadd.f32 %v5543_v58, %v5401_v60 }
 0x8b7   : > { %v5717_v4 = vadd.f32 %v5710_v39, %v5699_v5  ;;  %v5718_v31 = vadd.f32 %v5710_v39, %v5700_v27 }
 0x8b9   : > { %v5729_v38 = vmul.f32 0.2, %v5717_v4  ;;  %v5730_v12 = vmul.f32 0.2, %v5718_v31 }
 0x8bb   : > { %v5693_v17 = vpop.f32.mrf.mxu2  ;;  %v5763_v62 = vadd.f32 %v5753_v54, %v5729_v38  ;;  %v5764_v61 = vadd.f32 %v5754_v57, %v5730_v12 }
 0x8bc   : > { %v5701_v42 = vadd.f32 %v5693_v17, %v5551_v35  ;;  %v5650_v29 = vpop.f32.mrf.mxu0  ;;  %v5673_v18 = vpop.f32.mrf.mxu1 }
 0x8bd   : > { %5769 = vst [vmem:[%s10142_s17] sm:$0xff] %v5763_v62  ;;  %v5702_v41 = vadd.f32 %v5650_v29, %v5552_v6  ;;  %v5546_v52 = vpop.f32.mrf.mxu3  ;;  %v5703_v36 = vadd.f32 %v5673_v18, %v5553_v49 }
 0x8be   : > { %v5719_v28 = vadd.f32 %v5710_v39, %v5701_v42  ;;  %5770 = vst [vmem:[%s10142_s17 + $0x8] sm:$0xff] %v5764_v61  ;;  %v5554_v39 = vadd.f32 %v5546_v52, %v5404_v48 }
 0x8bf   : > { %v5720_v55 = vadd.f32 %v10130_v13, %v5702_v41  ;;  %v5721_v25 = vadd.f32 %v10130_v13, %v5703_v36 }
 0x8c0   : > { %v5731_v10 = vmul.f32 0.2, %v5719_v28 }
 0x8c1   : > { %v5732_v9 = vmul.f32 0.2, %v5720_v55  ;;  %v5733_v47 = vmul.f32 0.2, %v5721_v25 }
 0x8c2   : > { %v5765_v37 = vadd.f32 %v5746_v1, %v5731_v10 }
 0x8c3   : > { %v5696_v20 = vpop.f32.mrf.mxu2  ;;  %v5766_v43 = vadd.f32 %v5755_v34, %v5732_v9  ;;  %v5767_v16 = vadd.f32 %v5756_v30, %v5733_v47 }
 0x8c4   : > { %5771 = vst.msk [vmem:[%s10142_s17 + $0x10] sm:$0xff] %vm2310_vm11, %v5765_v37  ;;  %v5704_v7 = vadd.f32 %v5696_v20, %v5554_v39 }
 0x8c5   : > { %5772 = vst [vmem:[%s10142_s17 + $0x18] sm:$0xff] %v5766_v43 }
 0x8c6   : > { %v5722_v33 = vadd.f32 %v10130_v13, %v5704_v7  ;;  %5773 = vst [vmem:[%s10142_s17 + $0x20] sm:$0xff] %v5767_v16 }
 0x8c8   : > { %v5734_v51 = vmul.f32 0.2, %v5722_v33 }
 0x8ca   : > { %v5768_v46 = vadd.f32 %v5752_v8, %v5734_v51 }
 0x8cc   : > { %5774 = vst.msk [vmem:[%s10142_s17 + $0x28] sm:$0xff] %vm2310_vm11, %v5768_v46 }
 0x8cd PF: > { %s22_s21 = sadd.s32 1, %s7321_s21  }
 0x8ce   : > { %p19_p4 = scmp.ge.s32.totalorder %s22_s21, 4  }
 0x8d0   :  { %21 = sbr.rel (!%p19_p4) target bundleno = 1 (0x1), region = 138 }

</bundles_post_ra>
